<compile_context>
chip_gen: v7x
topology: tpu7x:2x2x1
jax: 0.10.0
libtpu: 0.0.40
codegen_flags: <defaults>
</compile_context>

<pallas_src>
import functools
import math

import jax
import jax.numpy as jnp
import numpy as np
from jax.experimental import pallas as pl
from jax.experimental.pallas import tpu as pltpu


# ----------------------------- model config ---------------------------------
class Args:
    dim = 32
    n_layers = 2
    n_heads = 4
    vocab_size = 64
    multiple_of = 16
    norm_eps = 1e-5
    max_seq_len = 64


_NEG_BIG = float(np.finfo(np.float32).min)
_VMEM = pl.BlockSpec(memory_space=pltpu.MemorySpace.VMEM)
_MAX_UNROLL_LAYERS = 4          # statically unroll layer loop up to this depth


# ----------------------------- fused Pallas kernel ---------------------------
def _fused_fwd_kernel(hf_ref, cos_ref, sin_ref,
                      wattn_ref, wo_ref, w13_ref, w2_ref, wout_ref,
                      logits_ref,
                      *, B, S, D, H, hd, hidden, L, eps):
    """Full reversible-transformer forward.

    hf_ref      : (B*S, D)         token embeddings (x1 == x2 == hf)
    cos/sin_ref : (B*S, D)         RoPE tables, pre-tiled over batch
    wattn_ref   : (L, D, 5D)       [wq*scale | wk | wv | wq*scale@R | wk@R],
                                   attn-norm weight folded in
    wo_ref      : (L, D, D)
    w13_ref     : (L, D, 2*hidden) [w1 | w3], ffn-norm weight folded in
    w2_ref      : (L, hidden, D)
    wout_ref    : (D, Vpad)        final-norm weight folded in, vocab padded to 128
    logits_ref  : (B*S, Vpad)      lane-dense output
    """
    hf = hf_ref[...]                                     # (B*S, D)
    cos = cos_ref[...]                                   # (B*S, D)
    sin = sin_ref[...]                                   # (B*S, D)

    row = jax.lax.broadcasted_iota(jnp.int32, (S, S), 0)
    col = jax.lax.broadcasted_iota(jnp.int32, (S, S), 1)
    causal = col <= row                                  # built once, reused every layer

    def rmsnorm_unit(x):                                 # weight folded into next matmul
        ms = jnp.mean(x * x, axis=-1, keepdims=True)
        return x * jax.lax.rsqrt(ms + eps)

    def layer_body(l, carry):
        x1, x2 = carry

        # ---- f: y1 = x1 + Attention(RMSNorm(x2)) ------------------------
        xn = rmsnorm_unit(x2)                            # (B*S, D)
        proj = jnp.dot(xn, wattn_ref[l],
                       preferred_element_type=jnp.float32)      # (B*S, 5D)
        # RoPE (1/sqrt(hd) and rotation matrix already folded into weights)
        q = proj[:, 0:D] * cos + proj[:, 3 * D:4 * D] * sin      # (B*S, D)
        k = proj[:, D:2 * D] * cos + proj[:, 4 * D:5 * D] * sin  # (B*S, D)
        v = proj[:, 2 * D:3 * D]                                  # (B*S, D)
        wo_l = wo_ref[l]                                 # (D, D)

        y1_rows = []
        for b in range(B):                               # static, tiny
            r0 = b * S
            qb = q[r0:r0 + S, :]
            kb = k[r0:r0 + S, :]
            vb = v[r0:r0 + S, :]
            head_outs = []
            for h in range(H):                           # static, tiny
                c0 = h * hd
                qh = qb[:, c0:c0 + hd]
                kh = kb[:, c0:c0 + hd]
                vh = vb[:, c0:c0 + hd]
                s = jax.lax.dot_general(qh, kh, (((1,), (1,)), ((), ())),
                                        preferred_element_type=jnp.float32)
                s = jnp.where(causal, s, _NEG_BIG)
                m = jnp.max(s, axis=-1, keepdims=True)
                p = jnp.exp(s - m)
                p = p * pl.reciprocal(jnp.sum(p, axis=-1, keepdims=True),
                                      approx=True)
                head_outs.append(jnp.dot(p, vh,
                                         preferred_element_type=jnp.float32))
            ob = jnp.concatenate(head_outs, axis=-1)     # (S, D)
            y1_rows.append(x1[r0:r0 + S, :] +
                           jnp.dot(ob, wo_l, preferred_element_type=jnp.float32))
        y1 = jnp.concatenate(y1_rows, axis=0)            # (B*S, D)

        # ---- g: y2 = x2 + SwiGLU(RMSNorm(y1)) ---------------------------
        yn = rmsnorm_unit(y1)
        ag = jnp.dot(yn, w13_ref[l],
                     preferred_element_type=jnp.float32)       # (B*S, 2*hidden)
        a = ag[:, 0:hidden]
        g = ag[:, hidden:2 * hidden]
        act = (a * (1.0 / (1.0 + jnp.exp(-a)))) * g            # silu(a) * g
        y2 = x2 + jnp.dot(act, w2_ref[l], preferred_element_type=jnp.float32)
        return (y1, y2)

    if L <= _MAX_UNROLL_LAYERS:
        carry = (hf, hf)
        for l in range(L):                               # static unroll: static weight
            carry = layer_body(l, carry)                 # slices, full LLO visibility
        x1, x2 = carry
    else:
        x1, x2 = jax.lax.fori_loop(0, L, layer_body, (hf, hf))

    # ---- final head: logits = RMSNorm((x1 + x2)/2) @ Wout ----------------
    hm = (x1 + x2) * 0.5
    hn = rmsnorm_unit(hm)                                # final-norm weight folded in Wout
    logits_ref[...] = jnp.dot(hn, wout_ref[...],
                              preferred_element_type=jnp.float32)


# ----------------------------- parameter / rope setup ------------------------
def ffn_hidden_dim(dim, multiple_of):
    hidden = int(2 * (4 * dim) / 3)
    return multiple_of * ((hidden + multiple_of - 1) // multiple_of)


def init_params(key, args):
    D = args.dim
    hidden = ffn_hidden_dim(D, args.multiple_of)
    nkeys = 2 + args.n_layers * 7
    keys = iter(jax.random.split(key, nkeys))

    def nrm(k, shape, fan_in):
        return (jax.random.normal(k, shape, jnp.float32) / np.sqrt(fan_in)).astype(jnp.float32)

    params = {
        "emb": nrm(next(keys), (args.vocab_size, D), D),
        "layers": [],
        "norm": jnp.ones((1, D), jnp.float32),
    }
    for _ in range(args.n_layers):
        params["layers"].append(dict(
            wq=nrm(next(keys), (D, D), D),
            wk=nrm(next(keys), (D, D), D),
            wv=nrm(next(keys), (D, D), D),
            wo=nrm(next(keys), (D, D), D),
            w1=nrm(next(keys), (D, hidden), D),
            w3=nrm(next(keys), (D, hidden), D),
            w2=nrm(next(keys), (hidden, D), hidden),
            attn_norm=jnp.ones((1, D), jnp.float32),
            ffn_norm=jnp.ones((1, D), jnp.float32),
        ))
    params["wout"] = nrm(next(keys), (D, args.vocab_size), D)
    return params


def precompute_rope(args, seqlen, theta=10000.0):
    """(cos, sin) of shape (seqlen, dim) in interleaved/head-tiled layout, plus the
    block-diagonal pair-rotation matrix R (dim, dim) used for offline weight folding."""
    D, H = args.dim, args.n_heads
    hd = D // H
    inv = 1.0 / theta ** (np.arange(0, hd, 2, dtype=np.float32) / hd)
    t = np.arange(seqlen, dtype=np.float32)
    ang = np.outer(t, inv)                                  # (S, hd//2)
    cos_hd = np.stack([np.cos(ang), np.cos(ang)], -1).reshape(seqlen, hd)
    sin_hd = np.stack([np.sin(ang), np.sin(ang)], -1).reshape(seqlen, hd)
    cos = np.tile(cos_hd, (1, H))                           # (S, D)
    sin = np.tile(sin_hd, (1, H))
    R = np.zeros((D, D), np.float32)
    for i in range(0, D, 2):
        R[i + 1, i] = -1.0
        R[i, i + 1] = 1.0
    return jnp.asarray(cos), jnp.asarray(sin), jnp.asarray(R)


def prepare_fused_weights(params, args, rot):
    """One-time offline folding: stack per-layer weights along a leading layer axis,
    fold RoPE rotation, attention scale and RMSNorm weights into the matmul weights,
    concatenate the five attention projections into one wide weight, and pad the
    vocab projection to a lane-dense 128 columns."""
    D = args.dim
    hd = D // args.n_heads
    V = args.vocab_size
    Vpad = ((V + 127) // 128) * 128
    scale = 1.0 / math.sqrt(hd)

    wattn, wo, w13, w2 = [], [], [], []
    for lp in params["layers"]:
        an = lp["attn_norm"].reshape(D, 1)                  # fold attn RMSNorm weight
        fn = lp["ffn_norm"].reshape(D, 1)                   # fold FFN RMSNorm weight
        wq_s = lp["wq"] * scale                             # fold 1/sqrt(head_dim)
        wattn.append(an * jnp.concatenate(
            [wq_s, lp["wk"], lp["wv"], wq_s @ rot, lp["wk"] @ rot], axis=1))
        wo.append(lp["wo"])
        w13.append(fn * jnp.concatenate([lp["w1"], lp["w3"]], axis=1))
        w2.append(lp["w2"])

    wout_folded = params["norm"].reshape(D, 1) * params["wout"]   # fold final RMSNorm
    wout_pad = jnp.zeros((D, Vpad), jnp.float32).at[:, :V].set(wout_folded)

    return dict(
        wattn=jnp.stack(wattn),      # (L, D, 5D)
        wo=jnp.stack(wo),            # (L, D, D)
        w13=jnp.stack(w13),          # (L, D, 2*hidden)
        w2=jnp.stack(w2),            # (L, hidden, D)
        wout=wout_pad,               # (D, Vpad)
        vpad=Vpad,
    )


# ----------------------------- full forward ----------------------------------
def transformer_forward(examples, fused, params, args, rope_cos, rope_sin):
    B, S = examples.shape
    D = args.dim
    H = args.n_heads
    hd = D // H
    hidden = ffn_hidden_dim(D, args.multiple_of)
    L = args.n_layers
    V = args.vocab_size
    Vpad = fused["vpad"]

    # Embedding gather kept as plain JAX glue.
    h = jnp.take(params["emb"], examples, axis=0)            # (B, S, D)
    hf = h.reshape(B * S, D).astype(jnp.float32)
    cos = jnp.tile(rope_cos[:S], (B, 1))                      # (B*S, D)
    sin = jnp.tile(rope_sin[:S], (B, 1))

    kern = functools.partial(_fused_fwd_kernel, B=B, S=S, D=D, H=H, hd=hd,
                             hidden=hidden, L=L, eps=args.norm_eps)
    logits_pad = pl.pallas_call(
        kern,
        out_shape=jax.ShapeDtypeStruct((B * S, Vpad), jnp.float32),
        in_specs=[_VMEM] * 8,
        out_specs=_VMEM,
    )(hf, cos, sin,
      fused["wattn"], fused["wo"],
      fused["w13"], fused["w2"], fused["wout"])

    return logits_pad[:, :V].reshape(B, S, V)


# ----------------------------- pure-JAX reference ----------------------------
def reference_forward(examples, params, args):
    B, S = examples.shape
    D, H = args.dim, args.n_heads
    hd = D // H
    eps = args.norm_eps

    def rmsnorm(x, w):
        return x * jax.lax.rsqrt(jnp.mean(x * x, -1, keepdims=True) + eps) * w.reshape(-1)

    inv = 1.0 / 10000.0 ** (jnp.arange(0, hd, 2, dtype=jnp.float32) / hd)
    t = jnp.arange(S, dtype=jnp.float32)
    ang = jnp.outer(t, inv)                                  # (S, hd//2)
    fc = jnp.exp(1j * ang.astype(jnp.complex64))

    def rope(x):                                             # (B,S,H,hd)
        xr = x.reshape(B, S, H, hd // 2, 2)
        xc = jax.lax.complex(xr[..., 0], xr[..., 1]) * fc[None, :, None, :]
        return jnp.stack([jnp.real(xc), jnp.imag(xc)], -1).reshape(B, S, H, hd)

    h = jnp.take(params["emb"], examples, axis=0)
    x1, x2 = h, h
    neg_inf = jnp.finfo(jnp.float32).min
    causal = jnp.tril(jnp.ones((S, S), bool))
    for lp in params["layers"]:
        xn = rmsnorm(x2, lp["attn_norm"])
        q = (xn @ lp["wq"]).reshape(B, S, H, hd)
        k = (xn @ lp["wk"]).reshape(B, S, H, hd)
        v = (xn @ lp["wv"]).reshape(B, S, H, hd)
        q, k = rope(q), rope(k)
        q, k, v = (a.transpose(0, 2, 1, 3) for a in (q, k, v))
        s = jnp.einsum("bhqd,bhkd->bhqk", q, k) / math.sqrt(hd)
        s = jnp.where(causal[None, None], s, neg_inf)
        p = jax.nn.softmax(s, axis=-1)
        o = jnp.einsum("bhqk,bhkd->bhqd", p, v).transpose(0, 2, 1, 3).reshape(B, S, D)
        y1 = x1 + o @ lp["wo"]
        yn = rmsnorm(y1, lp["ffn_norm"])
        a = yn @ lp["w1"]
        g = (a * jax.nn.sigmoid(a)) * (yn @ lp["w3"])
        y2 = x2 + g @ lp["w2"]
        x1, x2 = y1, y2
    hm = (x1 + x2) / 2.0
    return rmsnorm(hm, params["norm"]) @ params["wout"]


# ----------------------------- main -------------------------------------------
if __name__ == "__main__":
    jax.config.update("jax_default_matmul_precision", "highest")
    args = Args()
    B, S = 2, 8

    key = jax.random.PRNGKey(0)
    kp, kx = jax.random.split(key)
    params = init_params(kp, args)
    examples = jax.random.randint(kx, (B, S), 0, args.vocab_size, dtype=jnp.int32)

    rope_cos, rope_sin, rot = precompute_rope(args, args.max_seq_len)
    fused = prepare_fused_weights(params, args, rot)

    out = transformer_forward(examples, fused, params, args, rope_cos, rope_sin)
    out = jax.block_until_ready(out)

    ref = jax.block_until_ready(reference_forward(examples, params, args))

    assert out.shape == (B, S, args.vocab_size)
    assert bool(jnp.all(jnp.isfinite(out)))
    np.testing.assert_allclose(np.asarray(out), np.asarray(ref), rtol=1e-2, atol=1e-2)
    print("KERNEL_OK")
</pallas_src>

<mosaic_0001>
module attributes {stable_mosaic.version = 11 : i64} {
  func.func @_fused_fwd_kernel(%arg0: memref<16x32xf32, #tpu.memory_space<vmem>>, %arg1: memref<16x32xf32, #tpu.memory_space<vmem>>, %arg2: memref<16x32xf32, #tpu.memory_space<vmem>>, %arg3: memref<2x32x160xf32, #tpu.memory_space<vmem>>, %arg4: memref<2x32x32xf32, #tpu.memory_space<vmem>>, %arg5: memref<2x32x192xf32, #tpu.memory_space<vmem>>, %arg6: memref<2x96x32xf32, #tpu.memory_space<vmem>>, %arg7: memref<32x128xf32, #tpu.memory_space<vmem>>, %arg8: memref<16x128xf32, #tpu.memory_space<vmem>>) attributes {dimension_semantics = [], scalar_prefetch = 0 : i64, scratch_operands = 0 : i64, tpu.core_type = #tpu.core_type<tc>} {
    %c0 = arith.constant 0 : index
    %c0_0 = arith.constant 0 : index
    %0 = vector.load %arg0[%c0, %c0_0] : memref<16x32xf32, #tpu.memory_space<vmem>>, vector<16x32xf32>
    %c0_1 = arith.constant 0 : index
    %c0_2 = arith.constant 0 : index
    %1 = vector.load %arg1[%c0_1, %c0_2] : memref<16x32xf32, #tpu.memory_space<vmem>>, vector<16x32xf32>
    %c0_3 = arith.constant 0 : index
    %c0_4 = arith.constant 0 : index
    %2 = vector.load %arg2[%c0_3, %c0_4] : memref<16x32xf32, #tpu.memory_space<vmem>>, vector<16x32xf32>
    %3 = tpu.iota {dimensions = array<i32: 0>} : vector<8x8xi32>
    %4 = tpu.iota {dimensions = array<i32: 1>} : vector<8x8xi32>
    %5 = arith.cmpi sle, %4, %3 : vector<8x8xi32>
    %6 = arith.mulf %0, %0 : vector<16x32xf32>
    %cst = arith.constant dense<0.000000e+00> : vector<16xf32>
    %7 = vector.multi_reduction <add>, %6, %cst [1] : vector<16x32xf32> to vector<16xf32>
    %8 = vector.shape_cast %7 : vector<16xf32> to vector<16x1xf32>
    %cst_5 = arith.constant 3.200000e+01 : f32
    %9 = vector.broadcast %cst_5 : f32 to vector<16x1xf32>
    %10 = arith.divf %8, %9 : vector<16x1xf32>
    %cst_6 = arith.constant 9.99999974E-6 : f32
    %11 = vector.broadcast %cst_6 : f32 to vector<16x1xf32>
    %12 = arith.addf %10, %11 : vector<16x1xf32>
    %13 = math.rsqrt %12 : vector<16x1xf32>
    %14 = vector.broadcast %13 : vector<16x1xf32> to vector<16x32xf32>
    %15 = arith.mulf %0, %14 : vector<16x32xf32>
    %c0_7 = arith.constant 0 : index
    %c0_8 = arith.constant 0 : index
    %c0_9 = arith.constant 0 : index
    %16 = vector.load %arg3[%c0_7, %c0_8, %c0_9] : memref<2x32x160xf32, #tpu.memory_space<vmem>>, vector<1x32x160xf32>
    %17 = vector.shape_cast %16 : vector<1x32x160xf32> to vector<32x160xf32>
    %cst_10 = arith.constant dense<0.000000e+00> : vector<16x160xf32>
    %18 = tpu.matmul %15, %17, %cst_10 {dimension_numbers = #tpu.dot_dimension_numbers<[1], [0], [0], [1], [0, 0, 1, 1], [], []>, precision = #tpu.contract_precision<fp32>} : vector<16x32xf32>, vector<32x160xf32>, vector<16x160xf32> -> vector<16x160xf32>
    %19 = vector.extract_strided_slice %18 {offsets = [0, 0], sizes = [16, 32], strides = [1, 1]} : vector<16x160xf32> to vector<16x32xf32>
    %20 = arith.mulf %19, %1 : vector<16x32xf32>
    %21 = vector.extract_strided_slice %18 {offsets = [0, 96], sizes = [16, 32], strides = [1, 1]} : vector<16x160xf32> to vector<16x32xf32>
    %22 = arith.mulf %21, %2 : vector<16x32xf32>
    %23 = arith.addf %20, %22 : vector<16x32xf32>
    %24 = vector.extract_strided_slice %18 {offsets = [0, 32], sizes = [16, 32], strides = [1, 1]} : vector<16x160xf32> to vector<16x32xf32>
    %25 = arith.mulf %24, %1 : vector<16x32xf32>
    %26 = vector.extract_strided_slice %18 {offsets = [0, 128], sizes = [16, 32], strides = [1, 1]} : vector<16x160xf32> to vector<16x32xf32>
    %27 = arith.mulf %26, %2 : vector<16x32xf32>
    %28 = arith.addf %25, %27 : vector<16x32xf32>
    %29 = vector.extract_strided_slice %18 {offsets = [0, 64], sizes = [16, 32], strides = [1, 1]} : vector<16x160xf32> to vector<16x32xf32>
    %c0_11 = arith.constant 0 : index
    %c0_12 = arith.constant 0 : index
    %c0_13 = arith.constant 0 : index
    %30 = vector.load %arg4[%c0_11, %c0_12, %c0_13] : memref<2x32x32xf32, #tpu.memory_space<vmem>>, vector<1x32x32xf32>
    %31 = vector.shape_cast %30 : vector<1x32x32xf32> to vector<32x32xf32>
    %32 = vector.extract_strided_slice %23 {offsets = [0, 0], sizes = [8, 32], strides = [1, 1]} : vector<16x32xf32> to vector<8x32xf32>
    %33 = vector.extract_strided_slice %28 {offsets = [0, 0], sizes = [8, 32], strides = [1, 1]} : vector<16x32xf32> to vector<8x32xf32>
    %34 = vector.extract_strided_slice %29 {offsets = [0, 0], sizes = [8, 32], strides = [1, 1]} : vector<16x32xf32> to vector<8x32xf32>
    %35 = vector.extract_strided_slice %32 {offsets = [0, 0], sizes = [8, 8], strides = [1, 1]} : vector<8x32xf32> to vector<8x8xf32>
    %36 = vector.extract_strided_slice %33 {offsets = [0, 0], sizes = [8, 8], strides = [1, 1]} : vector<8x32xf32> to vector<8x8xf32>
    %37 = vector.extract_strided_slice %34 {offsets = [0, 0], sizes = [8, 8], strides = [1, 1]} : vector<8x32xf32> to vector<8x8xf32>
    %cst_14 = arith.constant dense<0.000000e+00> : vector<8x8xf32>
    %38 = tpu.matmul %35, %36, %cst_14 {dimension_numbers = #tpu.dot_dimension_numbers<[1], [1], [0], [0], [0, 0, 1, 0], [], []>, precision = #tpu.contract_precision<fp32>} : vector<8x8xf32>, vector<8x8xf32>, vector<8x8xf32> -> vector<8x8xf32>
    %cst_15 = arith.constant -3.40282347E+38 : f32
    %39 = vector.broadcast %cst_15 : f32 to vector<8x8xf32>
    %40 = arith.select %5, %38, %39 : vector<8x8xi1>, vector<8x8xf32>
    %cst_16 = arith.constant dense<0xFF800000> : vector<8xf32>
    %41 = vector.multi_reduction <maximumf>, %40, %cst_16 [1] : vector<8x8xf32> to vector<8xf32>
    %42 = vector.shape_cast %41 : vector<8xf32> to vector<8x1xf32>
    %43 = vector.broadcast %42 : vector<8x1xf32> to vector<8x8xf32>
    %44 = arith.subf %40, %43 : vector<8x8xf32>
    %45 = math.exp %44 : vector<8x8xf32>
    %cst_17 = arith.constant dense<0.000000e+00> : vector<8xf32>
    %46 = vector.multi_reduction <add>, %45, %cst_17 [1] : vector<8x8xf32> to vector<8xf32>
    %47 = vector.shape_cast %46 : vector<8xf32> to vector<8x1xf32>
    %48 = tpu.reciprocal %47 {approx = true} : vector<8x1xf32> -> vector<8x1xf32>
    %49 = vector.broadcast %48 : vector<8x1xf32> to vector<8x8xf32>
    %50 = arith.mulf %45, %49 : vector<8x8xf32>
    %cst_18 = arith.constant dense<0.000000e+00> : vector<8x8xf32>
    %51 = tpu.matmul %50, %37, %cst_18 {dimension_numbers = #tpu.dot_dimension_numbers<[1], [0], [0], [1], [0, 0, 1, 1], [], []>, precision = #tpu.contract_precision<fp32>} : vector<8x8xf32>, vector<8x8xf32>, vector<8x8xf32> -> vector<8x8xf32>
    %52 = vector.extract_strided_slice %32 {offsets = [0, 8], sizes = [8, 8], strides = [1, 1]} : vector<8x32xf32> to vector<8x8xf32>
    %53 = vector.extract_strided_slice %33 {offsets = [0, 8], sizes = [8, 8], strides = [1, 1]} : vector<8x32xf32> to vector<8x8xf32>
    %54 = vector.extract_strided_slice %34 {offsets = [0, 8], sizes = [8, 8], strides = [1, 1]} : vector<8x32xf32> to vector<8x8xf32>
    %cst_19 = arith.constant dense<0.000000e+00> : vector<8x8xf32>
    %55 = tpu.matmul %52, %53, %cst_19 {dimension_numbers = #tpu.dot_dimension_numbers<[1], [1], [0], [0], [0, 0, 1, 0], [], []>, precision = #tpu.contract_precision<fp32>} : vector<8x8xf32>, vector<8x8xf32>, vector<8x8xf32> -> vector<8x8xf32>
    %cst_20 = arith.constant -3.40282347E+38 : f32
    %56 = vector.broadcast %cst_20 : f32 to vector<8x8xf32>
    %57 = arith.select %5, %55, %56 : vector<8x8xi1>, vector<8x8xf32>
    %cst_21 = arith.constant dense<0xFF800000> : vector<8xf32>
    %58 = vector.multi_reduction <maximumf>, %57, %cst_21 [1] : vector<8x8xf32> to vector<8xf32>
    %59 = vector.shape_cast %58 : vector<8xf32> to vector<8x1xf32>
    %60 = vector.broadcast %59 : vector<8x1xf32> to vector<8x8xf32>
    %61 = arith.subf %57, %60 : vector<8x8xf32>
    %62 = math.exp %61 : vector<8x8xf32>
    %cst_22 = arith.constant dense<0.000000e+00> : vector<8xf32>
    %63 = vector.multi_reduction <add>, %62, %cst_22 [1] : vector<8x8xf32> to vector<8xf32>
    %64 = vector.shape_cast %63 : vector<8xf32> to vector<8x1xf32>
    %65 = tpu.reciprocal %64 {approx = true} : vector<8x1xf32> -> vector<8x1xf32>
    %66 = vector.broadcast %65 : vector<8x1xf32> to vector<8x8xf32>
    %67 = arith.mulf %62, %66 : vector<8x8xf32>
    %cst_23 = arith.constant dense<0.000000e+00> : vector<8x8xf32>
    %68 = tpu.matmul %67, %54, %cst_23 {dimension_numbers = #tpu.dot_dimension_numbers<[1], [0], [0], [1], [0, 0, 1, 1], [], []>, precision = #tpu.contract_precision<fp32>} : vector<8x8xf32>, vector<8x8xf32>, vector<8x8xf32> -> vector<8x8xf32>
    %69 = vector.extract_strided_slice %32 {offsets = [0, 16], sizes = [8, 8], strides = [1, 1]} : vector<8x32xf32> to vector<8x8xf32>
    %70 = vector.extract_strided_slice %33 {offsets = [0, 16], sizes = [8, 8], strides = [1, 1]} : vector<8x32xf32> to vector<8x8xf32>
    %71 = vector.extract_strided_slice %34 {offsets = [0, 16], sizes = [8, 8], strides = [1, 1]} : vector<8x32xf32> to vector<8x8xf32>
    %cst_24 = arith.constant dense<0.000000e+00> : vector<8x8xf32>
    %72 = tpu.matmul %69, %70, %cst_24 {dimension_numbers = #tpu.dot_dimension_numbers<[1], [1], [0], [0], [0, 0, 1, 0], [], []>, precision = #tpu.contract_precision<fp32>} : vector<8x8xf32>, vector<8x8xf32>, vector<8x8xf32> -> vector<8x8xf32>
    %cst_25 = arith.constant -3.40282347E+38 : f32
    %73 = vector.broadcast %cst_25 : f32 to vector<8x8xf32>
    %74 = arith.select %5, %72, %73 : vector<8x8xi1>, vector<8x8xf32>
    %cst_26 = arith.constant dense<0xFF800000> : vector<8xf32>
    %75 = vector.multi_reduction <maximumf>, %74, %cst_26 [1] : vector<8x8xf32> to vector<8xf32>
    %76 = vector.shape_cast %75 : vector<8xf32> to vector<8x1xf32>
    %77 = vector.broadcast %76 : vector<8x1xf32> to vector<8x8xf32>
    %78 = arith.subf %74, %77 : vector<8x8xf32>
    %79 = math.exp %78 : vector<8x8xf32>
    %cst_27 = arith.constant dense<0.000000e+00> : vector<8xf32>
    %80 = vector.multi_reduction <add>, %79, %cst_27 [1] : vector<8x8xf32> to vector<8xf32>
    %81 = vector.shape_cast %80 : vector<8xf32> to vector<8x1xf32>
    %82 = tpu.reciprocal %81 {approx = true} : vector<8x1xf32> -> vector<8x1xf32>
    %83 = vector.broadcast %82 : vector<8x1xf32> to vector<8x8xf32>
    %84 = arith.mulf %79, %83 : vector<8x8xf32>
    %cst_28 = arith.constant dense<0.000000e+00> : vector<8x8xf32>
    %85 = tpu.matmul %84, %71, %cst_28 {dimension_numbers = #tpu.dot_dimension_numbers<[1], [0], [0], [1], [0, 0, 1, 1], [], []>, precision = #tpu.contract_precision<fp32>} : vector<8x8xf32>, vector<8x8xf32>, vector<8x8xf32> -> vector<8x8xf32>
    %86 = vector.extract_strided_slice %32 {offsets = [0, 24], sizes = [8, 8], strides = [1, 1]} : vector<8x32xf32> to vector<8x8xf32>
    %87 = vector.extract_strided_slice %33 {offsets = [0, 24], sizes = [8, 8], strides = [1, 1]} : vector<8x32xf32> to vector<8x8xf32>
    %88 = vector.extract_strided_slice %34 {offsets = [0, 24], sizes = [8, 8], strides = [1, 1]} : vector<8x32xf32> to vector<8x8xf32>
    %cst_29 = arith.constant dense<0.000000e+00> : vector<8x8xf32>
    %89 = tpu.matmul %86, %87, %cst_29 {dimension_numbers = #tpu.dot_dimension_numbers<[1], [1], [0], [0], [0, 0, 1, 0], [], []>, precision = #tpu.contract_precision<fp32>} : vector<8x8xf32>, vector<8x8xf32>, vector<8x8xf32> -> vector<8x8xf32>
    %cst_30 = arith.constant -3.40282347E+38 : f32
    %90 = vector.broadcast %cst_30 : f32 to vector<8x8xf32>
    %91 = arith.select %5, %89, %90 : vector<8x8xi1>, vector<8x8xf32>
    %cst_31 = arith.constant dense<0xFF800000> : vector<8xf32>
    %92 = vector.multi_reduction <maximumf>, %91, %cst_31 [1] : vector<8x8xf32> to vector<8xf32>
    %93 = vector.shape_cast %92 : vector<8xf32> to vector<8x1xf32>
    %94 = vector.broadcast %93 : vector<8x1xf32> to vector<8x8xf32>
    %95 = arith.subf %91, %94 : vector<8x8xf32>
    %96 = math.exp %95 : vector<8x8xf32>
    %cst_32 = arith.constant dense<0.000000e+00> : vector<8xf32>
    %97 = vector.multi_reduction <add>, %96, %cst_32 [1] : vector<8x8xf32> to vector<8xf32>
    %98 = vector.shape_cast %97 : vector<8xf32> to vector<8x1xf32>
    %99 = tpu.reciprocal %98 {approx = true} : vector<8x1xf32> -> vector<8x1xf32>
    %100 = vector.broadcast %99 : vector<8x1xf32> to vector<8x8xf32>
    %101 = arith.mulf %96, %100 : vector<8x8xf32>
    %cst_33 = arith.constant dense<0.000000e+00> : vector<8x8xf32>
    %102 = tpu.matmul %101, %88, %cst_33 {dimension_numbers = #tpu.dot_dimension_numbers<[1], [0], [0], [1], [0, 0, 1, 1], [], []>, precision = #tpu.contract_precision<fp32>} : vector<8x8xf32>, vector<8x8xf32>, vector<8x8xf32> -> vector<8x8xf32>
    %103 = tpu.concatenate %51, %68, %85, %102 in 1 : vector<8x8xf32>, vector<8x8xf32>, vector<8x8xf32>, vector<8x8xf32> -> vector<8x32xf32>
    %104 = vector.extract_strided_slice %0 {offsets = [0, 0], sizes = [8, 32], strides = [1, 1]} : vector<16x32xf32> to vector<8x32xf32>
    %cst_34 = arith.constant dense<0.000000e+00> : vector<8x32xf32>
    %105 = tpu.matmul %103, %31, %cst_34 {dimension_numbers = #tpu.dot_dimension_numbers<[1], [0], [0], [1], [0, 0, 1, 1], [], []>, precision = #tpu.contract_precision<fp32>} : vector<8x32xf32>, vector<32x32xf32>, vector<8x32xf32> -> vector<8x32xf32>
    %106 = arith.addf %104, %105 : vector<8x32xf32>
    %107 = vector.extract_strided_slice %23 {offsets = [8, 0], sizes = [8, 32], strides = [1, 1]} : vector<16x32xf32> to vector<8x32xf32>
    %108 = vector.extract_strided_slice %28 {offsets = [8, 0], sizes = [8, 32], strides = [1, 1]} : vector<16x32xf32> to vector<8x32xf32>
    %109 = vector.extract_strided_slice %29 {offsets = [8, 0], sizes = [8, 32], strides = [1, 1]} : vector<16x32xf32> to vector<8x32xf32>
    %110 = vector.extract_strided_slice %107 {offsets = [0, 0], sizes = [8, 8], strides = [1, 1]} : vector<8x32xf32> to vector<8x8xf32>
    %111 = vector.extract_strided_slice %108 {offsets = [0, 0], sizes = [8, 8], strides = [1, 1]} : vector<8x32xf32> to vector<8x8xf32>
    %112 = vector.extract_strided_slice %109 {offsets = [0, 0], sizes = [8, 8], strides = [1, 1]} : vector<8x32xf32> to vector<8x8xf32>
    %cst_35 = arith.constant dense<0.000000e+00> : vector<8x8xf32>
    %113 = tpu.matmul %110, %111, %cst_35 {dimension_numbers = #tpu.dot_dimension_numbers<[1], [1], [0], [0], [0, 0, 1, 0], [], []>, precision = #tpu.contract_precision<fp32>} : vector<8x8xf32>, vector<8x8xf32>, vector<8x8xf32> -> vector<8x8xf32>
    %cst_36 = arith.constant -3.40282347E+38 : f32
    %114 = vector.broadcast %cst_36 : f32 to vector<8x8xf32>
    %115 = arith.select %5, %113, %114 : vector<8x8xi1>, vector<8x8xf32>
    %cst_37 = arith.constant dense<0xFF800000> : vector<8xf32>
    %116 = vector.multi_reduction <maximumf>, %115, %cst_37 [1] : vector<8x8xf32> to vector<8xf32>
    %117 = vector.shape_cast %116 : vector<8xf32> to vector<8x1xf32>
    %118 = vector.broadcast %117 : vector<8x1xf32> to vector<8x8xf32>
    %119 = arith.subf %115, %118 : vector<8x8xf32>
    %120 = math.exp %119 : vector<8x8xf32>
    %cst_38 = arith.constant dense<0.000000e+00> : vector<8xf32>
    %121 = vector.multi_reduction <add>, %120, %cst_38 [1] : vector<8x8xf32> to vector<8xf32>
    %122 = vector.shape_cast %121 : vector<8xf32> to vector<8x1xf32>
    %123 = tpu.reciprocal %122 {approx = true} : vector<8x1xf32> -> vector<8x1xf32>
    %124 = vector.broadcast %123 : vector<8x1xf32> to vector<8x8xf32>
    %125 = arith.mulf %120, %124 : vector<8x8xf32>
    %cst_39 = arith.constant dense<0.000000e+00> : vector<8x8xf32>
    %126 = tpu.matmul %125, %112, %cst_39 {dimension_numbers = #tpu.dot_dimension_numbers<[1], [0], [0], [1], [0, 0, 1, 1], [], []>, precision = #tpu.contract_precision<fp32>} : vector<8x8xf32>, vector<8x8xf32>, vector<8x8xf32> -> vector<8x8xf32>
    %127 = vector.extract_strided_slice %107 {offsets = [0, 8], sizes = [8, 8], strides = [1, 1]} : vector<8x32xf32> to vector<8x8xf32>
    %128 = vector.extract_strided_slice %108 {offsets = [0, 8], sizes = [8, 8], strides = [1, 1]} : vector<8x32xf32> to vector<8x8xf32>
    %129 = vector.extract_strided_slice %109 {offsets = [0, 8], sizes = [8, 8], strides = [1, 1]} : vector<8x32xf32> to vector<8x8xf32>
    %cst_40 = arith.constant dense<0.000000e+00> : vector<8x8xf32>
    %130 = tpu.matmul %127, %128, %cst_40 {dimension_numbers = #tpu.dot_dimension_numbers<[1], [1], [0], [0], [0, 0, 1, 0], [], []>, precision = #tpu.contract_precision<fp32>} : vector<8x8xf32>, vector<8x8xf32>, vector<8x8xf32> -> vector<8x8xf32>
    %cst_41 = arith.constant -3.40282347E+38 : f32
    %131 = vector.broadcast %cst_41 : f32 to vector<8x8xf32>
    %132 = arith.select %5, %130, %131 : vector<8x8xi1>, vector<8x8xf32>
    %cst_42 = arith.constant dense<0xFF800000> : vector<8xf32>
    %133 = vector.multi_reduction <maximumf>, %132, %cst_42 [1] : vector<8x8xf32> to vector<8xf32>
    %134 = vector.shape_cast %133 : vector<8xf32> to vector<8x1xf32>
    %135 = vector.broadcast %134 : vector<8x1xf32> to vector<8x8xf32>
    %136 = arith.subf %132, %135 : vector<8x8xf32>
    %137 = math.exp %136 : vector<8x8xf32>
    %cst_43 = arith.constant dense<0.000000e+00> : vector<8xf32>
    %138 = vector.multi_reduction <add>, %137, %cst_43 [1] : vector<8x8xf32> to vector<8xf32>
    %139 = vector.shape_cast %138 : vector<8xf32> to vector<8x1xf32>
    %140 = tpu.reciprocal %139 {approx = true} : vector<8x1xf32> -> vector<8x1xf32>
    %141 = vector.broadcast %140 : vector<8x1xf32> to vector<8x8xf32>
    %142 = arith.mulf %137, %141 : vector<8x8xf32>
    %cst_44 = arith.constant dense<0.000000e+00> : vector<8x8xf32>
    %143 = tpu.matmul %142, %129, %cst_44 {dimension_numbers = #tpu.dot_dimension_numbers<[1], [0], [0], [1], [0, 0, 1, 1], [], []>, precision = #tpu.contract_precision<fp32>} : vector<8x8xf32>, vector<8x8xf32>, vector<8x8xf32> -> vector<8x8xf32>
    %144 = vector.extract_strided_slice %107 {offsets = [0, 16], sizes = [8, 8], strides = [1, 1]} : vector<8x32xf32> to vector<8x8xf32>
    %145 = vector.extract_strided_slice %108 {offsets = [0, 16], sizes = [8, 8], strides = [1, 1]} : vector<8x32xf32> to vector<8x8xf32>
    %146 = vector.extract_strided_slice %109 {offsets = [0, 16], sizes = [8, 8], strides = [1, 1]} : vector<8x32xf32> to vector<8x8xf32>
    %cst_45 = arith.constant dense<0.000000e+00> : vector<8x8xf32>
    %147 = tpu.matmul %144, %145, %cst_45 {dimension_numbers = #tpu.dot_dimension_numbers<[1], [1], [0], [0], [0, 0, 1, 0], [], []>, precision = #tpu.contract_precision<fp32>} : vector<8x8xf32>, vector<8x8xf32>, vector<8x8xf32> -> vector<8x8xf32>
    %cst_46 = arith.constant -3.40282347E+38 : f32
    %148 = vector.broadcast %cst_46 : f32 to vector<8x8xf32>
    %149 = arith.select %5, %147, %148 : vector<8x8xi1>, vector<8x8xf32>
    %cst_47 = arith.constant dense<0xFF800000> : vector<8xf32>
    %150 = vector.multi_reduction <maximumf>, %149, %cst_47 [1] : vector<8x8xf32> to vector<8xf32>
    %151 = vector.shape_cast %150 : vector<8xf32> to vector<8x1xf32>
    %152 = vector.broadcast %151 : vector<8x1xf32> to vector<8x8xf32>
    %153 = arith.subf %149, %152 : vector<8x8xf32>
    %154 = math.exp %153 : vector<8x8xf32>
    %cst_48 = arith.constant dense<0.000000e+00> : vector<8xf32>
    %155 = vector.multi_reduction <add>, %154, %cst_48 [1] : vector<8x8xf32> to vector<8xf32>
    %156 = vector.shape_cast %155 : vector<8xf32> to vector<8x1xf32>
    %157 = tpu.reciprocal %156 {approx = true} : vector<8x1xf32> -> vector<8x1xf32>
    %158 = vector.broadcast %157 : vector<8x1xf32> to vector<8x8xf32>
    %159 = arith.mulf %154, %158 : vector<8x8xf32>
    %cst_49 = arith.constant dense<0.000000e+00> : vector<8x8xf32>
    %160 = tpu.matmul %159, %146, %cst_49 {dimension_numbers = #tpu.dot_dimension_numbers<[1], [0], [0], [1], [0, 0, 1, 1], [], []>, precision = #tpu.contract_precision<fp32>} : vector<8x8xf32>, vector<8x8xf32>, vector<8x8xf32> -> vector<8x8xf32>
    %161 = vector.extract_strided_slice %107 {offsets = [0, 24], sizes = [8, 8], strides = [1, 1]} : vector<8x32xf32> to vector<8x8xf32>
    %162 = vector.extract_strided_slice %108 {offsets = [0, 24], sizes = [8, 8], strides = [1, 1]} : vector<8x32xf32> to vector<8x8xf32>
    %163 = vector.extract_strided_slice %109 {offsets = [0, 24], sizes = [8, 8], strides = [1, 1]} : vector<8x32xf32> to vector<8x8xf32>
    %cst_50 = arith.constant dense<0.000000e+00> : vector<8x8xf32>
    %164 = tpu.matmul %161, %162, %cst_50 {dimension_numbers = #tpu.dot_dimension_numbers<[1], [1], [0], [0], [0, 0, 1, 0], [], []>, precision = #tpu.contract_precision<fp32>} : vector<8x8xf32>, vector<8x8xf32>, vector<8x8xf32> -> vector<8x8xf32>
    %cst_51 = arith.constant -3.40282347E+38 : f32
    %165 = vector.broadcast %cst_51 : f32 to vector<8x8xf32>
    %166 = arith.select %5, %164, %165 : vector<8x8xi1>, vector<8x8xf32>
    %cst_52 = arith.constant dense<0xFF800000> : vector<8xf32>
    %167 = vector.multi_reduction <maximumf>, %166, %cst_52 [1] : vector<8x8xf32> to vector<8xf32>
    %168 = vector.shape_cast %167 : vector<8xf32> to vector<8x1xf32>
    %169 = vector.broadcast %168 : vector<8x1xf32> to vector<8x8xf32>
    %170 = arith.subf %166, %169 : vector<8x8xf32>
    %171 = math.exp %170 : vector<8x8xf32>
    %cst_53 = arith.constant dense<0.000000e+00> : vector<8xf32>
    %172 = vector.multi_reduction <add>, %171, %cst_53 [1] : vector<8x8xf32> to vector<8xf32>
    %173 = vector.shape_cast %172 : vector<8xf32> to vector<8x1xf32>
    %174 = tpu.reciprocal %173 {approx = true} : vector<8x1xf32> -> vector<8x1xf32>
    %175 = vector.broadcast %174 : vector<8x1xf32> to vector<8x8xf32>
    %176 = arith.mulf %171, %175 : vector<8x8xf32>
    %cst_54 = arith.constant dense<0.000000e+00> : vector<8x8xf32>
    %177 = tpu.matmul %176, %163, %cst_54 {dimension_numbers = #tpu.dot_dimension_numbers<[1], [0], [0], [1], [0, 0, 1, 1], [], []>, precision = #tpu.contract_precision<fp32>} : vector<8x8xf32>, vector<8x8xf32>, vector<8x8xf32> -> vector<8x8xf32>
    %178 = tpu.concatenate %126, %143, %160, %177 in 1 : vector<8x8xf32>, vector<8x8xf32>, vector<8x8xf32>, vector<8x8xf32> -> vector<8x32xf32>
    %179 = vector.extract_strided_slice %0 {offsets = [8, 0], sizes = [8, 32], strides = [1, 1]} : vector<16x32xf32> to vector<8x32xf32>
    %cst_55 = arith.constant dense<0.000000e+00> : vector<8x32xf32>
    %180 = tpu.matmul %178, %31, %cst_55 {dimension_numbers = #tpu.dot_dimension_numbers<[1], [0], [0], [1], [0, 0, 1, 1], [], []>, precision = #tpu.contract_precision<fp32>} : vector<8x32xf32>, vector<32x32xf32>, vector<8x32xf32> -> vector<8x32xf32>
    %181 = arith.addf %179, %180 : vector<8x32xf32>
    %182 = tpu.concatenate %106, %181 in 0 : vector<8x32xf32>, vector<8x32xf32> -> vector<16x32xf32>
    %183 = arith.mulf %182, %182 : vector<16x32xf32>
    %cst_56 = arith.constant dense<0.000000e+00> : vector<16xf32>
    %184 = vector.multi_reduction <add>, %183, %cst_56 [1] : vector<16x32xf32> to vector<16xf32>
    %185 = vector.shape_cast %184 : vector<16xf32> to vector<16x1xf32>
    %cst_57 = arith.constant 3.200000e+01 : f32
    %186 = vector.broadcast %cst_57 : f32 to vector<16x1xf32>
    %187 = arith.divf %185, %186 : vector<16x1xf32>
    %cst_58 = arith.constant 9.99999974E-6 : f32
    %188 = vector.broadcast %cst_58 : f32 to vector<16x1xf32>
    %189 = arith.addf %187, %188 : vector<16x1xf32>
    %190 = math.rsqrt %189 : vector<16x1xf32>
    %191 = vector.broadcast %190 : vector<16x1xf32> to vector<16x32xf32>
    %192 = arith.mulf %182, %191 : vector<16x32xf32>
    %c0_59 = arith.constant 0 : index
    %c0_60 = arith.constant 0 : index
    %c0_61 = arith.constant 0 : index
    %193 = vector.load %arg5[%c0_59, %c0_60, %c0_61] : memref<2x32x192xf32, #tpu.memory_space<vmem>>, vector<1x32x192xf32>
    %194 = vector.shape_cast %193 : vector<1x32x192xf32> to vector<32x192xf32>
    %cst_62 = arith.constant dense<0.000000e+00> : vector<16x192xf32>
    %195 = tpu.matmul %192, %194, %cst_62 {dimension_numbers = #tpu.dot_dimension_numbers<[1], [0], [0], [1], [0, 0, 1, 1], [], []>, precision = #tpu.contract_precision<fp32>} : vector<16x32xf32>, vector<32x192xf32>, vector<16x192xf32> -> vector<16x192xf32>
    %196 = vector.extract_strided_slice %195 {offsets = [0, 0], sizes = [16, 96], strides = [1, 1]} : vector<16x192xf32> to vector<16x96xf32>
    %197 = vector.extract_strided_slice %195 {offsets = [0, 96], sizes = [16, 96], strides = [1, 1]} : vector<16x192xf32> to vector<16x96xf32>
    %cst_63 = arith.constant 0.000000e+00 : f32
    %198 = vector.broadcast %cst_63 : f32 to vector<16x96xf32>
    %199 = arith.subf %198, %196 : vector<16x96xf32>
    %200 = math.exp %199 : vector<16x96xf32>
    %cst_64 = arith.constant 1.000000e+00 : f32
    %201 = vector.broadcast %cst_64 : f32 to vector<16x96xf32>
    %202 = arith.addf %201, %200 : vector<16x96xf32>
    %cst_65 = arith.constant 1.000000e+00 : f32
    %203 = vector.broadcast %cst_65 : f32 to vector<16x96xf32>
    %204 = arith.divf %203, %202 : vector<16x96xf32>
    %205 = arith.mulf %196, %204 : vector<16x96xf32>
    %206 = arith.mulf %205, %197 : vector<16x96xf32>
    %c0_66 = arith.constant 0 : index
    %c0_67 = arith.constant 0 : index
    %c0_68 = arith.constant 0 : index
    %207 = vector.load %arg6[%c0_66, %c0_67, %c0_68] : memref<2x96x32xf32, #tpu.memory_space<vmem>>, vector<1x96x32xf32>
    %208 = vector.shape_cast %207 : vector<1x96x32xf32> to vector<96x32xf32>
    %cst_69 = arith.constant dense<0.000000e+00> : vector<16x32xf32>
    %209 = tpu.matmul %206, %208, %cst_69 {dimension_numbers = #tpu.dot_dimension_numbers<[1], [0], [0], [1], [0, 0, 1, 1], [], []>, precision = #tpu.contract_precision<fp32>} : vector<16x96xf32>, vector<96x32xf32>, vector<16x32xf32> -> vector<16x32xf32>
    %210 = arith.addf %0, %209 : vector<16x32xf32>
    %211 = arith.mulf %210, %210 : vector<16x32xf32>
    %cst_70 = arith.constant dense<0.000000e+00> : vector<16xf32>
    %212 = vector.multi_reduction <add>, %211, %cst_70 [1] : vector<16x32xf32> to vector<16xf32>
    %213 = vector.shape_cast %212 : vector<16xf32> to vector<16x1xf32>
    %cst_71 = arith.constant 3.200000e+01 : f32
    %214 = vector.broadcast %cst_71 : f32 to vector<16x1xf32>
    %215 = arith.divf %213, %214 : vector<16x1xf32>
    %cst_72 = arith.constant 9.99999974E-6 : f32
    %216 = vector.broadcast %cst_72 : f32 to vector<16x1xf32>
    %217 = arith.addf %215, %216 : vector<16x1xf32>
    %218 = math.rsqrt %217 : vector<16x1xf32>
    %219 = vector.broadcast %218 : vector<16x1xf32> to vector<16x32xf32>
    %220 = arith.mulf %210, %219 : vector<16x32xf32>
    %c1 = arith.constant 1 : index
    %c0_73 = arith.constant 0 : index
    %c0_74 = arith.constant 0 : index
    %221 = vector.load %arg3[%c1, %c0_73, %c0_74] : memref<2x32x160xf32, #tpu.memory_space<vmem>>, vector<1x32x160xf32>
    %222 = vector.shape_cast %221 : vector<1x32x160xf32> to vector<32x160xf32>
    %cst_75 = arith.constant dense<0.000000e+00> : vector<16x160xf32>
    %223 = tpu.matmul %220, %222, %cst_75 {dimension_numbers = #tpu.dot_dimension_numbers<[1], [0], [0], [1], [0, 0, 1, 1], [], []>, precision = #tpu.contract_precision<fp32>} : vector<16x32xf32>, vector<32x160xf32>, vector<16x160xf32> -> vector<16x160xf32>
    %224 = vector.extract_strided_slice %223 {offsets = [0, 0], sizes = [16, 32], strides = [1, 1]} : vector<16x160xf32> to vector<16x32xf32>
    %225 = arith.mulf %224, %1 : vector<16x32xf32>
    %226 = vector.extract_strided_slice %223 {offsets = [0, 96], sizes = [16, 32], strides = [1, 1]} : vector<16x160xf32> to vector<16x32xf32>
    %227 = arith.mulf %226, %2 : vector<16x32xf32>
    %228 = arith.addf %225, %227 : vector<16x32xf32>
    %229 = vector.extract_strided_slice %223 {offsets = [0, 32], sizes = [16, 32], strides = [1, 1]} : vector<16x160xf32> to vector<16x32xf32>
    %230 = arith.mulf %229, %1 : vector<16x32xf32>
    %231 = vector.extract_strided_slice %223 {offsets = [0, 128], sizes = [16, 32], strides = [1, 1]} : vector<16x160xf32> to vector<16x32xf32>
    %232 = arith.mulf %231, %2 : vector<16x32xf32>
    %233 = arith.addf %230, %232 : vector<16x32xf32>
    %234 = vector.extract_strided_slice %223 {offsets = [0, 64], sizes = [16, 32], strides = [1, 1]} : vector<16x160xf32> to vector<16x32xf32>
    %c1_76 = arith.constant 1 : index
    %c0_77 = arith.constant 0 : index
    %c0_78 = arith.constant 0 : index
    %235 = vector.load %arg4[%c1_76, %c0_77, %c0_78] : memref<2x32x32xf32, #tpu.memory_space<vmem>>, vector<1x32x32xf32>
    %236 = vector.shape_cast %235 : vector<1x32x32xf32> to vector<32x32xf32>
    %237 = vector.extract_strided_slice %228 {offsets = [0, 0], sizes = [8, 32], strides = [1, 1]} : vector<16x32xf32> to vector<8x32xf32>
    %238 = vector.extract_strided_slice %233 {offsets = [0, 0], sizes = [8, 32], strides = [1, 1]} : vector<16x32xf32> to vector<8x32xf32>
    %239 = vector.extract_strided_slice %234 {offsets = [0, 0], sizes = [8, 32], strides = [1, 1]} : vector<16x32xf32> to vector<8x32xf32>
    %240 = vector.extract_strided_slice %237 {offsets = [0, 0], sizes = [8, 8], strides = [1, 1]} : vector<8x32xf32> to vector<8x8xf32>
    %241 = vector.extract_strided_slice %238 {offsets = [0, 0], sizes = [8, 8], strides = [1, 1]} : vector<8x32xf32> to vector<8x8xf32>
    %242 = vector.extract_strided_slice %239 {offsets = [0, 0], sizes = [8, 8], strides = [1, 1]} : vector<8x32xf32> to vector<8x8xf32>
    %cst_79 = arith.constant dense<0.000000e+00> : vector<8x8xf32>
    %243 = tpu.matmul %240, %241, %cst_79 {dimension_numbers = #tpu.dot_dimension_numbers<[1], [1], [0], [0], [0, 0, 1, 0], [], []>, precision = #tpu.contract_precision<fp32>} : vector<8x8xf32>, vector<8x8xf32>, vector<8x8xf32> -> vector<8x8xf32>
    %cst_80 = arith.constant -3.40282347E+38 : f32
    %244 = vector.broadcast %cst_80 : f32 to vector<8x8xf32>
    %245 = arith.select %5, %243, %244 : vector<8x8xi1>, vector<8x8xf32>
    %cst_81 = arith.constant dense<0xFF800000> : vector<8xf32>
    %246 = vector.multi_reduction <maximumf>, %245, %cst_81 [1] : vector<8x8xf32> to vector<8xf32>
    %247 = vector.shape_cast %246 : vector<8xf32> to vector<8x1xf32>
    %248 = vector.broadcast %247 : vector<8x1xf32> to vector<8x8xf32>
    %249 = arith.subf %245, %248 : vector<8x8xf32>
    %250 = math.exp %249 : vector<8x8xf32>
    %cst_82 = arith.constant dense<0.000000e+00> : vector<8xf32>
    %251 = vector.multi_reduction <add>, %250, %cst_82 [1] : vector<8x8xf32> to vector<8xf32>
    %252 = vector.shape_cast %251 : vector<8xf32> to vector<8x1xf32>
    %253 = tpu.reciprocal %252 {approx = true} : vector<8x1xf32> -> vector<8x1xf32>
    %254 = vector.broadcast %253 : vector<8x1xf32> to vector<8x8xf32>
    %255 = arith.mulf %250, %254 : vector<8x8xf32>
    %cst_83 = arith.constant dense<0.000000e+00> : vector<8x8xf32>
    %256 = tpu.matmul %255, %242, %cst_83 {dimension_numbers = #tpu.dot_dimension_numbers<[1], [0], [0], [1], [0, 0, 1, 1], [], []>, precision = #tpu.contract_precision<fp32>} : vector<8x8xf32>, vector<8x8xf32>, vector<8x8xf32> -> vector<8x8xf32>
    %257 = vector.extract_strided_slice %237 {offsets = [0, 8], sizes = [8, 8], strides = [1, 1]} : vector<8x32xf32> to vector<8x8xf32>
    %258 = vector.extract_strided_slice %238 {offsets = [0, 8], sizes = [8, 8], strides = [1, 1]} : vector<8x32xf32> to vector<8x8xf32>
    %259 = vector.extract_strided_slice %239 {offsets = [0, 8], sizes = [8, 8], strides = [1, 1]} : vector<8x32xf32> to vector<8x8xf32>
    %cst_84 = arith.constant dense<0.000000e+00> : vector<8x8xf32>
    %260 = tpu.matmul %257, %258, %cst_84 {dimension_numbers = #tpu.dot_dimension_numbers<[1], [1], [0], [0], [0, 0, 1, 0], [], []>, precision = #tpu.contract_precision<fp32>} : vector<8x8xf32>, vector<8x8xf32>, vector<8x8xf32> -> vector<8x8xf32>
    %cst_85 = arith.constant -3.40282347E+38 : f32
    %261 = vector.broadcast %cst_85 : f32 to vector<8x8xf32>
    %262 = arith.select %5, %260, %261 : vector<8x8xi1>, vector<8x8xf32>
    %cst_86 = arith.constant dense<0xFF800000> : vector<8xf32>
    %263 = vector.multi_reduction <maximumf>, %262, %cst_86 [1] : vector<8x8xf32> to vector<8xf32>
    %264 = vector.shape_cast %263 : vector<8xf32> to vector<8x1xf32>
    %265 = vector.broadcast %264 : vector<8x1xf32> to vector<8x8xf32>
    %266 = arith.subf %262, %265 : vector<8x8xf32>
    %267 = math.exp %266 : vector<8x8xf32>
    %cst_87 = arith.constant dense<0.000000e+00> : vector<8xf32>
    %268 = vector.multi_reduction <add>, %267, %cst_87 [1] : vector<8x8xf32> to vector<8xf32>
    %269 = vector.shape_cast %268 : vector<8xf32> to vector<8x1xf32>
    %270 = tpu.reciprocal %269 {approx = true} : vector<8x1xf32> -> vector<8x1xf32>
    %271 = vector.broadcast %270 : vector<8x1xf32> to vector<8x8xf32>
    %272 = arith.mulf %267, %271 : vector<8x8xf32>
    %cst_88 = arith.constant dense<0.000000e+00> : vector<8x8xf32>
    %273 = tpu.matmul %272, %259, %cst_88 {dimension_numbers = #tpu.dot_dimension_numbers<[1], [0], [0], [1], [0, 0, 1, 1], [], []>, precision = #tpu.contract_precision<fp32>} : vector<8x8xf32>, vector<8x8xf32>, vector<8x8xf32> -> vector<8x8xf32>
    %274 = vector.extract_strided_slice %237 {offsets = [0, 16], sizes = [8, 8], strides = [1, 1]} : vector<8x32xf32> to vector<8x8xf32>
    %275 = vector.extract_strided_slice %238 {offsets = [0, 16], sizes = [8, 8], strides = [1, 1]} : vector<8x32xf32> to vector<8x8xf32>
    %276 = vector.extract_strided_slice %239 {offsets = [0, 16], sizes = [8, 8], strides = [1, 1]} : vector<8x32xf32> to vector<8x8xf32>
    %cst_89 = arith.constant dense<0.000000e+00> : vector<8x8xf32>
    %277 = tpu.matmul %274, %275, %cst_89 {dimension_numbers = #tpu.dot_dimension_numbers<[1], [1], [0], [0], [0, 0, 1, 0], [], []>, precision = #tpu.contract_precision<fp32>} : vector<8x8xf32>, vector<8x8xf32>, vector<8x8xf32> -> vector<8x8xf32>
    %cst_90 = arith.constant -3.40282347E+38 : f32
    %278 = vector.broadcast %cst_90 : f32 to vector<8x8xf32>
    %279 = arith.select %5, %277, %278 : vector<8x8xi1>, vector<8x8xf32>
    %cst_91 = arith.constant dense<0xFF800000> : vector<8xf32>
    %280 = vector.multi_reduction <maximumf>, %279, %cst_91 [1] : vector<8x8xf32> to vector<8xf32>
    %281 = vector.shape_cast %280 : vector<8xf32> to vector<8x1xf32>
    %282 = vector.broadcast %281 : vector<8x1xf32> to vector<8x8xf32>
    %283 = arith.subf %279, %282 : vector<8x8xf32>
    %284 = math.exp %283 : vector<8x8xf32>
    %cst_92 = arith.constant dense<0.000000e+00> : vector<8xf32>
    %285 = vector.multi_reduction <add>, %284, %cst_92 [1] : vector<8x8xf32> to vector<8xf32>
    %286 = vector.shape_cast %285 : vector<8xf32> to vector<8x1xf32>
    %287 = tpu.reciprocal %286 {approx = true} : vector<8x1xf32> -> vector<8x1xf32>
    %288 = vector.broadcast %287 : vector<8x1xf32> to vector<8x8xf32>
    %289 = arith.mulf %284, %288 : vector<8x8xf32>
    %cst_93 = arith.constant dense<0.000000e+00> : vector<8x8xf32>
    %290 = tpu.matmul %289, %276, %cst_93 {dimension_numbers = #tpu.dot_dimension_numbers<[1], [0], [0], [1], [0, 0, 1, 1], [], []>, precision = #tpu.contract_precision<fp32>} : vector<8x8xf32>, vector<8x8xf32>, vector<8x8xf32> -> vector<8x8xf32>
    %291 = vector.extract_strided_slice %237 {offsets = [0, 24], sizes = [8, 8], strides = [1, 1]} : vector<8x32xf32> to vector<8x8xf32>
    %292 = vector.extract_strided_slice %238 {offsets = [0, 24], sizes = [8, 8], strides = [1, 1]} : vector<8x32xf32> to vector<8x8xf32>
    %293 = vector.extract_strided_slice %239 {offsets = [0, 24], sizes = [8, 8], strides = [1, 1]} : vector<8x32xf32> to vector<8x8xf32>
    %cst_94 = arith.constant dense<0.000000e+00> : vector<8x8xf32>
    %294 = tpu.matmul %291, %292, %cst_94 {dimension_numbers = #tpu.dot_dimension_numbers<[1], [1], [0], [0], [0, 0, 1, 0], [], []>, precision = #tpu.contract_precision<fp32>} : vector<8x8xf32>, vector<8x8xf32>, vector<8x8xf32> -> vector<8x8xf32>
    %cst_95 = arith.constant -3.40282347E+38 : f32
    %295 = vector.broadcast %cst_95 : f32 to vector<8x8xf32>
    %296 = arith.select %5, %294, %295 : vector<8x8xi1>, vector<8x8xf32>
    %cst_96 = arith.constant dense<0xFF800000> : vector<8xf32>
    %297 = vector.multi_reduction <maximumf>, %296, %cst_96 [1] : vector<8x8xf32> to vector<8xf32>
    %298 = vector.shape_cast %297 : vector<8xf32> to vector<8x1xf32>
    %299 = vector.broadcast %298 : vector<8x1xf32> to vector<8x8xf32>
    %300 = arith.subf %296, %299 : vector<8x8xf32>
    %301 = math.exp %300 : vector<8x8xf32>
    %cst_97 = arith.constant dense<0.000000e+00> : vector<8xf32>
    %302 = vector.multi_reduction <add>, %301, %cst_97 [1] : vector<8x8xf32> to vector<8xf32>
    %303 = vector.shape_cast %302 : vector<8xf32> to vector<8x1xf32>
    %304 = tpu.reciprocal %303 {approx = true} : vector<8x1xf32> -> vector<8x1xf32>
    %305 = vector.broadcast %304 : vector<8x1xf32> to vector<8x8xf32>
    %306 = arith.mulf %301, %305 : vector<8x8xf32>
    %cst_98 = arith.constant dense<0.000000e+00> : vector<8x8xf32>
    %307 = tpu.matmul %306, %293, %cst_98 {dimension_numbers = #tpu.dot_dimension_numbers<[1], [0], [0], [1], [0, 0, 1, 1], [], []>, precision = #tpu.contract_precision<fp32>} : vector<8x8xf32>, vector<8x8xf32>, vector<8x8xf32> -> vector<8x8xf32>
    %308 = tpu.concatenate %256, %273, %290, %307 in 1 : vector<8x8xf32>, vector<8x8xf32>, vector<8x8xf32>, vector<8x8xf32> -> vector<8x32xf32>
    %309 = vector.extract_strided_slice %182 {offsets = [0, 0], sizes = [8, 32], strides = [1, 1]} : vector<16x32xf32> to vector<8x32xf32>
    %cst_99 = arith.constant dense<0.000000e+00> : vector<8x32xf32>
    %310 = tpu.matmul %308, %236, %cst_99 {dimension_numbers = #tpu.dot_dimension_numbers<[1], [0], [0], [1], [0, 0, 1, 1], [], []>, precision = #tpu.contract_precision<fp32>} : vector<8x32xf32>, vector<32x32xf32>, vector<8x32xf32> -> vector<8x32xf32>
    %311 = arith.addf %309, %310 : vector<8x32xf32>
    %312 = vector.extract_strided_slice %228 {offsets = [8, 0], sizes = [8, 32], strides = [1, 1]} : vector<16x32xf32> to vector<8x32xf32>
    %313 = vector.extract_strided_slice %233 {offsets = [8, 0], sizes = [8, 32], strides = [1, 1]} : vector<16x32xf32> to vector<8x32xf32>
    %314 = vector.extract_strided_slice %234 {offsets = [8, 0], sizes = [8, 32], strides = [1, 1]} : vector<16x32xf32> to vector<8x32xf32>
    %315 = vector.extract_strided_slice %312 {offsets = [0, 0], sizes = [8, 8], strides = [1, 1]} : vector<8x32xf32> to vector<8x8xf32>
    %316 = vector.extract_strided_slice %313 {offsets = [0, 0], sizes = [8, 8], strides = [1, 1]} : vector<8x32xf32> to vector<8x8xf32>
    %317 = vector.extract_strided_slice %314 {offsets = [0, 0], sizes = [8, 8], strides = [1, 1]} : vector<8x32xf32> to vector<8x8xf32>
    %cst_100 = arith.constant dense<0.000000e+00> : vector<8x8xf32>
    %318 = tpu.matmul %315, %316, %cst_100 {dimension_numbers = #tpu.dot_dimension_numbers<[1], [1], [0], [0], [0, 0, 1, 0], [], []>, precision = #tpu.contract_precision<fp32>} : vector<8x8xf32>, vector<8x8xf32>, vector<8x8xf32> -> vector<8x8xf32>
    %cst_101 = arith.constant -3.40282347E+38 : f32
    %319 = vector.broadcast %cst_101 : f32 to vector<8x8xf32>
    %320 = arith.select %5, %318, %319 : vector<8x8xi1>, vector<8x8xf32>
    %cst_102 = arith.constant dense<0xFF800000> : vector<8xf32>
    %321 = vector.multi_reduction <maximumf>, %320, %cst_102 [1] : vector<8x8xf32> to vector<8xf32>
    %322 = vector.shape_cast %321 : vector<8xf32> to vector<8x1xf32>
    %323 = vector.broadcast %322 : vector<8x1xf32> to vector<8x8xf32>
    %324 = arith.subf %320, %323 : vector<8x8xf32>
    %325 = math.exp %324 : vector<8x8xf32>
    %cst_103 = arith.constant dense<0.000000e+00> : vector<8xf32>
    %326 = vector.multi_reduction <add>, %325, %cst_103 [1] : vector<8x8xf32> to vector<8xf32>
    %327 = vector.shape_cast %326 : vector<8xf32> to vector<8x1xf32>
    %328 = tpu.reciprocal %327 {approx = true} : vector<8x1xf32> -> vector<8x1xf32>
    %329 = vector.broadcast %328 : vector<8x1xf32> to vector<8x8xf32>
    %330 = arith.mulf %325, %329 : vector<8x8xf32>
    %cst_104 = arith.constant dense<0.000000e+00> : vector<8x8xf32>
    %331 = tpu.matmul %330, %317, %cst_104 {dimension_numbers = #tpu.dot_dimension_numbers<[1], [0], [0], [1], [0, 0, 1, 1], [], []>, precision = #tpu.contract_precision<fp32>} : vector<8x8xf32>, vector<8x8xf32>, vector<8x8xf32> -> vector<8x8xf32>
    %332 = vector.extract_strided_slice %312 {offsets = [0, 8], sizes = [8, 8], strides = [1, 1]} : vector<8x32xf32> to vector<8x8xf32>
    %333 = vector.extract_strided_slice %313 {offsets = [0, 8], sizes = [8, 8], strides = [1, 1]} : vector<8x32xf32> to vector<8x8xf32>
    %334 = vector.extract_strided_slice %314 {offsets = [0, 8], sizes = [8, 8], strides = [1, 1]} : vector<8x32xf32> to vector<8x8xf32>
    %cst_105 = arith.constant dense<0.000000e+00> : vector<8x8xf32>
    %335 = tpu.matmul %332, %333, %cst_105 {dimension_numbers = #tpu.dot_dimension_numbers<[1], [1], [0], [0], [0, 0, 1, 0], [], []>, precision = #tpu.contract_precision<fp32>} : vector<8x8xf32>, vector<8x8xf32>, vector<8x8xf32> -> vector<8x8xf32>
    %cst_106 = arith.constant -3.40282347E+38 : f32
    %336 = vector.broadcast %cst_106 : f32 to vector<8x8xf32>
    %337 = arith.select %5, %335, %336 : vector<8x8xi1>, vector<8x8xf32>
    %cst_107 = arith.constant dense<0xFF800000> : vector<8xf32>
    %338 = vector.multi_reduction <maximumf>, %337, %cst_107 [1] : vector<8x8xf32> to vector<8xf32>
    %339 = vector.shape_cast %338 : vector<8xf32> to vector<8x1xf32>
    %340 = vector.broadcast %339 : vector<8x1xf32> to vector<8x8xf32>
    %341 = arith.subf %337, %340 : vector<8x8xf32>
    %342 = math.exp %341 : vector<8x8xf32>
    %cst_108 = arith.constant dense<0.000000e+00> : vector<8xf32>
    %343 = vector.multi_reduction <add>, %342, %cst_108 [1] : vector<8x8xf32> to vector<8xf32>
    %344 = vector.shape_cast %343 : vector<8xf32> to vector<8x1xf32>
    %345 = tpu.reciprocal %344 {approx = true} : vector<8x1xf32> -> vector<8x1xf32>
    %346 = vector.broadcast %345 : vector<8x1xf32> to vector<8x8xf32>
    %347 = arith.mulf %342, %346 : vector<8x8xf32>
    %cst_109 = arith.constant dense<0.000000e+00> : vector<8x8xf32>
    %348 = tpu.matmul %347, %334, %cst_109 {dimension_numbers = #tpu.dot_dimension_numbers<[1], [0], [0], [1], [0, 0, 1, 1], [], []>, precision = #tpu.contract_precision<fp32>} : vector<8x8xf32>, vector<8x8xf32>, vector<8x8xf32> -> vector<8x8xf32>
    %349 = vector.extract_strided_slice %312 {offsets = [0, 16], sizes = [8, 8], strides = [1, 1]} : vector<8x32xf32> to vector<8x8xf32>
    %350 = vector.extract_strided_slice %313 {offsets = [0, 16], sizes = [8, 8], strides = [1, 1]} : vector<8x32xf32> to vector<8x8xf32>
    %351 = vector.extract_strided_slice %314 {offsets = [0, 16], sizes = [8, 8], strides = [1, 1]} : vector<8x32xf32> to vector<8x8xf32>
    %cst_110 = arith.constant dense<0.000000e+00> : vector<8x8xf32>
    %352 = tpu.matmul %349, %350, %cst_110 {dimension_numbers = #tpu.dot_dimension_numbers<[1], [1], [0], [0], [0, 0, 1, 0], [], []>, precision = #tpu.contract_precision<fp32>} : vector<8x8xf32>, vector<8x8xf32>, vector<8x8xf32> -> vector<8x8xf32>
    %cst_111 = arith.constant -3.40282347E+38 : f32
    %353 = vector.broadcast %cst_111 : f32 to vector<8x8xf32>
    %354 = arith.select %5, %352, %353 : vector<8x8xi1>, vector<8x8xf32>
    %cst_112 = arith.constant dense<0xFF800000> : vector<8xf32>
    %355 = vector.multi_reduction <maximumf>, %354, %cst_112 [1] : vector<8x8xf32> to vector<8xf32>
    %356 = vector.shape_cast %355 : vector<8xf32> to vector<8x1xf32>
    %357 = vector.broadcast %356 : vector<8x1xf32> to vector<8x8xf32>
    %358 = arith.subf %354, %357 : vector<8x8xf32>
    %359 = math.exp %358 : vector<8x8xf32>
    %cst_113 = arith.constant dense<0.000000e+00> : vector<8xf32>
    %360 = vector.multi_reduction <add>, %359, %cst_113 [1] : vector<8x8xf32> to vector<8xf32>
    %361 = vector.shape_cast %360 : vector<8xf32> to vector<8x1xf32>
    %362 = tpu.reciprocal %361 {approx = true} : vector<8x1xf32> -> vector<8x1xf32>
    %363 = vector.broadcast %362 : vector<8x1xf32> to vector<8x8xf32>
    %364 = arith.mulf %359, %363 : vector<8x8xf32>
    %cst_114 = arith.constant dense<0.000000e+00> : vector<8x8xf32>
    %365 = tpu.matmul %364, %351, %cst_114 {dimension_numbers = #tpu.dot_dimension_numbers<[1], [0], [0], [1], [0, 0, 1, 1], [], []>, precision = #tpu.contract_precision<fp32>} : vector<8x8xf32>, vector<8x8xf32>, vector<8x8xf32> -> vector<8x8xf32>
    %366 = vector.extract_strided_slice %312 {offsets = [0, 24], sizes = [8, 8], strides = [1, 1]} : vector<8x32xf32> to vector<8x8xf32>
    %367 = vector.extract_strided_slice %313 {offsets = [0, 24], sizes = [8, 8], strides = [1, 1]} : vector<8x32xf32> to vector<8x8xf32>
    %368 = vector.extract_strided_slice %314 {offsets = [0, 24], sizes = [8, 8], strides = [1, 1]} : vector<8x32xf32> to vector<8x8xf32>
    %cst_115 = arith.constant dense<0.000000e+00> : vector<8x8xf32>
    %369 = tpu.matmul %366, %367, %cst_115 {dimension_numbers = #tpu.dot_dimension_numbers<[1], [1], [0], [0], [0, 0, 1, 0], [], []>, precision = #tpu.contract_precision<fp32>} : vector<8x8xf32>, vector<8x8xf32>, vector<8x8xf32> -> vector<8x8xf32>
    %cst_116 = arith.constant -3.40282347E+38 : f32
    %370 = vector.broadcast %cst_116 : f32 to vector<8x8xf32>
    %371 = arith.select %5, %369, %370 : vector<8x8xi1>, vector<8x8xf32>
    %cst_117 = arith.constant dense<0xFF800000> : vector<8xf32>
    %372 = vector.multi_reduction <maximumf>, %371, %cst_117 [1] : vector<8x8xf32> to vector<8xf32>
    %373 = vector.shape_cast %372 : vector<8xf32> to vector<8x1xf32>
    %374 = vector.broadcast %373 : vector<8x1xf32> to vector<8x8xf32>
    %375 = arith.subf %371, %374 : vector<8x8xf32>
    %376 = math.exp %375 : vector<8x8xf32>
    %cst_118 = arith.constant dense<0.000000e+00> : vector<8xf32>
    %377 = vector.multi_reduction <add>, %376, %cst_118 [1] : vector<8x8xf32> to vector<8xf32>
    %378 = vector.shape_cast %377 : vector<8xf32> to vector<8x1xf32>
    %379 = tpu.reciprocal %378 {approx = true} : vector<8x1xf32> -> vector<8x1xf32>
    %380 = vector.broadcast %379 : vector<8x1xf32> to vector<8x8xf32>
    %381 = arith.mulf %376, %380 : vector<8x8xf32>
    %cst_119 = arith.constant dense<0.000000e+00> : vector<8x8xf32>
    %382 = tpu.matmul %381, %368, %cst_119 {dimension_numbers = #tpu.dot_dimension_numbers<[1], [0], [0], [1], [0, 0, 1, 1], [], []>, precision = #tpu.contract_precision<fp32>} : vector<8x8xf32>, vector<8x8xf32>, vector<8x8xf32> -> vector<8x8xf32>
    %383 = tpu.concatenate %331, %348, %365, %382 in 1 : vector<8x8xf32>, vector<8x8xf32>, vector<8x8xf32>, vector<8x8xf32> -> vector<8x32xf32>
    %384 = vector.extract_strided_slice %182 {offsets = [8, 0], sizes = [8, 32], strides = [1, 1]} : vector<16x32xf32> to vector<8x32xf32>
    %cst_120 = arith.constant dense<0.000000e+00> : vector<8x32xf32>
    %385 = tpu.matmul %383, %236, %cst_120 {dimension_numbers = #tpu.dot_dimension_numbers<[1], [0], [0], [1], [0, 0, 1, 1], [], []>, precision = #tpu.contract_precision<fp32>} : vector<8x32xf32>, vector<32x32xf32>, vector<8x32xf32> -> vector<8x32xf32>
    %386 = arith.addf %384, %385 : vector<8x32xf32>
    %387 = tpu.concatenate %311, %386 in 0 : vector<8x32xf32>, vector<8x32xf32> -> vector<16x32xf32>
    %388 = arith.mulf %387, %387 : vector<16x32xf32>
    %cst_121 = arith.constant dense<0.000000e+00> : vector<16xf32>
    %389 = vector.multi_reduction <add>, %388, %cst_121 [1] : vector<16x32xf32> to vector<16xf32>
    %390 = vector.shape_cast %389 : vector<16xf32> to vector<16x1xf32>
    %cst_122 = arith.constant 3.200000e+01 : f32
    %391 = vector.broadcast %cst_122 : f32 to vector<16x1xf32>
    %392 = arith.divf %390, %391 : vector<16x1xf32>
    %cst_123 = arith.constant 9.99999974E-6 : f32
    %393 = vector.broadcast %cst_123 : f32 to vector<16x1xf32>
    %394 = arith.addf %392, %393 : vector<16x1xf32>
    %395 = math.rsqrt %394 : vector<16x1xf32>
    %396 = vector.broadcast %395 : vector<16x1xf32> to vector<16x32xf32>
    %397 = arith.mulf %387, %396 : vector<16x32xf32>
    %c1_124 = arith.constant 1 : index
    %c0_125 = arith.constant 0 : index
    %c0_126 = arith.constant 0 : index
    %398 = vector.load %arg5[%c1_124, %c0_125, %c0_126] : memref<2x32x192xf32, #tpu.memory_space<vmem>>, vector<1x32x192xf32>
    %399 = vector.shape_cast %398 : vector<1x32x192xf32> to vector<32x192xf32>
    %cst_127 = arith.constant dense<0.000000e+00> : vector<16x192xf32>
    %400 = tpu.matmul %397, %399, %cst_127 {dimension_numbers = #tpu.dot_dimension_numbers<[1], [0], [0], [1], [0, 0, 1, 1], [], []>, precision = #tpu.contract_precision<fp32>} : vector<16x32xf32>, vector<32x192xf32>, vector<16x192xf32> -> vector<16x192xf32>
    %401 = vector.extract_strided_slice %400 {offsets = [0, 0], sizes = [16, 96], strides = [1, 1]} : vector<16x192xf32> to vector<16x96xf32>
    %402 = vector.extract_strided_slice %400 {offsets = [0, 96], sizes = [16, 96], strides = [1, 1]} : vector<16x192xf32> to vector<16x96xf32>
    %cst_128 = arith.constant 0.000000e+00 : f32
    %403 = vector.broadcast %cst_128 : f32 to vector<16x96xf32>
    %404 = arith.subf %403, %401 : vector<16x96xf32>
    %405 = math.exp %404 : vector<16x96xf32>
    %cst_129 = arith.constant 1.000000e+00 : f32
    %406 = vector.broadcast %cst_129 : f32 to vector<16x96xf32>
    %407 = arith.addf %406, %405 : vector<16x96xf32>
    %cst_130 = arith.constant 1.000000e+00 : f32
    %408 = vector.broadcast %cst_130 : f32 to vector<16x96xf32>
    %409 = arith.divf %408, %407 : vector<16x96xf32>
    %410 = arith.mulf %401, %409 : vector<16x96xf32>
    %411 = arith.mulf %410, %402 : vector<16x96xf32>
    %c1_131 = arith.constant 1 : index
    %c0_132 = arith.constant 0 : index
    %c0_133 = arith.constant 0 : index
    %412 = vector.load %arg6[%c1_131, %c0_132, %c0_133] : memref<2x96x32xf32, #tpu.memory_space<vmem>>, vector<1x96x32xf32>
    %413 = vector.shape_cast %412 : vector<1x96x32xf32> to vector<96x32xf32>
    %cst_134 = arith.constant dense<0.000000e+00> : vector<16x32xf32>
    %414 = tpu.matmul %411, %413, %cst_134 {dimension_numbers = #tpu.dot_dimension_numbers<[1], [0], [0], [1], [0, 0, 1, 1], [], []>, precision = #tpu.contract_precision<fp32>} : vector<16x96xf32>, vector<96x32xf32>, vector<16x32xf32> -> vector<16x32xf32>
    %415 = arith.addf %210, %414 : vector<16x32xf32>
    %416 = arith.addf %387, %415 : vector<16x32xf32>
    %cst_135 = arith.constant 5.000000e-01 : f32
    %417 = vector.broadcast %cst_135 : f32 to vector<16x32xf32>
    %418 = arith.mulf %416, %417 : vector<16x32xf32>
    %419 = arith.mulf %418, %418 : vector<16x32xf32>
    %cst_136 = arith.constant dense<0.000000e+00> : vector<16xf32>
    %420 = vector.multi_reduction <add>, %419, %cst_136 [1] : vector<16x32xf32> to vector<16xf32>
    %421 = vector.shape_cast %420 : vector<16xf32> to vector<16x1xf32>
    %cst_137 = arith.constant 3.200000e+01 : f32
    %422 = vector.broadcast %cst_137 : f32 to vector<16x1xf32>
    %423 = arith.divf %421, %422 : vector<16x1xf32>
    %cst_138 = arith.constant 9.99999974E-6 : f32
    %424 = vector.broadcast %cst_138 : f32 to vector<16x1xf32>
    %425 = arith.addf %423, %424 : vector<16x1xf32>
    %426 = math.rsqrt %425 : vector<16x1xf32>
    %427 = vector.broadcast %426 : vector<16x1xf32> to vector<16x32xf32>
    %428 = arith.mulf %418, %427 : vector<16x32xf32>
    %c0_139 = arith.constant 0 : index
    %c0_140 = arith.constant 0 : index
    %429 = vector.load %arg7[%c0_139, %c0_140] : memref<32x128xf32, #tpu.memory_space<vmem>>, vector<32x128xf32>
    %cst_141 = arith.constant dense<0.000000e+00> : vector<16x128xf32>
    %430 = tpu.matmul %428, %429, %cst_141 {dimension_numbers = #tpu.dot_dimension_numbers<[1], [0], [0], [1], [0, 0, 1, 1], [], []>, precision = #tpu.contract_precision<fp32>} : vector<16x32xf32>, vector<32x128xf32>, vector<16x128xf32> -> vector<16x128xf32>
    %c0_142 = arith.constant 0 : index
    %c0_143 = arith.constant 0 : index
    %431 = vector.load %arg8[%c0_142, %c0_143] : memref<16x128xf32, #tpu.memory_space<vmem>>, vector<16x128xf32>
    tpu.vector_store %arg8[%c0_142, %c0_143], %430 {strides = array<i32>} : memref<16x128xf32, #tpu.memory_space<vmem>>, vector<16x128xf32>,
    return
  }
}

</mosaic_0001>

<bundles_post_ra>
// kernel: tpu_custom_call.1
= control target key start
LH: loop header
LB: loop body
LE: loop exit
PB: predicated region body
PF: predicated region fallthrough
CT: control target
= control target key end

     0   :  { %13 = vsyncpa [#allocation3], 0  ;;  %s27334_s0 = inlined_call_operand.hbm [shape: f32[16,32], index: 0, kind: input, shape index: {}]   ;;  %s27335_s1 = inlined_call_operand.hbm [shape: f32[16,32], index: 1, kind: input, shape index: {}]   ;;  %s27336_s2 = inlined_call_operand.hbm [shape: f32[16,32], index: 2, kind: input, shape index: {}]   ;;  %s27337_s3 = inlined_call_operand.vmem [shape: f32[2,32,160], index: 3, kind: input, shape index: {}]   ;;  %s27338_s4 = inlined_call_operand.hbm [shape: f32[2,32,32], index: 4, kind: input, shape index: {}]   ;;  %s27339_s5 = inlined_call_operand.vmem [shape: f32[2,32,192], index: 5, kind: input, shape index: {}]   ;;  %s27340_s6 = inlined_call_operand.vmem [shape: f32[2,96,32], index: 6, kind: input, shape index: {}]   ;;  %s27341_s7 = inlined_call_operand.hbm [shape: f32[32,128], index: 7, kind: input, shape index: {}]   ;;  %s27342_s8 = inlined_call_operand.hbm [shape: f32[16,128], index: 8, kind: output, shape index: {}]  }
   0x1   :  { %14 = vsyncpa [#allocation6], 0 }
   0x2   :  { %15 = vsyncpa [#allocation9], 0 }
   0x3   :  { %16 = vsyncpa [#allocation4], 0  ;;  %s25065_s27 = smov [#allocation5]   ;;  %s25066_s29 = smov [#allocation8]  }
   0x4   :  { %s34_s28 = sshll.u32 %s25065_s27, 4  ;;  %s60_s30 = sshll.u32 %s25066_s29, 4  ;;  %s35_s28 = int_to_ptr.vmem [resolvable:$true] %s34_s28  ;;  %s25135_s30 = int_to_ptr.vmem [resolvable:$true] %s60_s30 }
   0x5   :  { %s24925_s11 = scalar_lea.hbm %s27335_s1, 256 }
   0x6   :  { %p24926_p0 = scmp.ne.s32.totalorder %s27335_s1, %s24925_s11  ;;  %p24929_p1 = scmp.lt.u32.totalorder %s24925_s11, %s27335_s1 }
   0x8   :  { %p24931_p2 = pnand %p24929_p1, %p24926_p0 }
   0xa   :  { %24934 = shalt.err (!%p24931_p2)
}
   0xb   :  { %s24935_s16 = scalar_lea.vmem %s35_s28, 256  ;;  %p24940_p4 = scmp.lt.s32.totalorder %s35_s28, %s35_s28 }
   0xc   :  { %p24936_p3 = scmp.ne.s32.totalorder %s35_s28, %s24935_s16  ;;  %p24941_p5 = scmp.lt.s32.totalorder %s24935_s16, %s24935_s16 }
   0xe   :  { %p24942_p6 = por %p24941_p5, %p24940_p4 }
  0x10   :  { %p24943_p7 = pnand %p24942_p6, %p24936_p3 }
  0x12   :  { %24946 = shalt.err (!%p24943_p7)
}
  0x13   :  { %s25067_s17 = smov 128   ;;  %s25068_s18 = smov 8  }
  0x14   :  { %40 = dma.hbm_to_vmem [thread:$0]  %s27335_s1, 256, %s35_s28, [#allocation6], %s25067_s17, %s25067_s17, %s25068_s18  }
  0x15   :  { %s24947_s23 = scalar_lea.hbm %s27338_s4, 1024 }
  0x16   :  { %p24948_p8 = scmp.ne.s32.totalorder %s27338_s4, %s24947_s23  ;;  %p24951_p9 = scmp.lt.u32.totalorder %s24947_s23, %s27338_s4 }
  0x18   :  { %p24953_p10 = pnand %p24951_p9, %p24948_p8 }
  0x1a   :  { %24956 = shalt.err (!%p24953_p10)
}
  0x1b   :  { %s24957_s29 = scalar_lea.vmem %s25135_s30, 1024  ;;  %p24962_p12 = scmp.lt.s32.totalorder %s25135_s30, %s25135_s30 }
  0x1c   :  { %p24958_p11 = scmp.ne.s32.totalorder %s25135_s30, %s24957_s29  ;;  %p24963_p13 = scmp.lt.s32.totalorder %s24957_s29, %s24957_s29 }
  0x1e   :  { %p24964_p0 = por %p24963_p13, %p24962_p12 }
  0x20   :  { %p24965_p1 = pnand %p24964_p0, %p24958_p11 }
  0x22   :  { %24968 = shalt.err (!%p24965_p1)
}
  0x23   :  { %66 = dma.hbm_to_vmem [thread:$0]  %s27338_s4, 1024, %s25135_s30, [#allocation9], %s25067_s17, %s25067_s17, %s25068_s18  }
  0x24   :  { %s25069_s9 = smov [#allocation2]   ;;  %s25070_s11 = smov [#allocation7]  }
  0x25   :  { %s22_s10 = sshll.u32 %s25069_s9, 4  ;;  %s46_s12 = sshll.u32 %s25070_s11, 4  ;;  %s23_s10 = int_to_ptr.vmem [resolvable:$true] %s22_s10  ;;  %s25172_s12 = int_to_ptr.vmem [resolvable:$true] %s46_s12 }
  0x26   :  { %s24969_s15 = scalar_lea.hbm %s27334_s0, 256 }
  0x27   :  { %p24970_p2 = scmp.ne.s32.totalorder %s27334_s0, %s24969_s15  ;;  %p24973_p3 = scmp.lt.u32.totalorder %s24969_s15, %s27334_s0 }
  0x29   :  { %p24975_p4 = pnand %p24973_p3, %p24970_p2 }
  0x2b   :  { %24978 = shalt.err (!%p24975_p4)
}
  0x2c   :  { %s24979_s4 = scalar_lea.vmem %s23_s10, 256  ;;  %p24984_p6 = scmp.lt.s32.totalorder %s23_s10, %s23_s10 }
  0x2d   :  { %p24980_p5 = scmp.ne.s32.totalorder %s23_s10, %s24979_s4  ;;  %p24985_p7 = scmp.lt.s32.totalorder %s24979_s4, %s24979_s4 }
  0x2f   :  { %p24986_p8 = por %p24985_p7, %p24984_p6 }
  0x31   :  { %p24987_p9 = pnand %p24986_p8, %p24980_p5 }
  0x33   :  { %24990 = shalt.err (!%p24987_p9)
}
  0x34   :  { %28 = dma.hbm_to_vmem [thread:$0]  %s27334_s0, 256, %s23_s10, [#allocation3], %s25067_s17, %s25067_s17, %s25068_s18  }
  0x35   :  { %s24991_s25 = scalar_lea.hbm %s27336_s2, 256 }
  0x36   :  { %p24992_p10 = scmp.ne.s32.totalorder %s27336_s2, %s24991_s25  ;;  %p24995_p11 = scmp.lt.u32.totalorder %s24991_s25, %s27336_s2 }
  0x38   :  { %p24997_p12 = pnand %p24995_p11, %p24992_p10 }
  0x3a   :  { %25000 = shalt.err (!%p24997_p12)
}
  0x3b   :  { %s25001_s28 = scalar_lea.vmem %s25172_s12, 256  ;;  %p25006_p0 = scmp.lt.s32.totalorder %s25172_s12, %s25172_s12 }
  0x3c   :  { %p25002_p13 = scmp.ne.s32.totalorder %s25172_s12, %s25001_s28  ;;  %p25007_p1 = scmp.lt.s32.totalorder %s25001_s28, %s25001_s28 }
  0x3e   :  { %p25008_p2 = por %p25007_p1, %p25006_p0 }
  0x40   :  { %p25009_p3 = pnand %p25008_p2, %p25002_p13 }
  0x42   :  { %25012 = shalt.err (!%p25009_p3)
}
  0x43   :  { %52 = dma.hbm_to_vmem [thread:$0]  %s27336_s2, 256, %s25172_s12, [#allocation6], %s25067_s17, %s25067_s17, %s25068_s18  }
  0x44   :  { %s25071_s10 = smov [#allocation10]   ;;  %s25013_s15 = scalar_lea.hbm %s27341_s7, 512 }
  0x45   :  { %s76_s11 = sshll.u32 %s25071_s10, 4  ;;  %p25014_p4 = scmp.ne.s32.totalorder %s27341_s7, %s25013_s15  ;;  %s77_s11 = int_to_ptr.vmem [resolvable:$true] %s76_s11 }
  0x46   :  { %p25017_p5 = scmp.lt.u32.totalorder %s25013_s15, %s27341_s7 }
  0x48   :  { %p25019_p6 = pnand %p25017_p5, %p25014_p4 }
  0x4a   :  { %25022 = shalt.err (!%p25019_p6)
}
  0x4b   :  { %s25023_s4 = scalar_lea.vmem %s77_s11, 512  ;;  %p25028_p8 = scmp.lt.s32.totalorder %s77_s11, %s77_s11 }
  0x4c   :  { %p25024_p7 = scmp.ne.s32.totalorder %s77_s11, %s25023_s4  ;;  %p25029_p9 = scmp.lt.s32.totalorder %s25023_s4, %s25023_s4 }
  0x4e   :  { %p25030_p10 = por %p25029_p9, %p25028_p8 }
  0x50   :  { %p25031_p11 = pnand %p25030_p10, %p25024_p7 }
  0x52   :  { %25034 = shalt.err (!%p25031_p11)
}
  0x53   :  { %82 = dma.hbm_to_vmem [thread:$0]  %s27341_s7, 512, %s77_s11, [#allocation9], %s25067_s17, %s25067_s17, %s25068_s18  }
  0x54   :  { %25057 = dma.done.wait [#allocation3], 256  }
  0x55   :  { %25058 = vsyncadd [#allocation3], 4294967040 }
  0x56   :  { %25059 = dma.done.wait [#allocation6], 512  }
  0x57   :  { %25060 = vsyncadd [#allocation6], 4294966784 }
  0x58   :  { %25061 = dma.done.wait [#allocation9], 1536  }
  0x59   :  { %25062 = vsyncadd [#allocation9], 4294965760  ;;  %v25224_v0 = vld [vmem:[#allocation2] sm:$0xff]  ;;  %vm111_vm0 = vcmask 261120   ;;  %v25226_v1 = vld [vmem:[#allocation2 + $0x8] sm:$0xff]  ;;  %v27345_v15 = vmov 0.0  }
  0x5a   :  { %v109_v2 = vmul.f32 %v25224_v0, %v25224_v0  ;;  %v110_v3 = vmul.f32 %v25226_v1, %v25226_v1  ;;  %v128_v6 = vld [vmem:[%s27337_s3 + $0x8] sm:$0xff]  ;;  %v130_v7 = vld [vmem:[%s27337_s3 + $0x18] sm:$0xff]  ;;  %v127_v8 = vld [vmem:[%s27337_s3] sm:$0xff]  ;;  %213 = vmatprep.mubr.f32.mxu0 %v27345_v15  ;;  %22078 = vmatprep.subr.mxu1 %v27345_v15  ;;  %s25073_s14 = smov 96   ;;  %s25074_s15 = smov 32   ;;  %vm25075_vm1 = vmmov 0  }
  0x5b   :  { %v141_v9 = vand.u32 4294901760, %v128_v6  ;;  %v145_v10 = vand.u32 4294901760, %v130_v7  ;;  %v129_v11 = vld [vmem:[%s27337_s3 + $0x10] sm:$0xff]  ;;  %v143_v12 = vand.u32 4294901760, %v127_v8  ;;  %v132_v13 = vld [vmem:[%s27337_s3 + $0x28] sm:$0xff]  ;;  %v134_v14 = vld [vmem:[%s27337_s3 + $0x38] sm:$0xff]  ;;  %22080 = vmatprep.mubr.msk.f32.mxu1 %vm25075_vm1, %v27345_v15 }
  0x5c   :  { %v112_v4 = vsel %vm111_vm0, %v109_v2, 0.0  ;;  %v115_v5 = vsel %vm111_vm0, %v110_v3, 0.0  ;;  %v147_v16 = vand.u32 4294901760, %v129_v11  ;;  %v149_v17 = vand.u32 4294901760, %v132_v13  ;;  %v131_v19 = vld [vmem:[%s27337_s3 + $0x20] sm:$0xff]  ;;  %v133_v20 = vld [vmem:[%s27337_s3 + $0x30] sm:$0xff] }
  0x5d   :  { %113 = vadd.xlane.f32.xlu0 %v112_v4  ;;  %v153_v18 = vand.u32 4294901760, %v134_v14  ;;  %v25260_v21 = vpack.c.bf16 %v145_v10, %v141_v9  ;;  %v25262_v22 = vsub.f32 %v127_v8, %v143_v12  ;;  %v151_v28 = vand.u32 4294901760, %v131_v19  ;;  %s25076_s16 = smov 64   ;;  %s25077_s19 = smov 88  }
  0x5e   :  { %v25264_v23 = vpack.c.bf16 %v147_v16, %v143_v12  ;;  %v25266_v24 = vsub.f32 %v129_v11, %v147_v16  ;;  %v25270_v26 = vsub.f32 %v132_v13, %v149_v17  ;;  %v155_v29 = vand.u32 4294901760, %v133_v20  ;;  %s25078_s20 = smov 112   ;;  %s25079_s21 = smov 80  }
  0x5f   :  { %v25268_v25 = vpack.c.bf16 %v153_v18, %v149_v17  ;;  %23693 = vmatprep.subr.bf16.mxu0 %v25260_v21  ;;  %v25273_v27 = vsub.f32 %v134_v14, %v153_v18  ;;  %v25279_v31 = vsub.f32 %v131_v19, %v151_v28  ;;  %v25283_v33 = vsub.f32 %v128_v6, %v141_v9  ;;  %v25312_v9 = vld [vmem:[#allocation7] sm:$0xff]  ;;  %s25080_s4 = smov 104   ;;  %s25081_s2 = smov 120  }
  0x60   :  { %23695 = vmatpush1.bf16.msra.mxu0 %v25264_v23  ;;  %v25277_v30 = vpack.c.bf16 %v155_v29, %v151_v28  ;;  %v25281_v32 = vsub.f32 %v133_v20, %v155_v29  ;;  %v25285_v34 = vsub.f32 %v130_v7, %v145_v10  ;;  %v244_v37 = vand.u32 4294901760, %v25262_v22  ;;  %737 = vrot.lane.b32.xlu1 %v25312_v9, %s25073_s14  ;;  %v25316_v10 = vld [vmem:[#allocation5] sm:$0xff]  ;;  %s25082_s12 = smov 72   ;;  %s25083_s7 = smov 56  }
  0x61   :  { %116 = vadd.xlane.f32.xlu0 %v115_v5  ;;  %23697 = vmatprep.subr.bf16.mxu0 %v25268_v25  ;;  %v238_v35 = vand.u32 4294901760, %v25283_v33  ;;  %v256_v38 = vand.u32 4294901760, %v25266_v24  ;;  %v262_v45 = vand.u32 4294901760, %v25270_v26  ;;  %v274_v46 = vand.u32 4294901760, %v25273_v27  ;;  %s25084_s30 = smov 48   ;;  %s25085_s22 = smov 40  }
  0x62   :  { %v250_v36 = vand.u32 4294901760, %v25285_v34  ;;  %v245_v41 = vsub.f32 %v25262_v22, %v244_v37  ;;  %v268_v49 = vand.u32 4294901760, %v25279_v31  ;;  %v280_v50 = vand.u32 4294901760, %v25281_v32  ;;  %s25087_s23 = smov 16   ;;  %s25088_s24 = smov 24  }
  0x63   :  { %v239_v39 = vsub.f32 %v25283_v33, %v238_v35  ;;  %v257_v42 = vsub.f32 %v25266_v24, %v256_v38  ;;  %v263_v52 = vsub.f32 %v25270_v26, %v262_v45  ;;  %v275_v53 = vsub.f32 %v25273_v27, %v274_v46 }
  0x64   :  { %23699 = vmatpush1.bf16.msra.mxu0 %v25277_v30  ;;  %v251_v40 = vsub.f32 %v25285_v34, %v250_v36  ;;  %v246_v47 = vand.u32 4294901760, %v245_v41  ;;  %v269_v55 = vsub.f32 %v25279_v31, %v268_v49  ;;  %v281_v56 = vsub.f32 %v25281_v32, %v280_v50  ;;  %757 = vrot.lane.b32.xlu1 %v25316_v10, %s25074_s15 }
  0x65   :  { %v240_v43 = vand.u32 4294901760, %v239_v39  ;;  %v258_v48 = vand.u32 4294901760, %v257_v42  ;;  %v264_v57 = vand.u32 4294901760, %v263_v52  ;;  %v276_v58 = vand.u32 4294901760, %v275_v53 }
  0x66   :  { %v252_v44 = vand.u32 4294901760, %v251_v40  ;;  %v270_v59 = vand.u32 4294901760, %v269_v55  ;;  %v282_v60 = vand.u32 4294901760, %v281_v56  ;;  %v23708_v63 = vpack.c.bf16 %v25285_v34, %v25283_v33 }
  0x67   :  { %v23702_v54 = vpack.c.bf16 %v258_v48, %v246_v47  ;;  %v23704_v61 = vpack.c.bf16 %v276_v58, %v264_v57  ;;  %v23710_v2 = vpack.c.bf16 %v25266_v24, %v25262_v22  ;;  %v23712_v3 = vpack.c.bf16 %v25273_v27, %v25270_v26 }
  0x68   :  { %v23700_v51 = vpack.c.bf16 %v252_v44, %v240_v43  ;;  %v23706_v62 = vpack.c.bf16 %v282_v60, %v270_v59  ;;  %v23714_v4 = vpack.c.bf16 %v25281_v32, %v25279_v31  ;;  %v23724_v5 = vpack.c.bf16 %v250_v36, %v238_v35 }
  0x69   :  { %v23726_v6 = vpack.c.bf16 %v256_v38, %v244_v37  ;;  %v23728_v7 = vpack.c.bf16 %v274_v46, %v262_v45  ;;  %v23730_v8 = vpack.c.bf16 %v280_v50, %v268_v49  ;;  %vm784_vm2 = vcmask 64512  }
  0x6a   :  { %23701 = vmatprep.subr.bf16.mxu0 %v23700_v51  ;;  %v104_v59 = vlaneseq  ;;  %vm4468_vm4 = vcmask 130048   ;;  %vm4470_vm5 = vcmask 195584   ;;  %vm9804_vm6 = vcmask 785408  }
  0x6c   :  { %v105_v60 = vshrl.u32 %v104_v59, 7 }
  0xea   :  { %v114_v11 = vpop.xlane.xlu0 %113 }
  0xeb   :  { %v119_v12 = vmul.f32 0.03125, %v114_v11 }
  0xed   :  { %v121_v13 = vadd.f32 1e-05, %v119_v12 }
  0xee   :  { %v117_v14 = vpop.xlane.xlu0 %116 }
  0xef   :  { %24819 = vrsqrt.f32 %v121_v13  ;;  %v120_v16 = vmul.f32 0.03125, %v117_v14 }
  0xf1   :  { %v122_v17 = vadd.f32 1e-05, %v120_v16 }
  0xf3   :  { %24821 = vrsqrt.f32 %v122_v17 }
  0xf9   :  { %v24820_v18 = vpop.eup %24819 }
  0xfa   :  { %v125_v19 = vmul.f32 %v24820_v18, %v25224_v0 }
  0xfc   :  { %v136_v20 = vsel %vm111_vm0, %v125_v19, 0 }
  0xfd   :  { %v24822_v22 = vpop.eup %24821  ;;  %v214_v24 = vand.u32 4294901760, %v136_v20 }
  0xfe   :  { %v126_v26 = vmul.f32 %v24822_v22, %v25226_v1  ;;  %v25344_v1 = vpop.permute.xlu1 %737 }
  0xff   :  { %v215_v27 = vsub.f32 %v136_v20, %v214_v24 }
 0x100   :  { %v139_v28 = vsel %vm111_vm0, %v126_v26, 0 }
 0x101   :  { %v216_v29 = vand.u32 4294901760, %v215_v27  ;;  %v225_v31 = vand.u32 4294901760, %v139_v28 }
 0x102   :  { %v25361_v39 = vpop.permute.xlu1 %757 }
 0x103   :  { %v217_v32 = vsub.f32 %v215_v27, %v216_v29  ;;  %v226_v33 = vsub.f32 %v139_v28, %v225_v31 }
 0x105   :  { %v218_v34 = vand.u32 4294901760, %v217_v32  ;;  %v227_v35 = vand.u32 4294901760, %v226_v33 }
 0x107   :  { %219 = vmatmul.mubr.f32.vlgmr.msra.gmra.mrb[0].mxu0 %v218_v34  ;;  %v228_v36 = vsub.f32 %v226_v33, %v227_v35 }
 0x108   :  { %23703 = vmatpush1.bf16.msra.mxu0 %v23702_v54  ;;  %224 = vmatprep.mubr.f32.mxu0 %v27345_v15 }
 0x109   :  { %v229_v0 = vand.u32 4294901760, %v228_v36  ;;  %23705 = vmatprep.subr.bf16.mxu0 %v23704_v61  ;;  %v107_v61 = vand.u32 127, %v104_v59 }
 0x10b   :  { %230 = vmatmul.mubr.f32.gmra.mrb[2].mxu0 %v229_v0  ;;  %vm25394_vm3 = vcmp.le.s32.totalorder %v107_v61, %v105_v60 }
 0x10c   :  { %23707 = vmatpush1.bf16.msra.mxu0 %v23706_v62  ;;  %340 = vmatprep.mubr.f32.mxu0 %v27345_v15 }
 0x10d   :  { %23709 = vmatprep.subr.bf16.mxu0 %v23708_v63 }
 0x10f   :  { %342 = vmatmul.mubr.f32.vlgmr.msra.gmra.mrb[0].mxu0 %v214_v24 }
 0x110   :  { %23711 = vmatpush1.bf16.msra.mxu0 %v23710_v2  ;;  %347 = vmatprep.mubr.f32.mxu0 %v27345_v15 }
 0x111   :  { %23713 = vmatprep.subr.bf16.mxu0 %v23712_v3 }
 0x113   :  { %349 = vmatmul.mubr.f32.gmra.mrb[2].mxu0 %v225_v31 }
 0x114   :  { %23715 = vmatpush1.bf16.msra.mxu0 %v23714_v4  ;;  %435 = vmatprep.mubr.f32.mxu0 %v27345_v15 }
 0x115   :  { %23717 = vmatprep.subr.bf16.mxu0 %v25260_v21 }
 0x117   :  { %438 = vmatmul.mubr.f32.vlgmr.msra.gmra.mrb[0].mxu0 %v215_v27 }
 0x118   :  { %23719 = vmatpush1.bf16.msra.mxu0 %v25264_v23  ;;  %443 = vmatprep.mubr.f32.mxu0 %v27345_v15 }
 0x119   :  { %23721 = vmatprep.subr.bf16.mxu0 %v25268_v25 }
 0x11b   :  { %446 = vmatmul.mubr.f32.gmra.mrb[2].mxu0 %v226_v33 }
 0x11c   :  { %23723 = vmatpush1.bf16.msra.mxu0 %v25277_v30  ;;  %524 = vmatprep.mubr.f32.mxu0 %v27345_v15 }
 0x11d   :  { %23725 = vmatprep.subr.bf16.mxu0 %v23724_v5 }
 0x11f   :  { %528 = vmatmul.mubr.f32.vlgmr.msra.gmra.mrb[0].mxu0 %v216_v29 }
 0x120   :  { %23727 = vmatpush1.bf16.msra.mxu0 %v23726_v6  ;;  %533 = vmatprep.mubr.f32.mxu0 %v27345_v15 }
 0x121   :  { %23729 = vmatprep.subr.bf16.mxu0 %v23728_v7 }
 0x123   :  { %537 = vmatmul.mubr.f32.gmra.mrb[2].mxu0 %v227_v35 }
 0x124   :  { %23731 = vmatpush1.bf16.msra.mxu0 %v23730_v8  ;;  %631 = vmatprep.mubr.f32.mxu0 %v27345_v15 }
 0x125   :  { %23733 = vmatprep.subr.bf16.mxu0 %v25260_v21 }
 0x127   :  { %633 = vmatmul.mubr.f32.vlgmr.msra.gmra.mrb[0].mxu0 %v214_v24 }
 0x128   :  { %23735 = vmatpush1.bf16.msra.mxu0 %v25264_v23  ;;  %638 = vmatprep.mubr.f32.mxu0 %v27345_v15 }
 0x129   :  { %23737 = vmatprep.subr.bf16.mxu0 %v25268_v25 }
 0x12b   :  { %640 = vmatmul.mubr.f32.gmra.mrb[2].mxu0 %v225_v31 }
 0x12c   :  { %23739 = vmatpush1.bf16.msra.mxu0 %v25277_v30  ;;  %718 = vmatprep.mubr.f32.mxu0 %v27345_v15 }
 0x12d   :  { %22168 = vmatprep.subr.mxu0 %v27345_v15 }
 0x12f   :  { %720 = vmatmul.mubr.f32.vlgmr.msra.gmra.mrb[0].mxu0 %v214_v24 }
 0x130   :  { %725 = vmatprep.mubr.f32.mxu0 %v27345_v15 }
 0x133   :  { %727 = vmatmul.mubr.f32.gmra.mrb[2].mxu0 %v225_v31 }
 0x134   :  { %22170 = vmatprep.mubr.msk.f32.mxu0 %vm25075_vm1, %v27345_v15 }
 0x202   :  { %v25346_v21 = vpop.f32.mrb[0].mxu0 }
 0x203   :  { %v723_v23 = vpop.f32.mrb[1].mxu0  ;;  %v743_v37 = vmul.f32 %v25344_v1, %v25346_v21  ;;  %v763_v40 = vmul.f32 %v25361_v39, %v25346_v21  ;;  %v733_v44 = vmul.f32 %v25346_v21, %v25316_v10 }
 0x204   :  { %v765_v25 = vmul.f32 %v723_v23, %v25312_v9 }
 0x205   :  { %747 = vrot.lane.b32.xlu1 %v743_v37, %s25074_s15 }
 0x206   :  { %769 = vrot.lane.b32.xlu0 %v765_v25, %s25074_s15  ;;  %v25353_v30 = vpop.f32.mrb[2].mxu0 }
 0x207   :  { %v25355_v38 = vpop.f32.mrb[3].mxu0 }
 0x277   :  { %v748_v43 = vpop.permute.xlu1 %747 }
 0x278   :  { %v770_v41 = vpop.permute.xlu0 %769  ;;  %v25371_v45 = vadd.f32 %v748_v43, %v733_v44 }
 0x279   :  { %v25365_v42 = vadd.f32 %v770_v41, %v763_v40 }
 0x27a   :  { %v786_v46 = vsel %vm784_vm2, %v25371_v45, 0 }
 0x27b   :  { %782 = vrot.lane.b32.xlu1 %v25365_v42, %s25073_s14  ;;  %v856_v47 = vand.u32 4294901760, %v786_v46 }
 0x27d   :  { %v857_v48 = vsub.f32 %v786_v46, %v856_v47 }
 0x27f   :  { %v858_v49 = vand.u32 4294901760, %v857_v48 }
 0x281   :  { %v859_v52 = vsub.f32 %v857_v48, %v858_v49 }
 0x283   :  { %v860_v55 = vand.u32 4294901760, %v859_v52 }
 0x2ed   :  { %v783_v50 = vpop.permute.xlu1 %782 }
 0x2ee   :  { %v788_v51 = vsel %vm784_vm2, %v783_v50, 0 }
 0x2ef   :  { %v791_v53 = vand.u32 4294901760, %v788_v51 }
 0x2f1   :  { %v868_v54 = vsub.f32 %v788_v51, %v791_v53  ;;  %22079 = vmatpush3.xpose.msra.mxu1 %v791_v53 }
 0x2f2   :  { %22083 = vmatprep.subr.mxu1 %v27345_v15 }
 0x2f3   :  { %v869_v56 = vand.u32 4294901760, %v868_v54 }
 0x2f4   :  { %22081 = vmatmul.mubr.f32.vlgmr.msra.gmra.mrb[0].mxu1 %v860_v55 }
 0x2f5   :  { %v870_v57 = vsub.f32 %v868_v54, %v869_v56  ;;  %22085 = vmatprep.mubr.msk.f32.mxu1 %vm25075_vm1, %v27345_v15 }
 0x2f7   :  { %v871_v58 = vand.u32 4294901760, %v870_v57 }
 0x2f9   :  { %22084 = vmatpush3.xpose.msra.mxu1 %v871_v58 }
 0x2fa   :  { %22088 = vmatprep.subr.mxu1 %v27345_v15 }
 0x2fc   :  { %22086 = vmatmul.mubr.f32.vlgmr.msra.gmra.mrb[0].mxu1 %v856_v47 }
 0x2fd   :  { %22089 = vmatpush3.xpose.msra.mxu1 %v868_v54  ;;  %22090 = vmatprep.mubr.msk.f32.mxu1 %vm25075_vm1, %v27345_v15 }
 0x2fe   :  { %22093 = vmatprep.subr.mxu1 %v27345_v15 }
 0x304   :  { %22091 = vmatmul.mubr.f32.vlgmr.msra.gmra.mrb[0].mxu1 %v857_v48 }
 0x305   :  { %22094 = vmatpush3.xpose.msra.mxu1 %v791_v53  ;;  %22095 = vmatprep.mubr.msk.f32.mxu1 %vm25075_vm1, %v27345_v15 }
 0x306   :  { %22098 = vmatprep.subr.mxu1 %v27345_v15 }
 0x30c   :  { %22096 = vmatmul.mubr.f32.vlgmr.msra.gmra.mrb[0].mxu1 %v858_v49 }
 0x30d   :  { %22099 = vmatpush3.xpose.msra.mxu1 %v869_v56  ;;  %22100 = vmatprep.mubr.msk.f32.mxu1 %vm25075_vm1, %v27345_v15 }
 0x30e   :  { %22103 = vmatprep.subr.mxu1 %v27345_v15 }
 0x314   :  { %22101 = vmatmul.mubr.f32.vlgmr.msra.gmra.mrb[0].mxu1 %v856_v47 }
 0x315   :  { %22104 = vmatpush3.xpose.msra.mxu1 %v791_v53  ;;  %22105 = vmatprep.mubr.msk.f32.mxu1 %vm25075_vm1, %v27345_v15 }
 0x316   :  { %22108 = vmatprep.subr.mxu1 %v27345_v15 }
 0x31c   :  { %22106 = vmatmul.mubr.f32.vlgmr.msra.gmra.mrb[0].mxu1 %v856_v47 }
 0x31d   :  { %22110 = vmatprep.mubr.msk.f32.mxu1 %vm25075_vm1, %v27345_v15 }
 0x3ef   :  { %v1232_v63 = vpop.f32.mrb[0].mxu1 }
 0x3f0   :  { %v1236_v2 = vsel %vm25394_vm3, %v1232_v63, -3.4028235e+38  ;;  %v22107_v3 = vpop.f32.mrb[1].mxu1 }
 0x3f1   :  { %v1237_v4 = vsel %vm784_vm2, %v1236_v2, -inf }
 0x3f2   :  { %1238 = vmax.xlane.f32.xlu1 %v1237_v4 }
 0x403   :  { %1249 = vrot.lane.b32.xlu1 %v25346_v21, %s25076_s16 }
 0x407   :  { %1703 = vrot.lane.b32.xlu1 %v25365_v42, %s25077_s19 }
 0x40b   :  { %2619 = vrot.lane.b32.xlu1 %v25371_v45, %s25078_s20 }
 0x40f   :  { %2621 = vrot.lane.b32.xlu1 %v25365_v42, %s25079_s21 }
 0x413   :  { %3537 = vrot.lane.b32.xlu1 %v25371_v45, %s25080_s4 }
 0x47f   :  { %v1239_v5 = vpop.xlane.xlu1 %1238 }
 0x480   :  { %v1240_v6 = vsub.f32 %v1236_v2, %v1239_v5 }
 0x482   :  { %v1241_v7 = vmul.f32 1.442695, %v1240_v6 }
 0x483   :  { %v1250_v8 = vpop.permute.xlu1 %1249 }
 0x484   :  { %24823 = vpow2.f32 %v1241_v7  ;;  %v1256_v9 = vand.u32 4294901760, %v1250_v8 }
 0x486   :  { %22109 = vmatpush3.msra.mxu1 %v1256_v9  ;;  %v1333_v14 = vsub.f32 %v1250_v8, %v1256_v9 }
 0x487   :  { %22113 = vmatprep.subr.mxu1 %v27345_v15  ;;  %v1704_v31 = vpop.permute.xlu1 %1703 }
 0x488   :  { %v1334_v19 = vand.u32 4294901760, %v1333_v14  ;;  %v1707_v33 = vsel %vm784_vm2, %v1704_v31, 0 }
 0x489   :  { %v1710_v35 = vand.u32 4294901760, %v1707_v33 }
 0x48a   :  { %v1335_v24 = vsub.f32 %v1333_v14, %v1334_v19 }
 0x48b   :  { %v1787_v0 = vsub.f32 %v1707_v33, %v1710_v35  ;;  %v2620_v43 = vpop.permute.xlu1 %2619 }
 0x48c   :  { %v1336_v28 = vand.u32 4294901760, %v1335_v24 }
 0x48d   :  { %v1788_v37 = vand.u32 4294901760, %v1787_v0 }
 0x48e   :  { %v24824_v10 = vpop.eup %24823 }
 0x48f   :  { %v1243_v11 = vsel %vm784_vm2, %v24824_v10, 0.0  ;;  %v1789_v40 = vsub.f32 %v1787_v0, %v1788_v37  ;;  %v2622_v44 = vpop.permute.xlu1 %2621 }
 0x490   :  { %1244 = vadd.xlane.f32.xlu0 %v1243_v11  ;;  %v2625_v46 = vsel %vm784_vm2, %v2622_v44, 0 }
 0x491   :  { %v2628_v48 = vand.u32 4294901760, %v2625_v46 }
 0x493   :  { %v2705_v50 = vsub.f32 %v2625_v46, %v2628_v48  ;;  %v3538_v57 = vpop.permute.xlu1 %3537 }
 0x494   :  { %v3541_v59 = vsel %vm784_vm2, %v3538_v57, 0 }
 0x495   :  { %v2706_v52 = vand.u32 4294901760, %v2705_v50  ;;  %v3611_v61 = vand.u32 4294901760, %v3541_v59 }
 0x497   :  { %v2707_v54 = vsub.f32 %v2705_v50, %v2706_v52  ;;  %v3612_v2 = vsub.f32 %v3541_v59, %v3611_v61 }
 0x499   :  { %v2708_v56 = vand.u32 4294901760, %v2707_v54  ;;  %v3613_v4 = vand.u32 4294901760, %v3612_v2 }
 0x49b   :  { %v3614_v6 = vsub.f32 %v3612_v2, %v3613_v4 }
 0x49d   :  { %v3615_v8 = vand.u32 4294901760, %v3614_v6 }
 0x4a6   :  { %1701 = vrot.lane.b32.xlu0 %v25371_v45, %s25081_s2  ;;  %v2623_v45 = vsel %vm784_vm2, %v2620_v43, 0 }
 0x4a7   :  { %v2693_v47 = vand.u32 4294901760, %v2623_v45 }
 0x4a9   :  { %v2694_v49 = vsub.f32 %v2623_v45, %v2693_v47 }
 0x4aa   :  { %3539 = vrot.lane.b32.xlu0 %v25365_v42, %s25082_s12  ;;  %v1790_v42 = vand.u32 4294901760, %v1789_v40 }
 0x4ab   :  { %v2695_v51 = vand.u32 4294901760, %v2694_v49 }
 0x4ad   :  { %v2696_v53 = vsub.f32 %v2694_v49, %v2695_v51 }
 0x4af   :  { %v2697_v55 = vand.u32 4294901760, %v2696_v53 }
 0x51d   :  { %v1245_v12 = vpop.xlane.xlu0 %1244 }
 0x51e   :  { %24825 = vrcp.f32 %v1245_v12 }
 0x521   :  { %v1702_v29 = vpop.permute.xlu0 %1701 }
 0x522   :  { %v1705_v32 = vsel %vm784_vm2, %v1702_v29, 0 }
 0x523   :  { %v1775_v34 = vand.u32 4294901760, %v1705_v32 }
 0x525   :  { %v1776_v36 = vsub.f32 %v1705_v32, %v1775_v34  ;;  %v3540_v58 = vpop.permute.xlu0 %3539 }
 0x526   :  { %v3543_v60 = vsel %vm784_vm2, %v3540_v58, 0 }
 0x527   :  { %v1777_v23 = vand.u32 4294901760, %v1776_v36  ;;  %v3546_v63 = vand.u32 4294901760, %v3543_v60 }
 0x528   :  { %v24826_v13 = vpop.eup %24825 }
 0x529   :  { %v1247_v16 = vmul.f32 %v24826_v13, %v24824_v10  ;;  %v1778_v25 = vsub.f32 %v1776_v36, %v1777_v23  ;;  %v3623_v3 = vsub.f32 %v3543_v60, %v3546_v63 }
 0x52b   :  { %v1253_v17 = vsel %vm784_vm2, %v1247_v16, 0  ;;  %v1779_v41 = vand.u32 4294901760, %v1778_v25  ;;  %v3624_v5 = vand.u32 4294901760, %v3623_v3 }
 0x52c   :  { %v1321_v18 = vand.u32 4294901760, %v1253_v17 }
 0x52d   :  { %v3625_v7 = vsub.f32 %v3623_v3, %v3624_v5 }
 0x52e   :  { %v1322_v20 = vsub.f32 %v1253_v17, %v1321_v18 }
 0x530   :  { %v1323_v22 = vand.u32 4294901760, %v1322_v20 }
 0x532   :  { %v1324_v26 = vsub.f32 %v1322_v20, %v1323_v22 }
 0x534   :  { %v1325_v27 = vand.u32 4294901760, %v1324_v26 }
 0x536   :  { %22111 = vmatmul.mubr.f32.vlgmr.msra.gmra.mrb[2].mxu1 %v1325_v27 }
 0x537   :  { %22114 = vmatpush3.msra.mxu1 %v1336_v28  ;;  %22115 = vmatprep.mubr.msk.f32.mxu1 %vm25075_vm1, %v27345_v15 }
 0x538   :  { %22118 = vmatprep.subr.mxu1 %v27345_v15 }
 0x53e   :  { %22116 = vmatmul.mubr.f32.vlgmr.msra.gmra.mrb[2].mxu1 %v1321_v18 }
 0x53f   :  { %22119 = vmatpush3.msra.mxu1 %v1333_v14  ;;  %22120 = vmatprep.mubr.msk.f32.mxu1 %vm25075_vm1, %v27345_v15 }
 0x540   :  { %22123 = vmatprep.subr.mxu1 %v27345_v15 }
 0x546   :  { %22121 = vmatmul.mubr.f32.vlgmr.msra.gmra.mrb[2].mxu1 %v1322_v20 }
 0x547   :  { %22124 = vmatpush3.msra.mxu1 %v1256_v9  ;;  %22125 = vmatprep.mubr.msk.f32.mxu1 %vm25075_vm1, %v27345_v15 }
 0x548   :  { %22128 = vmatprep.subr.mxu1 %v27345_v15 }
 0x54e   :  { %22126 = vmatmul.mubr.f32.vlgmr.msra.gmra.mrb[2].mxu1 %v1323_v22 }
 0x54f   :  { %22129 = vmatpush3.msra.mxu1 %v1334_v19  ;;  %22130 = vmatprep.mubr.msk.f32.mxu1 %vm25075_vm1, %v27345_v15 }
 0x550   :  { %22133 = vmatprep.subr.mxu1 %v27345_v15 }
 0x556   :  { %22131 = vmatmul.mubr.f32.vlgmr.msra.gmra.mrb[2].mxu1 %v1321_v18 }
 0x557   :  { %22134 = vmatpush3.msra.mxu1 %v1256_v9  ;;  %22135 = vmatprep.mubr.msk.f32.mxu1 %vm25075_vm1, %v27345_v15  ;;  %v3626_v9 = vand.u32 4294901760, %v3625_v7 }
 0x558   :  { %22138 = vmatprep.subr.mxu1 %v27345_v15 }
 0x55e   :  { %22136 = vmatmul.mubr.f32.vlgmr.msra.gmra.mrb[2].mxu1 %v1321_v18 }
 0x55f   :  { %22139 = vmatpush3.xpose.msra.mxu1 %v1710_v35  ;;  %22140 = vmatprep.mubr.msk.f32.mxu1 %vm25075_vm1, %v27345_v15 }
 0x560   :  { %22143 = vmatprep.subr.mxu1 %v27345_v15 }
 0x562   :  { %22141 = vmatmul.mubr.f32.vlgmr.msra.gmra.mrb[4].mxu1 %v1779_v41  ;;  %v25514_v41 = vld [vmem:[#allocation5 + $0x8] sm:$0xff] }
 0x563   :  { %22144 = vmatpush3.xpose.msra.mxu1 %v1790_v42  ;;  %22145 = vmatprep.mubr.msk.f32.mxu1 %vm25075_vm1, %v27345_v15 }
 0x564   :  { %22148 = vmatprep.subr.mxu1 %v27345_v15 }
 0x56a   :  { %22146 = vmatmul.mubr.f32.vlgmr.msra.gmra.mrb[4].mxu1 %v1775_v34 }
 0x56b   :  { %22149 = vmatpush3.xpose.msra.mxu1 %v1787_v0  ;;  %22150 = vmatprep.mubr.msk.f32.mxu1 %vm25075_vm1, %v27345_v15 }
 0x56c   :  { %22153 = vmatprep.subr.mxu1 %v27345_v15 }
 0x572   :  { %22151 = vmatmul.mubr.f32.vlgmr.msra.gmra.mrb[4].mxu1 %v1776_v36 }
 0x573   :  { %22154 = vmatpush3.xpose.msra.mxu1 %v1710_v35  ;;  %22155 = vmatprep.mubr.msk.f32.mxu1 %vm25075_vm1, %v27345_v15 }
 0x574   :  { %22158 = vmatprep.subr.mxu1 %v27345_v15 }
 0x57a   :  { %22156 = vmatmul.mubr.f32.vlgmr.msra.gmra.mrb[4].mxu1 %v1777_v23 }
 0x57b   :  { %22159 = vmatpush3.xpose.msra.mxu1 %v1788_v37  ;;  %22160 = vmatprep.mubr.msk.f32.mxu1 %vm25075_vm1, %v27345_v15  ;;  %v103_v37 = vld [vmem:[#allocation7 + $0x8] sm:$0xff] }
 0x57c   :  { %22163 = vmatprep.subr.mxu1 %v27345_v15  ;;  %v766_v43 = vmul.f32 %v25355_v38, %v103_v37 }
 0x582   :  { %22161 = vmatmul.mubr.f32.vlgmr.msra.gmra.mrb[4].mxu1 %v1775_v34 }
 0x583   :  { %22164 = vmatpush3.xpose.msra.mxu1 %v1710_v35  ;;  %22165 = vmatprep.mubr.msk.f32.mxu1 %vm25075_vm1, %v27345_v15 }
 0x584   :  { %22198 = vmatprep.subr.mxu1 %v27345_v15 }
 0x58a   :  { %22166 = vmatmul.mubr.f32.vlgmr.msra.gmra.mrb[4].mxu1 %v1775_v34 }
 0x58b   :  { %22199 = vmatpush3.xpose.msra.mxu1 %v2628_v48  ;;  %22200 = vmatprep.mubr.msk.f32.mxu1 %vm25075_vm1, %v27345_v15 }
 0x58c   :  { %22203 = vmatprep.subr.mxu1 %v27345_v15 }
 0x58e   :  { %22201 = vmatmul.mubr.f32.vlgmr.msra.gmra.mrb[6].mxu1 %v2697_v55 }
 0x58f   :  { %22204 = vmatpush3.xpose.msra.mxu1 %v2708_v56  ;;  %22205 = vmatprep.mubr.msk.f32.mxu1 %vm25075_vm1, %v27345_v15 }
 0x590   :  { %22208 = vmatprep.subr.mxu1 %v27345_v15 }
 0x596   :  { %22206 = vmatmul.mubr.f32.vlgmr.msra.gmra.mrb[6].mxu1 %v2693_v47 }
 0x597   :  { %22209 = vmatpush3.xpose.msra.mxu1 %v2705_v50  ;;  %22210 = vmatprep.mubr.msk.f32.mxu1 %vm25075_vm1, %v27345_v15 }
 0x598   :  { %22213 = vmatprep.subr.mxu1 %v27345_v15 }
 0x59e   :  { %22211 = vmatmul.mubr.f32.vlgmr.msra.gmra.mrb[6].mxu1 %v2694_v49 }
 0x59f   :  { %22214 = vmatpush3.xpose.msra.mxu1 %v2628_v48  ;;  %22215 = vmatprep.mubr.msk.f32.mxu1 %vm25075_vm1, %v27345_v15 }
 0x5a0   :  { %22218 = vmatprep.subr.mxu1 %v27345_v15 }
 0x5a6   :  { %22216 = vmatmul.mubr.f32.vlgmr.msra.gmra.mrb[6].mxu1 %v2695_v51 }
 0x5a7   :  { %22219 = vmatpush3.xpose.msra.mxu1 %v2706_v52  ;;  %22220 = vmatprep.mubr.msk.f32.mxu1 %vm25075_vm1, %v27345_v15 }
 0x5a8   :  { %22223 = vmatprep.subr.mxu1 %v27345_v15 }
 0x5ae   :  { %22221 = vmatmul.mubr.f32.vlgmr.msra.gmra.mrb[6].mxu1 %v2693_v47 }
 0x5af   :  { %22224 = vmatpush3.xpose.msra.mxu1 %v2628_v48  ;;  %22225 = vmatprep.mubr.msk.f32.mxu1 %vm25075_vm1, %v27345_v15 }
 0x5b0   :  { %22258 = vmatprep.subr.mxu1 %v27345_v15 }
 0x5b6   :  { %22226 = vmatmul.mubr.f32.vlgmr.msra.gmra.mrb[6].mxu1 %v2693_v47 }
 0x5b7   :  { %22259 = vmatpush3.xpose.msra.mxu1 %v3546_v63  ;;  %22260 = vmatprep.mubr.msk.f32.mxu1 %vm25075_vm1, %v27345_v15 }
 0x5b8   :  { %22263 = vmatprep.subr.mxu1 %v27345_v15 }
 0x5ba   :  { %22261 = vmatmul.mubr.f32.vlgmr.msra.gmra.mrb[8].mxu1 %v3615_v8 }
 0x5bb   :  { %22264 = vmatpush3.xpose.msra.mxu1 %v3626_v9  ;;  %22265 = vmatprep.mubr.msk.f32.mxu1 %vm25075_vm1, %v27345_v15 }
 0x5bc   :  { %22268 = vmatprep.subr.mxu1 %v27345_v15 }
 0x5c2   :  { %22266 = vmatmul.mubr.f32.vlgmr.msra.gmra.mrb[8].mxu1 %v3611_v61 }
 0x5c3   :  { %22269 = vmatpush3.xpose.msra.mxu1 %v3623_v3  ;;  %22270 = vmatprep.mubr.msk.f32.mxu1 %vm25075_vm1, %v27345_v15 }
 0x5c4   :  { %22273 = vmatprep.subr.mxu1 %v27345_v15 }
 0x5ca   :  { %22271 = vmatmul.mubr.f32.vlgmr.msra.gmra.mrb[8].mxu1 %v3612_v2 }
 0x5cb   :  { %22274 = vmatpush3.xpose.msra.mxu1 %v3546_v63  ;;  %22275 = vmatprep.mubr.msk.f32.mxu1 %vm25075_vm1, %v27345_v15 }
 0x5cc   :  { %22278 = vmatprep.subr.mxu1 %v27345_v15 }
 0x5d2   :  { %22276 = vmatmul.mubr.f32.vlgmr.msra.gmra.mrb[8].mxu1 %v3613_v4 }
 0x5d3   :  { %22279 = vmatpush3.xpose.msra.mxu1 %v3624_v5  ;;  %22280 = vmatprep.mubr.msk.f32.mxu1 %vm25075_vm1, %v27345_v15 }
 0x5d4   :  { %22283 = vmatprep.subr.mxu1 %v27345_v15 }
 0x5da   :  { %22281 = vmatmul.mubr.f32.vlgmr.msra.gmra.mrb[8].mxu1 %v3611_v61 }
 0x5db   :  { %22284 = vmatpush3.xpose.msra.mxu1 %v3546_v63  ;;  %22285 = vmatprep.mubr.msk.f32.mxu1 %vm25075_vm1, %v27345_v15 }
 0x5e2   :  { %22286 = vmatmul.mubr.f32.vlgmr.msra.gmra.mrb[8].mxu1 %v3611_v61 }
 0x5e3   :  { %22326 = vmatprep.mubr.msk.f32.mxu1 %vm25075_vm1, %v27345_v15 }
 0x631   :  { %v25494_v10 = vpop.f32.mrb[2].mxu1 }
 0x632   :  { %v22137_v11 = vpop.f32.mrb[3].mxu1 }
 0x65d   :  { %v2151_v12 = vpop.f32.mrb[4].mxu1 }
 0x65e   :  { %v2155_v13 = vsel %vm25394_vm3, %v2151_v12, -3.4028235e+38  ;;  %v22167_v14 = vpop.f32.mrb[5].mxu1 }
 0x65f   :  { %v2156_v16 = vsel %vm784_vm2, %v2155_v13, -inf }
 0x660   :  { %2157 = vmax.xlane.f32.xlu1 %v2156_v16 }
 0x689   :  { %v3069_v17 = vpop.f32.mrb[6].mxu1 }
 0x68a   :  { %v3073_v18 = vsel %vm25394_vm3, %v3069_v17, -3.4028235e+38  ;;  %v22227_v19 = vpop.f32.mrb[7].mxu1 }
 0x68b   :  { %v3074_v20 = vsel %vm784_vm2, %v3073_v18, -inf }
 0x68c   :  { %3075 = vmax.xlane.f32.xlu0 %v3074_v20 }
 0x6b5   :  { %v3987_v22 = vpop.f32.mrb[8].mxu1 }
 0x6b6   :  { %v3991_v24 = vsel %vm25394_vm3, %v3987_v22, -3.4028235e+38  ;;  %v22287_v26 = vpop.f32.mrb[9].mxu1 }
 0x6b7   :  { %v3992_v27 = vsel %vm784_vm2, %v3991_v24, -inf }
 0x6b8   :  { %3993 = vmax.xlane.f32.xlu1 %v3992_v27 }
 0x6ed   :  { %v2158_v28 = vpop.xlane.xlu1 %2157 }
 0x6ee   :  { %v2159_v29 = vsub.f32 %v2155_v13, %v2158_v28 }
 0x6f0   :  { %v2160_v31 = vmul.f32 1.442695, %v2159_v29 }
 0x6f2   :  { %24827 = vpow2.f32 %v2160_v31 }
 0x6fc   :  { %v24828_v32 = vpop.eup %24827 }
 0x6fd   :  { %v2162_v33 = vsel %vm784_vm2, %v24828_v32, 0.0 }
 0x6fe   :  { %2163 = vadd.xlane.f32.xlu0 %v2162_v33 }
 0x714   :  { %2167 = vrot.lane.b32.xlu0 %v25346_v21, %s25083_s7 }
 0x719   :  { %v3076_v34 = vpop.xlane.xlu0 %3075 }
 0x71a   :  { %v3077_v35 = vsub.f32 %v3073_v18, %v3076_v34 }
 0x71c   :  { %v3078_v36 = vmul.f32 1.442695, %v3077_v35 }
 0x71e   :  { %24829 = vpow2.f32 %v3078_v36 }
 0x728   :  { %v24830_v0 = vpop.eup %24829 }
 0x729   :  { %v3080_v23 = vsel %vm784_vm2, %v24830_v0, 0.0 }
 0x72a   :  { %3081 = vadd.xlane.f32.xlu1 %v3080_v23 }
 0x73b   :  { %3085 = vrot.lane.b32.xlu1 %v25346_v21, %s25084_s30 }
 0x73f   :  { %4003 = vrot.lane.b32.xlu1 %v25346_v21, %s25085_s22 }
 0x743   :  { %739 = vrot.lane.b32.xlu1 %v103_v37, %s25073_s14 }
 0x745   :  { %v3994_v25 = vpop.xlane.xlu1 %3993 }
 0x746   :  { %v3995_v40 = vsub.f32 %v3991_v24, %v3994_v25 }
 0x747   :  { %759 = vrot.lane.b32.xlu1 %v25514_v41, %s25074_s15 }
 0x748   :  { %v3996_v42 = vmul.f32 1.442695, %v3995_v40  ;;  %v777_v40 = vld [vmem:[#allocation8] sm:$0xff] }
 0x74a   :  { %24831 = vpow2.f32 %v3996_v42  ;;  %v778_v42 = vld [vmem:[#allocation8 + $0x8] sm:$0xff] }
 0x74b   :  { %771 = vrot.lane.b32.xlu1 %v766_v43, %s25074_s15  ;;  %v27343_v43 = vmov 0.0|0.0  }
 0x74c   :  { %23740 = vmatprep.subr.bf16.mxu1 %v27343_v43 }
 0x754   :  { %v25520_v44 = vpop.eup %24831 }
 0x755   :  { %v3998_v21 = vsel %vm784_vm2, %v25520_v44, 0.0 }
 0x756   :  { %3999 = vadd.xlane.f32.xlu0 %v3998_v21  ;;  %v4479_v21 = vand.u32 4294901760, %v778_v42 }
 0x78b   :  { %v2164_v45 = vpop.xlane.xlu0 %2163 }
 0x78c   :  { %24833 = vrcp.f32 %v2164_v45 }
 0x78f   :  { %v2168_v46 = vpop.permute.xlu0 %2167 }
 0x790   :  { %v2174_v47 = vand.u32 4294901760, %v2168_v46 }
 0x792   :  { %22169 = vmatpush3.msra.mxu0 %v2174_v47  ;;  %v2251_v50 = vsub.f32 %v2168_v46, %v2174_v47  ;;  %v4563_v46 = vsub.f32 %v778_v42, %v4479_v21 }
 0x793   :  { %22173 = vmatprep.subr.mxu0 %v27345_v15 }
 0x794   :  { %v2252_v52 = vand.u32 4294901760, %v2251_v50 }
 0x796   :  { %v24834_v48 = vpop.eup %24833  ;;  %v2253_v55 = vsub.f32 %v2251_v50, %v2252_v52 }
 0x797   :  { %v2166_v49 = vmul.f32 %v24834_v48, %v24828_v32  ;;  %v4564_v48 = vand.u32 4294901760, %v4563_v46 }
 0x798   :  { %v2254_v58 = vand.u32 4294901760, %v2253_v55  ;;  %v779_v55 = vld [vmem:[#allocation8 + $0x10] sm:$0xff] }
 0x799   :  { %v2171_v38 = vsel %vm784_vm2, %v2166_v49, 0 }
 0x79a   :  { %v2239_v51 = vand.u32 4294901760, %v2171_v38 }
 0x79c   :  { %v2240_v53 = vsub.f32 %v2171_v38, %v2239_v51 }
 0x79e   :  { %v2241_v54 = vand.u32 4294901760, %v2240_v53 }
 0x7a0   :  { %v2242_v56 = vsub.f32 %v2240_v53, %v2241_v54 }
 0x7a2   :  { %v2243_v57 = vand.u32 4294901760, %v2242_v56  ;;  %v780_v56 = vld [vmem:[#allocation8 + $0x18] sm:$0xff] }
 0x7a4   :  { %22171 = vmatmul.mubr.f32.vlgmr.msra.gmra.mrb[4].mxu0 %v2243_v57  ;;  %v4482_v57 = vand.u32 4294901760, %v779_v55 }
 0x7a5   :  { %22174 = vmatpush3.msra.mxu0 %v2254_v58  ;;  %22175 = vmatprep.mubr.msk.f32.mxu0 %vm25075_vm1, %v27345_v15  ;;  %v4485_v58 = vand.u32 4294901760, %v780_v56 }
 0x7a6   :  { %22178 = vmatprep.subr.mxu0 %v27345_v15 }
 0x7ac   :  { %22176 = vmatmul.mubr.f32.vlgmr.msra.gmra.mrb[4].mxu0 %v2239_v51 }
 0x7ad   :  { %22179 = vmatpush3.msra.mxu0 %v2251_v50  ;;  %22180 = vmatprep.mubr.msk.f32.mxu0 %vm25075_vm1, %v27345_v15  ;;  %v4565_v50 = vsub.f32 %v4563_v46, %v4564_v48 }
 0x7ae   :  { %22183 = vmatprep.subr.mxu0 %v27345_v15 }
 0x7b4   :  { %22181 = vmatmul.mubr.f32.vlgmr.msra.gmra.mrb[4].mxu0 %v2240_v53 }
 0x7b5   :  { %22184 = vmatpush3.msra.mxu0 %v2174_v47  ;;  %22185 = vmatprep.mubr.msk.f32.mxu0 %vm25075_vm1, %v27345_v15 }
 0x7b6   :  { %22188 = vmatprep.subr.mxu0 %v27345_v15 }
 0x7b7   :  { %v3082_v59 = vpop.xlane.xlu1 %3081 }
 0x7b8   :  { %24835 = vrcp.f32 %v3082_v59  ;;  %v4570_v59 = vsub.f32 %v779_v55, %v4482_v57 }
 0x7bb   :  { %v3086_v60 = vpop.permute.xlu1 %3085 }
 0x7bc   :  { %22186 = vmatmul.mubr.f32.vlgmr.msra.gmra.mrb[4].mxu0 %v2241_v54  ;;  %v3092_v61 = vand.u32 4294901760, %v3086_v60 }
 0x7bd   :  { %22189 = vmatpush3.msra.mxu0 %v2252_v52  ;;  %22190 = vmatprep.mubr.msk.f32.mxu0 %vm25075_vm1, %v27345_v15 }
 0x7be   :  { %22193 = vmatprep.subr.mxu0 %v27345_v15  ;;  %v3169_v4 = vsub.f32 %v3086_v60, %v3092_v61  ;;  %v4577_v60 = vsub.f32 %v780_v56, %v4485_v58 }
 0x7bf   :  { %v4004_v63 = vpop.permute.xlu1 %4003 }
 0x7c0   :  { %v3170_v8 = vand.u32 4294901760, %v3169_v4  ;;  %v4010_v24 = vand.u32 4294901760, %v4004_v63 }
 0x7c2   :  { %v24836_v2 = vpop.eup %24835  ;;  %v3171_v16 = vsub.f32 %v3169_v4, %v3170_v8  ;;  %v4087_v27 = vsub.f32 %v4004_v63, %v4010_v24  ;;  %v4578_v63 = vand.u32 4294901760, %v4577_v60 }
 0x7c3   :  { %v3084_v3 = vmul.f32 %v24836_v2, %v24830_v0  ;;  %v25538_v5 = vpop.permute.xlu1 %739 }
 0x7c4   :  { %22191 = vmatmul.mubr.f32.vlgmr.msra.gmra.mrb[4].mxu0 %v2239_v51  ;;  %v3172_v20 = vand.u32 4294901760, %v3171_v16  ;;  %v4088_v32 = vand.u32 4294901760, %v4087_v27  ;;  %v744_v16 = vmul.f32 %v25538_v5, %v25353_v30 }
 0x7c5   :  { %22194 = vmatpush3.msra.mxu0 %v2174_v47  ;;  %22195 = vmatprep.mubr.msk.f32.mxu0 %vm25075_vm1, %v27345_v15  ;;  %v3089_v6 = vsel %vm784_vm2, %v3084_v3, 0  ;;  %v4579_v3 = vsub.f32 %v4577_v60, %v4578_v63 }
 0x7c6   :  { %22228 = vmatprep.subr.mxu0 %v27345_v15  ;;  %v3157_v7 = vand.u32 4294901760, %v3089_v6  ;;  %v4089_v35 = vsub.f32 %v4087_v27, %v4088_v32 }
 0x7c7   :  { %v25544_v9 = vpop.permute.xlu1 %759 }
 0x7c8   :  { %v3158_v11 = vsub.f32 %v3089_v6, %v3157_v7  ;;  %v764_v12 = vmul.f32 %v25544_v9, %v25353_v30  ;;  %v4090_v23 = vand.u32 4294901760, %v4089_v35  ;;  %v4580_v6 = vand.u32 4294901760, %v4579_v3 }
 0x7ca   :  { %v3159_v13 = vand.u32 4294901760, %v3158_v11 }
 0x7cb   :  { %v772_v14 = vpop.permute.xlu1 %771 }
 0x7cc   :  { %v25548_v17 = vadd.f32 %v772_v14, %v764_v12  ;;  %22196 = vmatmul.mubr.f32.vlgmr.msra.gmra.mrb[4].mxu0 %v2239_v51  ;;  %v3160_v18 = vsub.f32 %v3158_v11, %v3159_v13  ;;  %v4566_v51 = vand.u32 4294901760, %v4565_v50 }
 0x7cd   :  { %22229 = vmatpush3.msra.mxu0 %v3092_v61  ;;  %22230 = vmatprep.mubr.msk.f32.mxu0 %vm25075_vm1, %v27345_v15 }
 0x7ce   :  { %4962 = vrot.lane.b32.xlu0 %v25548_v17, %s25073_s14  ;;  %22233 = vmatprep.subr.mxu0 %v27345_v15  ;;  %v3161_v19 = vand.u32 4294901760, %v3160_v18  ;;  %v25618_v18 = vpack.c.bf16 %v4577_v60, %v4570_v59 }
 0x7d0   :  { %22231 = vmatmul.mubr.f32.vlgmr.msra.gmra.mrb[6].mxu0 %v3161_v19 }
 0x7d1   :  { %22234 = vmatpush3.msra.mxu0 %v3172_v20  ;;  %22235 = vmatprep.mubr.msk.f32.mxu0 %vm25075_vm1, %v27345_v15 }
 0x7d2   :  { %7718 = vrot.lane.b32.xlu0 %v25548_v17, %s25082_s12  ;;  %22238 = vmatprep.subr.mxu0 %v27345_v15 }
 0x7d8   :  { %22236 = vmatmul.mubr.f32.vlgmr.msra.gmra.mrb[6].mxu0 %v3157_v7 }
 0x7d9   :  { %22239 = vmatpush3.msra.mxu0 %v3169_v4  ;;  %22240 = vmatprep.mubr.msk.f32.mxu0 %vm25075_vm1, %v27345_v15 }
 0x7da   :  { %22243 = vmatprep.subr.mxu0 %v27345_v15 }
 0x7e0   :  { %22241 = vmatmul.mubr.f32.vlgmr.msra.gmra.mrb[6].mxu0 %v3158_v11  ;;  %v25609_v11 = vpack.c.bf16 %v4485_v58, %v4482_v57 }
 0x7e1   :  { %22244 = vmatpush3.msra.mxu0 %v3092_v61  ;;  %22245 = vmatprep.mubr.msk.f32.mxu0 %vm25075_vm1, %v27345_v15 }
 0x7e2   :  { %22248 = vmatprep.subr.mxu0 %v27345_v15 }
 0x7e3   :  { %v4000_v22 = vpop.xlane.xlu0 %3999 }
 0x7e4   :  { %24837 = vrcp.f32 %v4000_v22 }
 0x7e8   :  { %22246 = vmatmul.mubr.f32.vlgmr.msra.gmra.mrb[6].mxu0 %v3159_v13 }
 0x7e9   :  { %22249 = vmatpush3.msra.mxu0 %v3170_v8  ;;  %22250 = vmatprep.mubr.msk.f32.mxu0 %vm25075_vm1, %v27345_v15 }
 0x7ea   :  { %22253 = vmatprep.subr.mxu0 %v27345_v15 }
 0x7ee   :  { %v24838_v26 = vpop.eup %24837 }
 0x7ef   :  { %v4002_v28 = vmul.f32 %v24838_v26, %v25520_v44  ;;  %v4476_v44 = vand.u32 4294901760, %v777_v40 }
 0x7f0   :  { %22251 = vmatmul.mubr.f32.vlgmr.msra.gmra.mrb[6].mxu0 %v3157_v7 }
 0x7f1   :  { %22254 = vmatpush3.msra.mxu0 %v3092_v61  ;;  %22255 = vmatprep.mubr.msk.f32.mxu0 %vm25075_vm1, %v27345_v15  ;;  %v4007_v29 = vsel %vm784_vm2, %v4002_v28, 0  ;;  %v4556_v45 = vsub.f32 %v777_v40, %v4476_v44  ;;  %v4571_v61 = vand.u32 4294901760, %v4570_v59  ;;  %v25605_v8 = vpack.c.bf16 %v4479_v21, %v4476_v44 }
 0x7f2   :  { %22288 = vmatprep.subr.mxu0 %v27345_v15  ;;  %v4075_v31 = vand.u32 4294901760, %v4007_v29 }
 0x7f3   :  { %v4557_v47 = vand.u32 4294901760, %v4556_v45  ;;  %v4572_v2 = vsub.f32 %v4570_v59, %v4571_v61  ;;  %23742 = vmatpush3.bf16.msra.mxu1 %v25605_v8  ;;  %v25613_v12 = vpack.c.bf16 %v4563_v46, %v4556_v45  ;;  %v25623_v20 = vpack.c.bf16 %v4578_v63, %v4571_v61 }
 0x7f4   :  { %v4076_v33 = vsub.f32 %v4007_v29, %v4075_v31  ;;  %23743 = vmatprep.subr.bf16.mxu1 %v27343_v43 }
 0x7f5   :  { %v4558_v49 = vsub.f32 %v4556_v45, %v4557_v47  ;;  %v4573_v4 = vand.u32 4294901760, %v4572_v2  ;;  %v25621_v19 = vpack.c.bf16 %v4564_v48, %v4557_v47 }
 0x7f6   :  { %v4077_v34 = vand.u32 4294901760, %v4076_v33 }
 0x7f7   :  { %v4559_v38 = vand.u32 4294901760, %v4558_v49  ;;  %23745 = vmatpush3.bf16.msra.mxu1 %v25609_v11 }
 0x7f8   :  { %22256 = vmatmul.mubr.f32.vlgmr.msra.gmra.mrb[6].mxu0 %v3157_v7  ;;  %v4078_v36 = vsub.f32 %v4076_v33, %v4077_v34  ;;  %v25601_v7 = vpack.c.bf16 %v4580_v6, %v4573_v4  ;;  %23752 = vmatprep.subr.bf16.mxu1 %v27343_v43 }
 0x7f9   :  { %22289 = vmatpush3.msra.mxu0 %v4010_v24  ;;  %22290 = vmatprep.mubr.msk.f32.mxu0 %vm25075_vm1, %v27345_v15  ;;  %v25596_v52 = vpack.c.bf16 %v4566_v51, %v4559_v38 }
 0x7fa   :  { %22293 = vmatprep.subr.mxu0 %v27345_v15  ;;  %v4079_v0 = vand.u32 4294901760, %v4078_v36 }
 0x7fc   :  { %22291 = vmatmul.mubr.f32.vlgmr.msra.gmra.mrb[8].mxu0 %v4079_v0 }
 0x7fd   :  { %22294 = vmatpush3.msra.mxu0 %v4090_v23  ;;  %22295 = vmatprep.mubr.msk.f32.mxu0 %vm25075_vm1, %v27345_v15 }
 0x7fe   :  { %22298 = vmatprep.subr.mxu0 %v27345_v15 }
 0x804   :  { %22296 = vmatmul.mubr.f32.vlgmr.msra.gmra.mrb[8].mxu0 %v4075_v31 }
 0x805   :  { %22299 = vmatpush3.msra.mxu0 %v4087_v27  ;;  %22300 = vmatprep.mubr.msk.f32.mxu0 %vm25075_vm1, %v27345_v15 }
 0x806   :  { %22303 = vmatprep.subr.mxu0 %v27345_v15 }
 0x80c   :  { %22301 = vmatmul.mubr.f32.vlgmr.msra.gmra.mrb[8].mxu0 %v4076_v33  ;;  %v734_v33 = vmul.f32 %v25353_v30, %v25514_v41 }
 0x80d   :  { %22304 = vmatpush3.msra.mxu0 %v4010_v24  ;;  %22305 = vmatprep.mubr.msk.f32.mxu0 %vm25075_vm1, %v27345_v15 }
 0x80e   :  { %22308 = vmatprep.subr.mxu0 %v27345_v15 }
 0x814   :  { %22306 = vmatmul.mubr.f32.vlgmr.msra.gmra.mrb[8].mxu0 %v4077_v34 }
 0x815   :  { %22309 = vmatpush3.msra.mxu0 %v4088_v32  ;;  %22310 = vmatprep.mubr.msk.f32.mxu0 %vm25075_vm1, %v27345_v15 }
 0x816   :  { %22313 = vmatprep.subr.mxu0 %v27345_v15 }
 0x81c   :  { %22311 = vmatmul.mubr.f32.vlgmr.msra.gmra.mrb[8].mxu0 %v4075_v31 }
 0x81d   :  { %22314 = vmatpush3.msra.mxu0 %v4010_v24  ;;  %22315 = vmatprep.mubr.msk.f32.mxu0 %vm25075_vm1, %v27345_v15 }
 0x81e   :  { %23746 = vmatprep.subr.bf16.mxu0 %v27343_v43 }
 0x824   :  { %22316 = vmatmul.mubr.f32.vlgmr.msra.gmra.mrb[8].mxu0 %v4075_v31 }
 0x825   :  { %22337 = vmatprep.mubr.msk.f32.mxu0 %vm25075_vm1, %v27345_v15  ;;  %23748 = vmatpush3.bf16.msra.mxu0 %v25596_v52 }
 0x826   :  { %23749 = vmatprep.subr.bf16.mxu0 %v27343_v43 }
 0x829   :  { %23751 = vmatpush3.bf16.msra.mxu0 %v25601_v7 }
 0x82a   :  { %23758 = vmatprep.subr.bf16.mxu0 %v27343_v43 }
 0x840   :  { %v4963_v23 = vpop.permute.xlu0 %4962 }
 0x89f   :  { %v2615_v37 = vpop.f32.mrb[4].mxu0 }
 0x8a0   :  { %v22197_v25 = vpop.f32.mrb[5].mxu0  ;;  %4456 = vrot.lane.b32.xlu1 %v2615_v37, %s25068_s18 }
 0x8a1   :  { %v4967_v25 = vsel %vm784_vm2, %v4963_v23, 0 }
 0x8a2   :  { %v4970_v42 = vand.u32 4294901760, %v4967_v25 }
 0x8cb   :  { %v3533_v53 = vpop.f32.mrb[6].mxu0 }
 0x8cc   :  { %v22257_v54 = vpop.f32.mrb[7].mxu0  ;;  %4460 = vrot.lane.b32.xlu1 %v3533_v53, %s25087_s23 }
 0x8f7   :  { %v4451_v13 = vpop.f32.mrb[8].mxu0 }
 0x8f8   :  { %v22317_v14 = vpop.f32.mrb[9].mxu0  ;;  %4464 = vrot.lane.b32.xlu1 %v4451_v13, %s25088_s24 }
 0x8fc   :  { %749 = vrot.lane.b32.xlu1 %v744_v16, %s25074_s15 }
 0x912   :  { %v4457_v22 = vpop.permute.xlu1 %4456 }
 0x913   :  { %v4467_v26 = vsel %vm784_vm2, %v25494_v10, %v4457_v22 }
 0x93e   :  { %v4461_v24 = vpop.permute.xlu1 %4460 }
 0x93f   :  { %v4469_v27 = vsel %vm4468_vm4, %v4467_v26, %v4461_v24 }
 0x96a   :  { %v4465_v28 = vpop.permute.xlu1 %4464 }
 0x96b   :  { %v4471_v29 = vsel %vm4470_vm5, %v4469_v27, %v4465_v28 }
 0x96c   :  { %v4473_v31 = vsel %vm111_vm0, %v4471_v29, 0 }
 0x96d   :  { %v4544_v32 = vand.u32 4294901760, %v4473_v31 }
 0x96e   :  { %v750_v34 = vpop.permute.xlu1 %749 }
 0x96f   :  { %v4545_v35 = vsub.f32 %v4473_v31, %v4544_v32  ;;  %v754_v36 = vadd.f32 %v750_v34, %v734_v33  ;;  %22338 = vmatmul.mubr.f32.vlgmr.msra.gmra.mrb[10].mxu0 %v4544_v32  ;;  %v7719_v34 = vpop.permute.xlu0 %7718 }
 0x970   :  { %23760 = vmatpush3.bf16.msra.mxu0 %v25605_v8  ;;  %22359 = vmatprep.mubr.msk.f32.mxu0 %vm25075_vm1, %v27345_v15 }
 0x971   :  { %5880 = vrot.lane.b32.xlu1 %v754_v36, %s25081_s2  ;;  %23761 = vmatprep.subr.bf16.mxu0 %v27343_v43  ;;  %v4546_v10 = vand.u32 4294901760, %v4545_v35  ;;  %v4965_v37 = vsel %vm784_vm2, %v754_v36, 0 }
 0x972   :  { %v5035_v40 = vand.u32 4294901760, %v4965_v37 }
 0x973   :  { %v4547_v0 = vsub.f32 %v4545_v35, %v4546_v10 }
 0x974   :  { %23763 = vmatpush3.bf16.msra.mxu0 %v25609_v11  ;;  %v5036_v44 = vsub.f32 %v4965_v37, %v5035_v40 }
 0x975   :  { %5882 = vrot.lane.b32.xlu1 %v25548_v17, %s25077_s19  ;;  %23770 = vmatprep.subr.bf16.mxu0 %v27343_v43  ;;  %v4548_v41 = vand.u32 4294901760, %v4547_v0 }
 0x976   :  { %v5037_v21 = vand.u32 4294901760, %v5036_v44 }
 0x977   :  { %22360 = vmatmul.mubr.f32.vlgmr.msra.gmra.mrb[12].mxu0 %v4546_v10  ;;  %22327 = vmatmul.mubr.f32.vlgmr.msra.gmra.mrb[10].mxu1 %v4548_v41 }
 0x978   :  { %23754 = vmatpush3.bf16.msra.mxu1 %v25613_v12  ;;  %23772 = vmatpush3.bf16.msra.mxu0 %v25605_v8  ;;  %v5038_v46 = vsub.f32 %v5036_v44, %v5037_v21 }
 0x979   :  { %6798 = vrot.lane.b32.xlu1 %v754_v36, %s25078_s20  ;;  %23755 = vmatprep.subr.bf16.mxu1 %v27343_v43 }
 0x97a   :  { %23773 = vmatprep.subr.bf16.mxu0 %v27343_v43  ;;  %22348 = vmatprep.mubr.msk.f32.mxu1 %vm25075_vm1, %v27345_v15  ;;  %v5039_v48 = vand.u32 4294901760, %v5038_v46 }
 0x97b   :  { %22381 = vmatprep.mubr.msk.f32.mxu0 %vm25075_vm1, %v27345_v15 }
 0x97c   :  { %23757 = vmatpush3.bf16.msra.mxu1 %v25618_v18  ;;  %23775 = vmatpush3.bf16.msra.mxu0 %v25609_v11 }
 0x97d   :  { %6800 = vrot.lane.b32.xlu1 %v25548_v17, %s25079_s21  ;;  %23764 = vmatprep.subr.bf16.mxu1 %v27343_v43  ;;  %v5047_v17 = vsub.f32 %v4967_v25, %v4970_v42 }
 0x97e   :  { %22414 = vmatprep.subr.mxu0 %v27345_v15 }
 0x97f   :  { %22349 = vmatmul.mubr.f32.vlgmr.msra.gmra.mrb[12].mxu1 %v4545_v35  ;;  %22382 = vmatmul.mubr.f32.vlgmr.msra.gmra.mrb[14].mxu0 %v4544_v32  ;;  %v5048_v45 = vand.u32 4294901760, %v5047_v17 }
 0x980   :  { %23766 = vmatpush3.bf16.msra.mxu1 %v25621_v19  ;;  %22370 = vmatprep.mubr.msk.f32.mxu1 %vm25075_vm1, %v27345_v15 }
 0x981   :  { %7716 = vrot.lane.b32.xlu1 %v754_v36, %s25080_s4  ;;  %23767 = vmatprep.subr.bf16.mxu1 %v27343_v43  ;;  %v5049_v47 = vsub.f32 %v5047_v17, %v5048_v45  ;;  %v7722_v36 = vsel %vm784_vm2, %v7719_v34, 0 }
 0x982   :  { %22416 = vmatprep.mubr.msk.f32.mxu0 %vm25075_vm1, %v27345_v15  ;;  %v7725_v0 = vand.u32 4294901760, %v7722_v36 }
 0x983   :  { %v5050_v49 = vand.u32 4294901760, %v5049_v47 }
 0x984   :  { %23769 = vmatpush3.bf16.msra.mxu1 %v25623_v20  ;;  %v7802_v23 = vsub.f32 %v7722_v36, %v7725_v0 }
 0x985   :  { %22384 = vmatprep.subr.mxu1 %v27345_v15 }
 0x986   :  { %v7803_v25 = vand.u32 4294901760, %v7802_v23 }
 0x987   :  { %22371 = vmatmul.mubr.f32.vlgmr.msra.gmra.mrb[14].mxu1 %v4544_v32 }
 0x988   :  { %22386 = vmatprep.mubr.msk.f32.mxu1 %vm25075_vm1, %v27345_v15 }
 0x98d   :  { %22385 = vmatpush3.xpose.msra.mxu1 %v4970_v42 }
 0x98e   :  { %22389 = vmatprep.subr.mxu1 %v27345_v15 }
 0x990   :  { %22387 = vmatmul.mubr.f32.vlgmr.msra.gmra.mrb[16].mxu1 %v5039_v48 }
 0x991   :  { %22390 = vmatpush3.xpose.msra.mxu1 %v5050_v49  ;;  %22391 = vmatprep.mubr.msk.f32.mxu1 %vm25075_vm1, %v27345_v15 }
 0x992   :  { %22394 = vmatprep.subr.mxu1 %v27345_v15 }
 0x998   :  { %22392 = vmatmul.mubr.f32.vlgmr.msra.gmra.mrb[16].mxu1 %v5035_v40 }
 0x999   :  { %22395 = vmatpush3.xpose.msra.mxu1 %v5047_v17  ;;  %22396 = vmatprep.mubr.msk.f32.mxu1 %vm25075_vm1, %v27345_v15 }
 0x99a   :  { %22399 = vmatprep.subr.mxu1 %v27345_v15 }
 0x9a0   :  { %22397 = vmatmul.mubr.f32.vlgmr.msra.gmra.mrb[16].mxu1 %v5036_v44 }
 0x9a1   :  { %22400 = vmatpush3.xpose.msra.mxu1 %v4970_v42  ;;  %22401 = vmatprep.mubr.msk.f32.mxu1 %vm25075_vm1, %v27345_v15 }
 0x9a2   :  { %22404 = vmatprep.subr.mxu1 %v27345_v15 }
 0x9a8   :  { %22402 = vmatmul.mubr.f32.vlgmr.msra.gmra.mrb[16].mxu1 %v5037_v21 }
 0x9a9   :  { %22405 = vmatpush3.xpose.msra.mxu1 %v5048_v45  ;;  %22406 = vmatprep.mubr.msk.f32.mxu1 %vm25075_vm1, %v27345_v15 }
 0x9aa   :  { %22409 = vmatprep.subr.mxu1 %v27345_v15 }
 0x9b0   :  { %22407 = vmatmul.mubr.f32.vlgmr.msra.gmra.mrb[16].mxu1 %v5035_v40 }
 0x9b1   :  { %22410 = vmatpush3.xpose.msra.mxu1 %v4970_v42  ;;  %22411 = vmatprep.mubr.msk.f32.mxu1 %vm25075_vm1, %v27345_v15  ;;  %v7804_v42 = vsub.f32 %v7802_v23, %v7803_v25 }
 0x9b2   :  { %22444 = vmatprep.subr.mxu1 %v27345_v15 }
 0x9b3   :  { %v7805_v45 = vand.u32 4294901760, %v7804_v42 }
 0x9b8   :  { %22412 = vmatmul.mubr.f32.vlgmr.msra.gmra.mrb[16].mxu1 %v5035_v40 }
 0x9b9   :  { %22446 = vmatprep.mubr.msk.f32.mxu1 %vm25075_vm1, %v27345_v15 }
 0x9e3   :  { %v5881_v50 = vpop.permute.xlu1 %5880 }
 0x9e4   :  { %v5884_v38 = vsel %vm784_vm2, %v5881_v50, 0 }
 0x9e5   :  { %v5954_v51 = vand.u32 4294901760, %v5884_v38 }
 0x9e7   :  { %v5955_v53 = vsub.f32 %v5884_v38, %v5954_v51  ;;  %v5883_v54 = vpop.permute.xlu1 %5882 }
 0x9e8   :  { %v5886_v55 = vsel %vm784_vm2, %v5883_v54, 0 }
 0x9e9   :  { %v5956_v56 = vand.u32 4294901760, %v5955_v53  ;;  %v5889_v57 = vand.u32 4294901760, %v5886_v55 }
 0x9eb   :  { %v5957_v58 = vsub.f32 %v5955_v53, %v5956_v56  ;;  %v5966_v59 = vsub.f32 %v5886_v55, %v5889_v57  ;;  %22445 = vmatpush3.xpose.msra.mxu1 %v5889_v57  ;;  %v6799_v3 = vpop.permute.xlu1 %6798 }
 0x9ec   :  { %22449 = vmatprep.subr.mxu1 %v27345_v15  ;;  %v6802_v6 = vsel %vm784_vm2, %v6799_v3, 0 }
 0x9ed   :  { %v5958_v60 = vand.u32 4294901760, %v5957_v58  ;;  %v5967_v61 = vand.u32 4294901760, %v5966_v59  ;;  %v6872_v14 = vand.u32 4294901760, %v6802_v6 }
 0x9ef   :  { %v5968_v63 = vsub.f32 %v5966_v59, %v5967_v61  ;;  %22447 = vmatmul.mubr.f32.vlgmr.msra.gmra.mrb[18].mxu1 %v5958_v60  ;;  %v6801_v4 = vpop.permute.xlu1 %6800  ;;  %v6873_v22 = vsub.f32 %v6802_v6, %v6872_v14 }
 0x9f0   :  { %22451 = vmatprep.mubr.msk.f32.mxu1 %vm25075_vm1, %v27345_v15  ;;  %v6804_v13 = vsel %vm784_vm2, %v6801_v4, 0 }
 0x9f1   :  { %v5969_v2 = vand.u32 4294901760, %v5968_v63  ;;  %v6807_v16 = vand.u32 4294901760, %v6804_v13  ;;  %v6874_v26 = vand.u32 4294901760, %v6873_v22 }
 0x9f3   :  { %22450 = vmatpush3.xpose.msra.mxu1 %v5969_v2  ;;  %v6884_v24 = vsub.f32 %v6804_v13, %v6807_v16  ;;  %v6875_v28 = vsub.f32 %v6873_v22, %v6874_v26  ;;  %v7717_v33 = vpop.permute.xlu1 %7716 }
 0x9f4   :  { %22454 = vmatprep.subr.mxu1 %v27345_v15  ;;  %v7720_v35 = vsel %vm784_vm2, %v7717_v33, 0 }
 0x9f5   :  { %v6885_v27 = vand.u32 4294901760, %v6884_v24  ;;  %v6876_v31 = vand.u32 4294901760, %v6875_v28  ;;  %v7790_v10 = vand.u32 4294901760, %v7720_v35 }
 0x9f7   :  { %22452 = vmatmul.mubr.f32.vlgmr.msra.gmra.mrb[18].mxu1 %v5954_v51  ;;  %v6886_v29 = vsub.f32 %v6884_v24, %v6885_v27  ;;  %v7791_v41 = vsub.f32 %v7720_v35, %v7790_v10 }
 0x9f8   :  { %22455 = vmatpush3.xpose.msra.mxu1 %v5966_v59  ;;  %22456 = vmatprep.mubr.msk.f32.mxu1 %vm25075_vm1, %v27345_v15 }
 0x9f9   :  { %22459 = vmatprep.subr.mxu1 %v27345_v15  ;;  %v6887_v32 = vand.u32 4294901760, %v6886_v29  ;;  %v7792_v37 = vand.u32 4294901760, %v7791_v41 }
 0x9fb   :  { %v7793_v40 = vsub.f32 %v7791_v41, %v7792_v37 }
 0x9fd   :  { %v7794_v21 = vand.u32 4294901760, %v7793_v40 }
 0x9ff   :  { %22457 = vmatmul.mubr.f32.vlgmr.msra.gmra.mrb[18].mxu1 %v5955_v53 }
 0xa00   :  { %22460 = vmatpush3.xpose.msra.mxu1 %v5889_v57  ;;  %22461 = vmatprep.mubr.msk.f32.mxu1 %vm25075_vm1, %v27345_v15 }
 0xa01   :  { %22464 = vmatprep.subr.mxu1 %v27345_v15 }
 0xa07   :  { %22462 = vmatmul.mubr.f32.vlgmr.msra.gmra.mrb[18].mxu1 %v5956_v56 }
 0xa08   :  { %22465 = vmatpush3.xpose.msra.mxu1 %v5967_v61  ;;  %22466 = vmatprep.mubr.msk.f32.mxu1 %vm25075_vm1, %v27345_v15 }
 0xa09   :  { %22469 = vmatprep.subr.mxu1 %v27345_v15 }
 0xa0f   :  { %22467 = vmatmul.mubr.f32.vlgmr.msra.gmra.mrb[18].mxu1 %v5954_v51 }
 0xa10   :  { %22470 = vmatpush3.xpose.msra.mxu1 %v5889_v57  ;;  %22471 = vmatprep.mubr.msk.f32.mxu1 %vm25075_vm1, %v27345_v15 }
 0xa11   :  { %22504 = vmatprep.subr.mxu1 %v27345_v15 }
 0xa17   :  { %22472 = vmatmul.mubr.f32.vlgmr.msra.gmra.mrb[18].mxu1 %v5954_v51 }
 0xa18   :  { %22505 = vmatpush3.xpose.msra.mxu1 %v6807_v16  ;;  %22506 = vmatprep.mubr.msk.f32.mxu1 %vm25075_vm1, %v27345_v15 }
 0xa19   :  { %22509 = vmatprep.subr.mxu1 %v27345_v15 }
 0xa1b   :  { %22507 = vmatmul.mubr.f32.vlgmr.msra.gmra.mrb[20].mxu1 %v6876_v31 }
 0xa1c   :  { %22510 = vmatpush3.xpose.msra.mxu1 %v6887_v32  ;;  %22511 = vmatprep.mubr.msk.f32.mxu1 %vm25075_vm1, %v27345_v15 }
 0xa1d   :  { %22514 = vmatprep.subr.mxu1 %v27345_v15 }
 0xa23   :  { %22512 = vmatmul.mubr.f32.vlgmr.msra.gmra.mrb[20].mxu1 %v6872_v14 }
 0xa24   :  { %22515 = vmatpush3.xpose.msra.mxu1 %v6884_v24  ;;  %22516 = vmatprep.mubr.msk.f32.mxu1 %vm25075_vm1, %v27345_v15 }
 0xa25   :  { %22519 = vmatprep.subr.mxu1 %v27345_v15 }
 0xa2b   :  { %22517 = vmatmul.mubr.f32.vlgmr.msra.gmra.mrb[20].mxu1 %v6873_v22 }
 0xa2c   :  { %22520 = vmatpush3.xpose.msra.mxu1 %v6807_v16  ;;  %22521 = vmatprep.mubr.msk.f32.mxu1 %vm25075_vm1, %v27345_v15 }
 0xa2d   :  { %22524 = vmatprep.subr.mxu1 %v27345_v15 }
 0xa33   :  { %22522 = vmatmul.mubr.f32.vlgmr.msra.gmra.mrb[20].mxu1 %v6874_v26 }
 0xa34   :  { %22525 = vmatpush3.xpose.msra.mxu1 %v6885_v27  ;;  %22526 = vmatprep.mubr.msk.f32.mxu1 %vm25075_vm1, %v27345_v15 }
 0xa35   :  { %22529 = vmatprep.subr.mxu1 %v27345_v15 }
 0xa3b   :  { %22527 = vmatmul.mubr.f32.vlgmr.msra.gmra.mrb[20].mxu1 %v6872_v14 }
 0xa3c   :  { %22530 = vmatpush3.xpose.msra.mxu1 %v6807_v16  ;;  %22531 = vmatprep.mubr.msk.f32.mxu1 %vm25075_vm1, %v27345_v15 }
 0xa3d   :  { %22564 = vmatprep.subr.mxu1 %v27345_v15 }
 0xa42   :  { %v4641_v44 = vpop.f32.mrb[10].mxu0 }
 0xa43   :  { %v22339_v17 = vpop.f32.mrb[11].mxu0  ;;  %22532 = vmatmul.mubr.f32.vlgmr.msra.gmra.mrb[20].mxu1 %v6872_v14 }
 0xa44   :  { %22565 = vmatpush3.xpose.msra.mxu1 %v7725_v0  ;;  %22566 = vmatprep.mubr.msk.f32.mxu1 %vm25075_vm1, %v27345_v15 }
 0xa45   :  { %22569 = vmatprep.subr.mxu1 %v27345_v15 }
 0xa47   :  { %22567 = vmatmul.mubr.f32.vlgmr.msra.gmra.mrb[22].mxu1 %v7794_v21 }
 0xa48   :  { %22570 = vmatpush3.xpose.msra.mxu1 %v7805_v45  ;;  %22571 = vmatprep.mubr.msk.f32.mxu1 %vm25075_vm1, %v27345_v15 }
 0xa49   :  { %22574 = vmatprep.subr.mxu1 %v27345_v15 }
 0xa4a   :  { %v4798_v46 = vpop.f32.mrb[12].mxu0  ;;  %v4550_v47 = vpop.f32.mrb[10].mxu1 }
 0xa4b   :  { %v4642_v48 = vadd.f32 %v4641_v44, %v4550_v47  ;;  %v22361_v49 = vpop.f32.mrb[13].mxu0  ;;  %v22328_v50 = vpop.f32.mrb[11].mxu1 }
 0xa4f   :  { %22572 = vmatmul.mubr.f32.vlgmr.msra.gmra.mrb[22].mxu1 %v7790_v10 }
 0xa50   :  { %22575 = vmatpush3.xpose.msra.mxu1 %v7802_v23  ;;  %22576 = vmatprep.mubr.msk.f32.mxu1 %vm25075_vm1, %v27345_v15 }
 0xa51   :  { %22579 = vmatprep.subr.mxu1 %v27345_v15 }
 0xa52   :  { %v4721_v38 = vpop.f32.mrb[12].mxu1  ;;  %v4956_v51 = vpop.f32.mrb[14].mxu0 }
 0xa53   :  { %v4722_v53 = vadd.f32 %v4721_v38, %v4642_v48  ;;  %v22350_v54 = vpop.f32.mrb[13].mxu1  ;;  %v22383_v55 = vpop.f32.mrb[15].mxu0 }
 0xa55   :  { %v4799_v56 = vadd.f32 %v4798_v46, %v4722_v53 }
 0xa57   :  { %22577 = vmatmul.mubr.f32.vlgmr.msra.gmra.mrb[22].mxu1 %v7791_v41 }
 0xa58   :  { %22580 = vmatpush3.xpose.msra.mxu1 %v7725_v0  ;;  %22581 = vmatprep.mubr.msk.f32.mxu1 %vm25075_vm1, %v27345_v15 }
 0xa59   :  { %22584 = vmatprep.subr.mxu1 %v27345_v15 }
 0xa5a   :  { %v4881_v57 = vpop.f32.mrb[14].mxu1 }
 0xa5b   :  { %v4882_v58 = vadd.f32 %v4881_v57, %v4799_v56  ;;  %v22372_v59 = vpop.f32.mrb[15].mxu1 }
 0xa5d   :  { %v25739_v60 = vadd.f32 %v4956_v51, %v4882_v58 }
 0xa5f   :  { %22582 = vmatmul.mubr.f32.vlgmr.msra.gmra.mrb[22].mxu1 %v7792_v37 }
 0xa60   :  { %22585 = vmatpush3.xpose.msra.mxu1 %v7803_v25  ;;  %22586 = vmatprep.mubr.msk.f32.mxu1 %vm25075_vm1, %v27345_v15 }
 0xa61   :  { %22589 = vmatprep.subr.mxu1 %v27345_v15 }
 0xa67   :  { %22587 = vmatmul.mubr.f32.vlgmr.msra.gmra.mrb[22].mxu1 %v7790_v10 }
 0xa68   :  { %22590 = vmatpush3.xpose.msra.mxu1 %v7725_v0  ;;  %22591 = vmatprep.mubr.msk.f32.mxu1 %vm25075_vm1, %v27345_v15 }
 0xa69   :  { %23776 = vmatprep.subr.bf16.mxu1 %v27343_v43 }
 0xa6f   :  { %22592 = vmatmul.mubr.f32.vlgmr.msra.gmra.mrb[22].mxu1 %v7790_v10 }
 0xa70   :  { %23778 = vmatpush3.bf16.msra.mxu1 %v25605_v8  ;;  %22632 = vmatprep.mubr.msk.f32.mxu1 %vm25075_vm1, %v27345_v15 }
 0xa71   :  { %23779 = vmatprep.subr.bf16.mxu1 %v27343_v43 }
 0xa74   :  { %23781 = vmatpush3.bf16.msra.mxu1 %v25609_v11 }
 0xa75   :  { %23788 = vmatprep.subr.bf16.mxu1 %v27343_v43 }
 0xa8b   :  { %v5411_v61 = vpop.f32.mrb[16].mxu1 }
 0xa8c   :  { %v5415_v63 = vsel %vm25394_vm3, %v5411_v61, -3.4028235e+38  ;;  %v22413_v2 = vpop.f32.mrb[17].mxu1 }
 0xa8d   :  { %v5416_v3 = vsel %vm784_vm2, %v5415_v63, -inf }
 0xa8e   :  { %5417 = vmax.xlane.f32.xlu1 %v5416_v3 }
 0xaea   :  { %v6330_v4 = vpop.f32.mrb[18].mxu1 }
 0xaeb   :  { %v6334_v6 = vsel %vm25394_vm3, %v6330_v4, -3.4028235e+38  ;;  %v22473_v13 = vpop.f32.mrb[19].mxu1 }
 0xaec   :  { %v6335_v14 = vsel %vm784_vm2, %v6334_v6, -inf }
 0xaed   :  { %6336 = vmax.xlane.f32.xlu0 %v6335_v14 }
 0xb16   :  { %v7248_v16 = vpop.f32.mrb[20].mxu1 }
 0xb17   :  { %v7252_v22 = vsel %vm25394_vm3, %v7248_v16, -3.4028235e+38  ;;  %v22533_v24 = vpop.f32.mrb[21].mxu1 }
 0xb18   :  { %v7253_v26 = vsel %vm784_vm2, %v7252_v22, -inf }
 0xb19   :  { %7254 = vmax.xlane.f32.xlu1 %v7253_v26 }
 0xb1b   :  { %v5418_v27 = vpop.xlane.xlu1 %5417 }
 0xb1c   :  { %v5419_v28 = vsub.f32 %v5415_v63, %v5418_v27 }
 0xb1e   :  { %v5420_v29 = vmul.f32 1.442695, %v5419_v28 }
 0xb20   :  { %24839 = vpow2.f32 %v5420_v29 }
 0xb2a   :  { %v24840_v31 = vpop.eup %24839 }
 0xb2b   :  { %v5422_v32 = vsel %vm784_vm2, %v24840_v31, 0.0 }
 0xb2c   :  { %5423 = vadd.xlane.f32.xlu0 %v5422_v32 }
 0xb42   :  { %5428 = vrot.lane.b32.xlu0 %v25353_v30, %s25076_s16  ;;  %v8166_v33 = vpop.f32.mrb[22].mxu1 }
 0xb43   :  { %v8170_v34 = vsel %vm25394_vm3, %v8166_v33, -3.4028235e+38  ;;  %v22593_v35 = vpop.f32.mrb[23].mxu1 }
 0xb44   :  { %v8171_v36 = vsel %vm784_vm2, %v8170_v34, -inf }
 0xb45   :  { %8172 = vmax.xlane.f32.xlu1 %v8171_v36 }
 0xb7a   :  { %v6337_v10 = vpop.xlane.xlu0 %6336 }
 0xb7b   :  { %v6338_v0 = vsub.f32 %v6334_v6, %v6337_v10 }
 0xb7d   :  { %v6339_v41 = vmul.f32 1.442695, %v6338_v0 }
 0xb7f   :  { %24841 = vpow2.f32 %v6339_v41 }
 0xb89   :  { %v25768_v23 = vpop.eup %24841 }
 0xb8a   :  { %v6341_v37 = vsel %vm784_vm2, %v25768_v23, 0.0 }
 0xb8b   :  { %6342 = vadd.xlane.f32.xlu1 %v6341_v37 }
 0xb9c   :  { %6346 = vrot.lane.b32.xlu1 %v25353_v30, %s25083_s7 }
 0xba0   :  { %7264 = vrot.lane.b32.xlu1 %v25353_v30, %s25084_s30 }
 0xba6   :  { %v7255_v25 = vpop.xlane.xlu1 %7254 }
 0xba7   :  { %v7256_v40 = vsub.f32 %v7252_v22, %v7255_v25 }
 0xba9   :  { %v7257_v42 = vmul.f32 1.442695, %v7256_v40 }
 0xbab   :  { %24843 = vpow2.f32 %v7257_v42 }
 0xbb5   :  { %v25776_v44 = vpop.eup %24843 }
 0xbb6   :  { %v7259_v17 = vsel %vm784_vm2, %v25776_v44, 0.0 }
 0xbb7   :  { %7260 = vadd.xlane.f32.xlu0 %v7259_v17 }
 0xbb9   :  { %v5424_v21 = vpop.xlane.xlu0 %5423 }
 0xbba   :  { %24845 = vrcp.f32 %v5424_v21 }
 0xbbd   :  { %v5429_v45 = vpop.permute.xlu0 %5428 }
 0xbbe   :  { %v5435_v46 = vand.u32 4294901760, %v5429_v45 }
 0xbc0   :  { %22415 = vmatpush3.msra.mxu0 %v5435_v46  ;;  %v5512_v49 = vsub.f32 %v5429_v45, %v5435_v46 }
 0xbc1   :  { %22419 = vmatprep.subr.mxu0 %v27345_v15 }
 0xbc2   :  { %v5513_v51 = vand.u32 4294901760, %v5512_v49 }
 0xbc4   :  { %v24846_v47 = vpop.eup %24845  ;;  %v5514_v55 = vsub.f32 %v5512_v49, %v5513_v51 }
 0xbc5   :  { %v5426_v48 = vmul.f32 %v24846_v47, %v24840_v31 }
 0xbc6   :  { %v5515_v58 = vand.u32 4294901760, %v5514_v55 }
 0xbc7   :  { %v5432_v50 = vsel %vm784_vm2, %v5426_v48, 0 }
 0xbc8   :  { %v5500_v38 = vand.u32 4294901760, %v5432_v50 }
 0xbca   :  { %v5501_v53 = vsub.f32 %v5432_v50, %v5500_v38 }
 0xbcc   :  { %v5502_v54 = vand.u32 4294901760, %v5501_v53 }
 0xbcd   :  { %8182 = vrot.lane.b32.xlu0 %v25353_v30, %s25085_s22 }
 0xbce   :  { %v5503_v56 = vsub.f32 %v5501_v53, %v5502_v54 }
 0xbd0   :  { %v5504_v57 = vand.u32 4294901760, %v5503_v56 }
 0xbd2   :  { %22417 = vmatmul.mubr.f32.vlgmr.msra.gmra.mrb[16].mxu0 %v5504_v57  ;;  %v8173_v59 = vpop.xlane.xlu1 %8172 }
 0xbd3   :  { %22420 = vmatpush3.msra.mxu0 %v5515_v58  ;;  %v8174_v61 = vsub.f32 %v8170_v34, %v8173_v59  ;;  %22421 = vmatprep.mubr.msk.f32.mxu0 %vm25075_vm1, %v27345_v15 }
 0xbd4   :  { %22424 = vmatprep.subr.mxu0 %v27345_v15 }
 0xbd5   :  { %v8175_v63 = vmul.f32 1.442695, %v8174_v61 }
 0xbd7   :  { %24847 = vpow2.f32 %v8175_v63 }
 0xbda   :  { %22422 = vmatmul.mubr.f32.vlgmr.msra.gmra.mrb[16].mxu0 %v5500_v38 }
 0xbdb   :  { %22425 = vmatpush3.msra.mxu0 %v5512_v49  ;;  %22426 = vmatprep.mubr.msk.f32.mxu0 %vm25075_vm1, %v27345_v15 }
 0xbdc   :  { %22429 = vmatprep.subr.mxu0 %v27345_v15 }
 0xbe1   :  { %v25790_v30 = vpop.eup %24847 }
 0xbe2   :  { %22427 = vmatmul.mubr.f32.vlgmr.msra.gmra.mrb[16].mxu0 %v5501_v53  ;;  %v8177_v2 = vsel %vm784_vm2, %v25790_v30, 0.0 }
 0xbe3   :  { %22430 = vmatpush3.msra.mxu0 %v5435_v46  ;;  %8178 = vadd.xlane.f32.xlu1 %v8177_v2 }
 0xbe4   :  { %22431 = vmatprep.mubr.msk.f32.mxu0 %vm25075_vm1, %v27345_v15  ;;  %22434 = vmatprep.subr.mxu0 %v27345_v15 }
 0xbea   :  { %22432 = vmatmul.mubr.f32.vlgmr.msra.gmra.mrb[16].mxu0 %v5502_v54 }
 0xbeb   :  { %22435 = vmatpush3.msra.mxu0 %v5513_v51  ;;  %22436 = vmatprep.mubr.msk.f32.mxu0 %vm25075_vm1, %v27345_v15 }
 0xbec   :  { %22439 = vmatprep.subr.mxu0 %v27345_v15 }
 0xbf2   :  { %22437 = vmatmul.mubr.f32.vlgmr.msra.gmra.mrb[16].mxu0 %v5500_v38 }
 0xbf3   :  { %22440 = vmatpush3.msra.mxu0 %v5435_v46  ;;  %22441 = vmatprep.mubr.msk.f32.mxu0 %vm25075_vm1, %v27345_v15 }
 0xbf4   :  { %22474 = vmatprep.subr.mxu0 %v27345_v15 }
 0xbfa   :  { %22442 = vmatmul.mubr.f32.vlgmr.msra.gmra.mrb[16].mxu0 %v5500_v38 }
 0xbfb   :  { %22476 = vmatprep.mubr.msk.f32.mxu0 %vm25075_vm1, %v27345_v15 }
 0xc18   :  { %v6343_v3 = vpop.xlane.xlu1 %6342 }
 0xc19   :  { %24849 = vrcp.f32 %v6343_v3 }
 0xc1c   :  { %v6347_v4 = vpop.permute.xlu1 %6346 }
 0xc1d   :  { %v6353_v6 = vand.u32 4294901760, %v6347_v4 }
 0xc1f   :  { %22475 = vmatpush3.msra.mxu0 %v6353_v6  ;;  %v6430_v16 = vsub.f32 %v6347_v4, %v6353_v6 }
 0xc20   :  { %22479 = vmatprep.subr.mxu0 %v27345_v15  ;;  %v7265_v35 = vpop.permute.xlu1 %7264 }
 0xc21   :  { %v6431_v26 = vand.u32 4294901760, %v6430_v16  ;;  %v7271_v36 = vand.u32 4294901760, %v7265_v35 }
 0xc23   :  { %v24850_v13 = vpop.eup %24849  ;;  %v6432_v29 = vsub.f32 %v6430_v16, %v6431_v26  ;;  %v7348_v0 = vsub.f32 %v7265_v35, %v7271_v36 }
 0xc24   :  { %v6345_v14 = vmul.f32 %v24850_v13, %v25768_v23 }
 0xc25   :  { %v6433_v33 = vand.u32 4294901760, %v6432_v29  ;;  %v7349_v25 = vand.u32 4294901760, %v7348_v0  ;;  %v9156_v29 = vld [vmem:[%s27339_s5 + $0x10] sm:$0xff] }
 0xc26   :  { %v6350_v22 = vsel %vm784_vm2, %v6345_v14, 0  ;;  %v25872_v14 = vld [vmem:[#allocation2] sm:$0xff] }
 0xc27   :  { %v6418_v24 = vand.u32 4294901760, %v6350_v22  ;;  %v7350_v17 = vsub.f32 %v7348_v0, %v7349_v25 }
 0xc29   :  { %v6419_v27 = vsub.f32 %v6350_v22, %v6418_v24  ;;  %v7351_v45 = vand.u32 4294901760, %v7350_v17 }
 0xc2b   :  { %v6420_v28 = vand.u32 4294901760, %v6419_v27 }
 0xc2d   :  { %v6421_v31 = vsub.f32 %v6419_v27, %v6420_v28 }
 0xc2f   :  { %v6422_v32 = vand.u32 4294901760, %v6421_v31 }
 0xc31   :  { %22477 = vmatmul.mubr.f32.vlgmr.msra.gmra.mrb[18].mxu0 %v6422_v32  ;;  %v9159_v32 = vld [vmem:[%s27339_s5 + $0x28] sm:$0xff] }
 0xc32   :  { %22480 = vmatpush3.msra.mxu0 %v6433_v33  ;;  %22481 = vmatprep.mubr.msk.f32.mxu0 %vm25075_vm1, %v27345_v15  ;;  %v9161_v33 = vld [vmem:[%s27339_s5 + $0x38] sm:$0xff]  ;;  %v9176_v35 = vand.u32 4294901760, %v9159_v32 }
 0xc33   :  { %22484 = vmatprep.subr.mxu0 %v27345_v15 }
 0xc39   :  { %22482 = vmatmul.mubr.f32.vlgmr.msra.gmra.mrb[18].mxu0 %v6418_v24 }
 0xc3a   :  { %22485 = vmatpush3.msra.mxu0 %v6430_v16  ;;  %22486 = vmatprep.mubr.msk.f32.mxu0 %vm25075_vm1, %v27345_v15 }
 0xc3b   :  { %22489 = vmatprep.subr.mxu0 %v27345_v15 }
 0xc41   :  { %22487 = vmatmul.mubr.f32.vlgmr.msra.gmra.mrb[18].mxu0 %v6419_v27  ;;  %v9154_v27 = vld [vmem:[%s27339_s5] sm:$0xff] }
 0xc42   :  { %22490 = vmatpush3.msra.mxu0 %v6353_v6  ;;  %22491 = vmatprep.mubr.msk.f32.mxu0 %vm25075_vm1, %v27345_v15  ;;  %v9170_v31 = vand.u32 4294901760, %v9154_v27 }
 0xc43   :  { %22494 = vmatprep.subr.mxu0 %v27345_v15 }
 0xc44   :  { %v7261_v34 = vpop.xlane.xlu0 %7260 }
 0xc45   :  { %24851 = vrcp.f32 %v7261_v34  ;;  %v9174_v34 = vand.u32 4294901760, %v9156_v29 }
 0xc48   :  { %v8183_v47 = vpop.permute.xlu0 %8182 }
 0xc49   :  { %22492 = vmatmul.mubr.f32.vlgmr.msra.gmra.mrb[18].mxu0 %v6420_v28  ;;  %v8189_v48 = vand.u32 4294901760, %v8183_v47 }
 0xc4a   :  { %22495 = vmatpush3.msra.mxu0 %v6431_v26  ;;  %22496 = vmatprep.mubr.msk.f32.mxu0 %vm25075_vm1, %v27345_v15  ;;  %v9157_v26 = vld [vmem:[%s27339_s5 + $0x18] sm:$0xff] }
 0xc4b   :  { %22499 = vmatprep.subr.mxu0 %v27345_v15  ;;  %v8266_v50 = vsub.f32 %v8183_v47, %v8189_v48  ;;  %v9172_v28 = vand.u32 4294901760, %v9157_v26 }
 0xc4d   :  { %v8267_v54 = vand.u32 4294901760, %v8266_v50 }
 0xc4f   :  { %v24852_v10 = vpop.eup %24851  ;;  %v8268_v57 = vsub.f32 %v8266_v50, %v8267_v54 }
 0xc50   :  { %v7263_v41 = vmul.f32 %v24852_v10, %v25776_v44  ;;  %v9160_v10 = vld [vmem:[%s27339_s5 + $0x30] sm:$0xff] }
 0xc51   :  { %22497 = vmatmul.mubr.f32.vlgmr.msra.gmra.mrb[18].mxu0 %v6418_v24  ;;  %v8269_v61 = vand.u32 4294901760, %v8268_v57 }
 0xc52   :  { %22500 = vmatpush3.msra.mxu0 %v6353_v6  ;;  %22501 = vmatprep.mubr.msk.f32.mxu0 %vm25075_vm1, %v27345_v15  ;;  %v7268_v23 = vsel %vm784_vm2, %v7263_v41, 0  ;;  %v25907_v41 = vsub.f32 %v9157_v26, %v9172_v28 }
 0xc53   :  { %22534 = vmatprep.subr.mxu0 %v27345_v15  ;;  %v7336_v37 = vand.u32 4294901760, %v7268_v23 }
 0xc55   :  { %v7337_v40 = vsub.f32 %v7268_v23, %v7336_v37  ;;  %v25909_v23 = vsub.f32 %v9154_v27, %v9170_v31 }
 0xc57   :  { %v7338_v42 = vand.u32 4294901760, %v7337_v40 }
 0xc59   :  { %22502 = vmatmul.mubr.f32.vlgmr.msra.gmra.mrb[18].mxu0 %v6418_v24  ;;  %v7339_v21 = vsub.f32 %v7337_v40, %v7338_v42  ;;  %v9155_v24 = vld [vmem:[%s27339_s5 + $0x8] sm:$0xff] }
 0xc5a   :  { %22535 = vmatpush3.msra.mxu0 %v7271_v36  ;;  %22536 = vmatprep.mubr.msk.f32.mxu0 %vm25075_vm1, %v27345_v15 }
 0xc5b   :  { %22539 = vmatprep.subr.mxu0 %v27345_v15  ;;  %v7340_v44 = vand.u32 4294901760, %v7339_v21  ;;  %v9182_v21 = vand.u32 4294901760, %v9160_v10 }
 0xc5d   :  { %22537 = vmatmul.mubr.f32.vlgmr.msra.gmra.mrb[20].mxu0 %v7340_v44 }
 0xc5e   :  { %22540 = vmatpush3.msra.mxu0 %v7351_v45  ;;  %22541 = vmatprep.mubr.msk.f32.mxu0 %vm25075_vm1, %v27345_v15  ;;  %v25919_v45 = vsub.f32 %v9160_v10, %v9182_v21 }
 0xc5f   :  { %22544 = vmatprep.subr.mxu0 %v27345_v15 }
 0xc65   :  { %22542 = vmatmul.mubr.f32.vlgmr.msra.gmra.mrb[20].mxu0 %v7336_v37 }
 0xc66   :  { %22545 = vmatpush3.msra.mxu0 %v7348_v0  ;;  %22546 = vmatprep.mubr.msk.f32.mxu0 %vm25075_vm1, %v27345_v15 }
 0xc67   :  { %22549 = vmatprep.subr.mxu0 %v27345_v15 }
 0xc6d   :  { %22547 = vmatmul.mubr.f32.vlgmr.msra.gmra.mrb[20].mxu0 %v7337_v40  ;;  %v25913_v40 = vsub.f32 %v9159_v32, %v9176_v35 }
 0xc6e   :  { %22550 = vmatpush3.msra.mxu0 %v7271_v36  ;;  %22551 = vmatprep.mubr.msk.f32.mxu0 %vm25075_vm1, %v27345_v15 }
 0xc6f   :  { %22554 = vmatprep.subr.mxu0 %v27345_v15 }
 0xc70   :  { %v8179_v46 = vpop.xlane.xlu1 %8178 }
 0xc71   :  { %24853 = vrcp.f32 %v8179_v46 }
 0xc75   :  { %22552 = vmatmul.mubr.f32.vlgmr.msra.gmra.mrb[20].mxu0 %v7338_v42 }
 0xc76   :  { %22555 = vmatpush3.msra.mxu0 %v7349_v25  ;;  %22556 = vmatprep.mubr.msk.f32.mxu0 %vm25075_vm1, %v27345_v15  ;;  %v25911_v25 = vsub.f32 %v9156_v29, %v9174_v34 }
 0xc77   :  { %22559 = vmatprep.subr.mxu0 %v27345_v15 }
 0xc7b   :  { %v24854_v49 = vpop.eup %24853 }
 0xc7c   :  { %v8181_v38 = vmul.f32 %v24854_v49, %v25790_v30 }
 0xc7d   :  { %22557 = vmatmul.mubr.f32.vlgmr.msra.gmra.mrb[20].mxu0 %v7336_v37 }
 0xc7e   :  { %22560 = vmatpush3.msra.mxu0 %v7271_v36  ;;  %22561 = vmatprep.mubr.msk.f32.mxu0 %vm25075_vm1, %v27345_v15  ;;  %v8186_v51 = vsel %vm784_vm2, %v8181_v38, 0  ;;  %v9158_v36 = vld [vmem:[%s27339_s5 + $0x20] sm:$0xff] }
 0xc7f   :  { %22594 = vmatprep.subr.mxu0 %v27345_v15  ;;  %v8254_v53 = vand.u32 4294901760, %v8186_v51  ;;  %v9178_v17 = vand.u32 4294901760, %v9158_v36 }
 0xc81   :  { %v8255_v55 = vsub.f32 %v8186_v51, %v8254_v53  ;;  %v25917_v44 = vsub.f32 %v9158_v36, %v9178_v17 }
 0xc83   :  { %v8256_v56 = vand.u32 4294901760, %v8255_v55 }
 0xc85   :  { %22562 = vmatmul.mubr.f32.vlgmr.msra.gmra.mrb[20].mxu0 %v7336_v37  ;;  %v8257_v58 = vsub.f32 %v8255_v55, %v8256_v56  ;;  %v9180_v37 = vand.u32 4294901760, %v9161_v33 }
 0xc86   :  { %22595 = vmatpush3.msra.mxu0 %v8189_v48  ;;  %22596 = vmatprep.mubr.msk.f32.mxu0 %vm25075_vm1, %v27345_v15 }
 0xc87   :  { %22599 = vmatprep.subr.mxu0 %v27345_v15  ;;  %v8258_v59 = vand.u32 4294901760, %v8257_v58  ;;  %v25915_v42 = vsub.f32 %v9161_v33, %v9180_v37 }
 0xc89   :  { %22597 = vmatmul.mubr.f32.vlgmr.msra.gmra.mrb[22].mxu0 %v8258_v59 }
 0xc8a   :  { %22600 = vmatpush3.msra.mxu0 %v8269_v61  ;;  %22601 = vmatprep.mubr.msk.f32.mxu0 %vm25075_vm1, %v27345_v15 }
 0xc8b   :  { %22604 = vmatprep.subr.mxu0 %v27345_v15 }
 0xc91   :  { %22602 = vmatmul.mubr.f32.vlgmr.msra.gmra.mrb[22].mxu0 %v8254_v53 }
 0xc92   :  { %22605 = vmatpush3.msra.mxu0 %v8266_v50  ;;  %22606 = vmatprep.mubr.msk.f32.mxu0 %vm25075_vm1, %v27345_v15 }
 0xc93   :  { %22609 = vmatprep.subr.mxu0 %v27345_v15 }
 0xc99   :  { %22607 = vmatmul.mubr.f32.vlgmr.msra.gmra.mrb[22].mxu0 %v8255_v55 }
 0xc9a   :  { %22610 = vmatpush3.msra.mxu0 %v8189_v48  ;;  %22611 = vmatprep.mubr.msk.f32.mxu0 %vm25075_vm1, %v27345_v15 }
 0xc9b   :  { %22614 = vmatprep.subr.mxu0 %v27345_v15 }
 0xca1   :  { %22612 = vmatmul.mubr.f32.vlgmr.msra.gmra.mrb[22].mxu0 %v8256_v56 }
 0xca2   :  { %22615 = vmatpush3.msra.mxu0 %v8267_v54  ;;  %22616 = vmatprep.mubr.msk.f32.mxu0 %vm25075_vm1, %v27345_v15 }
 0xca3   :  { %22619 = vmatprep.subr.mxu0 %v27345_v15 }
 0xca9   :  { %22617 = vmatmul.mubr.f32.vlgmr.msra.gmra.mrb[22].mxu0 %v8254_v53 }
 0xcaa   :  { %22620 = vmatpush3.msra.mxu0 %v8189_v48  ;;  %22621 = vmatprep.mubr.msk.f32.mxu0 %vm25075_vm1, %v27345_v15 }
 0xcab   :  { %23782 = vmatprep.subr.bf16.mxu0 %v27343_v43 }
 0xcb1   :  { %22622 = vmatmul.mubr.f32.vlgmr.msra.gmra.mrb[22].mxu0 %v8254_v53 }
 0xcb2   :  { %23784 = vmatpush3.bf16.msra.mxu0 %v25596_v52  ;;  %22643 = vmatprep.mubr.msk.f32.mxu0 %vm25075_vm1, %v27345_v15 }
 0xcb3   :  { %23785 = vmatprep.subr.bf16.mxu0 %v27343_v43 }
 0xcb6   :  { %23787 = vmatpush3.bf16.msra.mxu0 %v25601_v7  ;;  %v25876_v7 = vadd.f32 %v25872_v14, %v25739_v60  ;;  %v9168_v60 = vand.u32 4294901760, %v9155_v24 }
 0xcb7   :  { %23794 = vmatprep.subr.bf16.mxu0 %v27343_v43 }
 0xcb8   :  { %v9138_v16 = vmul.f32 %v25876_v7, %v25876_v7  ;;  %v25905_v0 = vsub.f32 %v9155_v24, %v9168_v60 }
 0xcba   :  { %v9140_v22 = vsel %vm111_vm0, %v9138_v16, 0.0 }
 0xccd   :  { %v5876_v63 = vpop.f32.mrb[16].mxu0 }
 0xcce   :  { %v22443_v30 = vpop.f32.mrb[17].mxu0 }
 0xd2c   :  { %v6794_v2 = vpop.f32.mrb[18].mxu0 }
 0xd2d   :  { %8635 = vrot.lane.b32.xlu1 %v6794_v2, %s25068_s18  ;;  %v22503_v3 = vpop.f32.mrb[19].mxu0 }
 0xd58   :  { %v7712_v4 = vpop.f32.mrb[20].mxu0 }
 0xd59   :  { %8639 = vrot.lane.b32.xlu0 %v7712_v4, %s25087_s23  ;;  %v22563_v6 = vpop.f32.mrb[21].mxu0 }
 0xd84   :  { %v8630_v52 = vpop.f32.mrb[22].mxu0 }
 0xd85   :  { %8643 = vrot.lane.b32.xlu0 %v8630_v52, %s25088_s24  ;;  %v22623_v13 = vpop.f32.mrb[23].mxu0 }
 0xd9f   :  { %v8636_v46 = vpop.permute.xlu1 %8635 }
 0xda0   :  { %v8646_v48 = vsel %vm784_vm2, %v5876_v63, %v8636_v46 }
 0xda4   :  { %9141 = vadd.xlane.f32.xlu0 %v9140_v22 }
 0xdcb   :  { %v8640_v47 = vpop.permute.xlu0 %8639 }
 0xdcc   :  { %v8647_v49 = vsel %vm4468_vm4, %v8646_v48, %v8640_v47  ;;  %v9265_v47 = vand.u32 4294901760, %v25905_v0  ;;  %v9277_v48 = vand.u32 4294901760, %v25907_v41 }
 0xdf7   :  { %v8644_v50 = vpop.permute.xlu0 %8643 }
 0xdf8   :  { %v8648_v38 = vsel %vm4470_vm5, %v8647_v49, %v8644_v50  ;;  %v9271_v49 = vand.u32 4294901760, %v25909_v23  ;;  %v9283_v50 = vand.u32 4294901760, %v25911_v25 }
 0xdf9   :  { %v8650_v51 = vsel %vm111_vm0, %v8648_v38, 0  ;;  %v9266_v38 = vsub.f32 %v25905_v0, %v9265_v47 }
 0xdfa   :  { %v8721_v53 = vand.u32 4294901760, %v8650_v51 }
 0xdfc   :  { %v8722_v54 = vsub.f32 %v8650_v51, %v8721_v53  ;;  %22644 = vmatmul.mubr.f32.vlgmr.msra.gmra.mrb[24].mxu0 %v8721_v53  ;;  %v9278_v51 = vsub.f32 %v25907_v41, %v9277_v48 }
 0xdfd   :  { %23796 = vmatpush3.bf16.msra.mxu0 %v25605_v8  ;;  %22665 = vmatprep.mubr.msk.f32.mxu0 %vm25075_vm1, %v27345_v15 }
 0xdfe   :  { %23797 = vmatprep.subr.bf16.mxu0 %v27343_v43  ;;  %v8723_v55 = vand.u32 4294901760, %v8722_v54 }
 0xe00   :  { %v8724_v56 = vsub.f32 %v8722_v54, %v8723_v55 }
 0xe01   :  { %23799 = vmatpush3.bf16.msra.mxu0 %v25609_v11 }
 0xe02   :  { %23806 = vmatprep.subr.bf16.mxu0 %v27343_v43  ;;  %v8725_v57 = vand.u32 4294901760, %v8724_v56  ;;  %v9279_v56 = vand.u32 4294901760, %v9278_v51 }
 0xe04   :  { %22666 = vmatmul.mubr.f32.vlgmr.msra.gmra.mrb[26].mxu0 %v8723_v55  ;;  %22633 = vmatmul.mubr.f32.vlgmr.msra.gmra.mrb[24].mxu1 %v8725_v57  ;;  %v9267_v55 = vand.u32 4294901760, %v9266_v38 }
 0xe05   :  { %23790 = vmatpush3.bf16.msra.mxu1 %v25613_v12  ;;  %23808 = vmatpush3.bf16.msra.mxu0 %v25605_v8  ;;  %v25946_v8 = vpack.c.bf16 %v9172_v28, %v9168_v60  ;;  %v25949_v12 = vpack.c.bf16 %v9174_v34, %v9170_v31 }
 0xe06   :  { %23791 = vmatprep.subr.bf16.mxu1 %v27343_v43  ;;  %23809 = vmatprep.subr.bf16.mxu0 %v27343_v43 }
 0xe07   :  { %22654 = vmatprep.mubr.msk.f32.mxu1 %vm25075_vm1, %v27345_v15  ;;  %22687 = vmatprep.mubr.msk.f32.mxu0 %vm25075_vm1, %v27345_v15 }
 0xe09   :  { %23793 = vmatpush3.bf16.msra.mxu1 %v25618_v18  ;;  %23811 = vmatpush3.bf16.msra.mxu0 %v25609_v11  ;;  %v25952_v11 = vpack.c.bf16 %v9180_v37, %v9176_v35  ;;  %v25955_v18 = vpack.c.bf16 %v9182_v21, %v9178_v17  ;;  %v25972_v37 = vld [vmem:[#allocation2 + $0x8] sm:$0xff] }
 0xe0a   :  { %23800 = vmatprep.subr.bf16.mxu1 %v27343_v43 }
 0xe0c   :  { %22655 = vmatmul.mubr.f32.vlgmr.msra.gmra.mrb[26].mxu1 %v8722_v54  ;;  %22688 = vmatmul.mubr.f32.vlgmr.msra.gmra.mrb[28].mxu0 %v8721_v53  ;;  %v9284_v54 = vsub.f32 %v25911_v25, %v9283_v50 }
 0xe0d   :  { %23802 = vmatpush3.bf16.msra.mxu1 %v25621_v19  ;;  %22676 = vmatprep.mubr.msk.f32.mxu1 %vm25075_vm1, %v27345_v15 }
 0xe0e   :  { %23803 = vmatprep.subr.bf16.mxu1 %v27343_v43 }
 0xe11   :  { %23805 = vmatpush3.bf16.msra.mxu1 %v25623_v20 }
 0xe12   :  { %23813 = vmatprep.subr.bf16.mxu1 %v25946_v8 }
 0xe14   :  { %22677 = vmatmul.mubr.f32.vlgmr.msra.gmra.mrb[28].mxu1 %v8721_v53  ;;  %v9272_v53 = vsub.f32 %v25909_v23, %v9271_v49 }
 0xe15   :  { %23815 = vmatpush1.bf16.msra.mxu1 %v25949_v12  ;;  %9240 = vmatprep.mubr.f32.mxu1 %v27345_v15 }
 0xe16   :  { %23817 = vmatprep.subr.bf16.mxu1 %v25952_v11  ;;  %v9273_v57 = vand.u32 4294901760, %v9272_v53 }
 0xe19   :  { %23819 = vmatpush1.bf16.msra.mxu1 %v25955_v18 }
 0xe31   :  { %v9142_v19 = vpop.xlane.xlu0 %9141 }
 0xe32   :  { %v9146_v58 = vmul.f32 0.03125, %v9142_v19  ;;  %v9285_v19 = vand.u32 4294901760, %v9284_v54 }
 0xe34   :  { %v9148_v20 = vadd.f32 1e-05, %v9146_v58  ;;  %v23820_v58 = vpack.c.bf16 %v9279_v56, %v9267_v55  ;;  %v9798_v56 = vld [vmem:[%s27340_s6 + $0x30] sm:$0xff] }
 0xe36   :  { %24855 = vrsqrt.f32 %v9148_v20  ;;  %v23822_v20 = vpack.c.bf16 %v9285_v19, %v9273_v57  ;;  %23821 = vmatprep.subr.bf16.mxu1 %v23820_v58  ;;  %v9799_v57 = vld [vmem:[%s27340_s6 + $0x38] sm:$0xff]  ;;  %v9830_v19 = vand.u32 4294901760, %v9798_v56 }
 0xe37   :  { %v9833_v58 = vand.u32 4294901760, %v9799_v57 }
 0xe40   :  { %v24856_v59 = vpop.eup %24855 }
 0xe41   :  { %v9152_v61 = vmul.f32 %v24856_v59, %v25876_v7  ;;  %v9289_v59 = vand.u32 4294901760, %v25913_v40 }
 0xe43   :  { %v9163_v63 = vsel %vm111_vm0, %v9152_v61, 0  ;;  %v9301_v61 = vand.u32 4294901760, %v25915_v42 }
 0xe44   :  { %v25962_v30 = vand.u32 4294901760, %v9163_v63 }
 0xe46   :  { %v25965_v2 = vsub.f32 %v9163_v63, %v25962_v30  ;;  %v9295_v63 = vand.u32 4294901760, %v25917_v44 }
 0xe48   :  { %v9243_v3 = vand.u32 4294901760, %v25965_v2 }
 0xe4a   :  { %v9244_v4 = vsub.f32 %v25965_v2, %v9243_v3 }
 0xe4c   :  { %v9245_v6 = vand.u32 4294901760, %v9244_v4  ;;  %v9307_v4 = vand.u32 4294901760, %v25919_v45 }
 0xe4e   :  { %9246 = vmatmul.mubr.f32.vlgmr.msra.gmra.mrb[30].mxu1 %v9245_v6  ;;  %v9290_v6 = vsub.f32 %v25913_v40, %v9289_v59 }
 0xe4f   :  { %9251 = vmatprep.mubr.f32.mxu1 %v27345_v15  ;;  %23823 = vmatpush1.bf16.msra.mxu1 %v23822_v20  ;;  %v26077_v20 = vpack.c.bf16 %v9833_v58, %v9830_v19 }
 0xecf   :  { %v8818_v52 = vpop.f32.mrb[24].mxu0 }
 0xed0   :  { %v22645_v13 = vpop.f32.mrb[25].mxu0 }
 0xed1   :  { %v9296_v13 = vsub.f32 %v25917_v44, %v9295_v63 }
 0xed7   :  { %v8975_v16 = vpop.f32.mrb[26].mxu0  ;;  %v8727_v22 = vpop.f32.mrb[24].mxu1 }
 0xed8   :  { %v8819_v24 = vadd.f32 %v8818_v52, %v8727_v22  ;;  %v22667_v26 = vpop.f32.mrb[27].mxu0  ;;  %v22634_v27 = vpop.f32.mrb[25].mxu1  ;;  %v9302_v52 = vsub.f32 %v25915_v42, %v9301_v61  ;;  %v9291_v22 = vand.u32 4294901760, %v9290_v6 }
 0xed9   :  { %v9297_v26 = vand.u32 4294901760, %v9296_v13 }
 0xedf   :  { %v8898_v60 = vpop.f32.mrb[26].mxu1  ;;  %v9133_v28 = vpop.f32.mrb[28].mxu0 }
 0xee0   :  { %v8899_v29 = vadd.f32 %v8898_v60, %v8819_v24  ;;  %v22656_v31 = vpop.f32.mrb[27].mxu1  ;;  %v22689_v32 = vpop.f32.mrb[29].mxu0  ;;  %v9303_v24 = vand.u32 4294901760, %v9302_v52 }
 0xee1   :  { %v23830_v31 = vpack.c.bf16 %v25911_v25, %v25909_v23  ;;  %v23832_v32 = vpack.c.bf16 %v25915_v42, %v25913_v40 }
 0xee2   :  { %v8976_v33 = vadd.f32 %v8975_v16, %v8899_v29  ;;  %v9308_v16 = vsub.f32 %v25919_v45, %v9307_v4  ;;  %v23824_v60 = vpack.c.bf16 %v9303_v24, %v9291_v22  ;;  %v23828_v29 = vpack.c.bf16 %v25907_v41, %v25905_v0  ;;  %v9803_v22 = vld [vmem:[%s27340_s6 + $0x58] sm:$0xff] }
 0xee4   :  { %v9309_v27 = vand.u32 4294901760, %v9308_v16  ;;  %23825 = vmatprep.subr.bf16.mxu1 %v23824_v60  ;;  %v9802_v16 = vld [vmem:[%s27340_s6 + $0x50] sm:$0xff] }
 0xee5   :  { %v9842_v24 = vand.u32 4294901760, %v9802_v16 }
 0xee7   :  { %v9058_v34 = vpop.f32.mrb[28].mxu1 }
 0xee8   :  { %v9059_v35 = vadd.f32 %v9058_v34, %v8976_v33  ;;  %v22678_v36 = vpop.f32.mrb[29].mxu1  ;;  %v23834_v33 = vpack.c.bf16 %v25919_v45, %v25917_v44  ;;  %v23844_v34 = vpack.c.bf16 %v9277_v48, %v9265_v47  ;;  %v9792_v44 = vld [vmem:[%s27340_s6] sm:$0xff]  ;;  %v9793_v45 = vld [vmem:[%s27340_s6 + $0x8] sm:$0xff] }
 0xee9   :  { %v23848_v36 = vpack.c.bf16 %v9301_v61, %v9289_v59  ;;  %v9796_v48 = vld [vmem:[%s27340_s6 + $0x20] sm:$0xff]  ;;  %v9801_v61 = vld [vmem:[%s27340_s6 + $0x48] sm:$0xff] }
 0xeea   :  { %v9134_v10 = vadd.f32 %v9133_v28, %v9059_v35  ;;  %v23826_v28 = vpack.c.bf16 %v9309_v27, %v9297_v26  ;;  %v23846_v35 = vpack.c.bf16 %v9283_v50, %v9271_v49  ;;  %v9797_v49 = vld [vmem:[%s27340_s6 + $0x28] sm:$0xff]  ;;  %v9824_v50 = vand.u32 4294901760, %v9796_v48  ;;  %v9800_v59 = vld [vmem:[%s27340_s6 + $0x40] sm:$0xff] }
 0xeeb   :  { %v9827_v54 = vand.u32 4294901760, %v9797_v49  ;;  %v9845_v26 = vand.u32 4294901760, %v9803_v22 }
 0xeec   :  { %v25975_v17 = vadd.f32 %v25972_v37, %v9134_v10  ;;  %23827 = vmatpush1.bf16.msra.mxu1 %v23826_v28  ;;  %v23850_v10 = vpack.c.bf16 %v9307_v4, %v9295_v63  ;;  %v9836_v63 = vand.u32 4294901760, %v9800_v59  ;;  %v9839_v4 = vand.u32 4294901760, %v9801_v61 }
 0xeed   :  { %23829 = vmatprep.subr.bf16.mxu1 %v23828_v29  ;;  %v26067_v55 = vpack.c.bf16 %v9827_v54, %v9824_v50 }
 0xeee   :  { %v9139_v21 = vmul.f32 %v25975_v17, %v25975_v17  ;;  %v26087_v6 = vpack.c.bf16 %v9839_v4, %v9836_v63 }
 0xef0   :  { %v9143_v46 = vsel %vm111_vm0, %v9139_v21, 0.0 }
 0xef1   :  { %9144 = vadd.xlane.f32.xlu1 %v9143_v46 }
 0xf7e   :  { %v9145_v21 = vpop.xlane.xlu1 %9144 }
 0xf7f   :  { %v9147_v46 = vmul.f32 0.03125, %v9145_v21 }
 0xf81   :  { %v9149_v38 = vadd.f32 1e-05, %v9147_v46  ;;  %v26124_v46 = vsub.f32 %v9796_v48, %v9824_v50  ;;  %v26150_v48 = vsub.f32 %v9800_v59, %v9836_v63  ;;  %v26168_v63 = vsub.f32 %v9803_v22, %v9845_v26 }
 0xf83   :  { %24857 = vrsqrt.f32 %v9149_v38  ;;  %v26127_v38 = vsub.f32 %v9797_v49, %v9827_v54  ;;  %v26152_v49 = vsub.f32 %v9801_v61, %v9839_v4  ;;  %v26166_v61 = vsub.f32 %v9802_v16, %v9842_v24 }
 0xf8d   :  { %v24858_v51 = vpop.eup %24857 }
 0xf8e   :  { %v9153_v0 = vmul.f32 %v24858_v51, %v25975_v17  ;;  %v9939_v51 = vand.u32 4294901760, %v26124_v46 }
 0xf90   :  { %v9166_v41 = vsel %vm111_vm0, %v9153_v0, 0  ;;  %v9946_v0 = vand.u32 4294901760, %v26127_v38 }
 0xf91   :  { %v9252_v23 = vand.u32 4294901760, %v9166_v41 }
 0xf93   :  { %v9253_v25 = vsub.f32 %v9166_v41, %v9252_v23  ;;  %v9940_v41 = vsub.f32 %v26124_v46, %v9939_v51 }
 0xf95   :  { %v9254_v53 = vand.u32 4294901760, %v9253_v25 }
 0xf97   :  { %v9255_v40 = vsub.f32 %v9253_v25, %v9254_v53 }
 0xf99   :  { %v9256_v42 = vand.u32 4294901760, %v9255_v40  ;;  %v9941_v40 = vand.u32 4294901760, %v9940_v41 }
 0xf9b   :  { %9257 = vmatmul.mubr.f32.gmra.mrb[32].mxu1 %v9256_v42 }
 0xf9c   :  { %9367 = vmatprep.mubr.f32.mxu1 %v27345_v15 }
 0xf9f   :  { %9369 = vmatmul.mubr.f32.vlgmr.msra.gmra.mrb[30].mxu1 %v25962_v30 }
 0xfa0   :  { %23831 = vmatpush1.bf16.msra.mxu1 %v23830_v31  ;;  %9374 = vmatprep.mubr.f32.mxu1 %v27345_v15  ;;  %v26107_v31 = vpack.c.bf16 %v9845_v26, %v9842_v24 }
 0xfa1   :  { %23833 = vmatprep.subr.bf16.mxu1 %v23832_v32 }
 0xfa3   :  { %9376 = vmatmul.mubr.f32.gmra.mrb[32].mxu1 %v9252_v23 }
 0xfa4   :  { %23835 = vmatpush1.bf16.msra.mxu1 %v23834_v33  ;;  %9462 = vmatprep.mubr.f32.mxu1 %v27345_v15 }
 0xfa5   :  { %23837 = vmatprep.subr.bf16.mxu1 %v25946_v8 }
 0xfa7   :  { %9465 = vmatmul.mubr.f32.vlgmr.msra.gmra.mrb[30].mxu1 %v25965_v2 }
 0xfa8   :  { %23839 = vmatpush1.bf16.msra.mxu1 %v25949_v12  ;;  %9470 = vmatprep.mubr.f32.mxu1 %v27345_v15 }
 0xfa9   :  { %23841 = vmatprep.subr.bf16.mxu1 %v25952_v11 }
 0xfab   :  { %9473 = vmatmul.mubr.f32.gmra.mrb[32].mxu1 %v9253_v25  ;;  %v26137_v25 = vsub.f32 %v9799_v57, %v9833_v58  ;;  %v9967_v57 = vand.u32 4294901760, %v26150_v48 }
 0xfac   :  { %23843 = vmatpush1.bf16.msra.mxu1 %v25955_v18  ;;  %9551 = vmatprep.mubr.f32.mxu1 %v27345_v15 }
 0xfad   :  { %23845 = vmatprep.subr.bf16.mxu1 %v23844_v34 }
 0xfaf   :  { %9555 = vmatmul.mubr.f32.vlgmr.msra.gmra.mrb[30].mxu1 %v9243_v3 }
 0xfb0   :  { %23847 = vmatpush1.bf16.msra.mxu1 %v23846_v35  ;;  %9560 = vmatprep.mubr.f32.mxu1 %v27345_v15 }
 0xfb1   :  { %23849 = vmatprep.subr.bf16.mxu1 %v23848_v36 }
 0xfb3   :  { %9564 = vmatmul.mubr.f32.gmra.mrb[32].mxu1 %v9254_v53  ;;  %v9947_v53 = vsub.f32 %v26127_v38, %v9946_v0 }
 0xfb4   :  { %23851 = vmatpush1.bf16.msra.mxu1 %v23850_v10  ;;  %9658 = vmatprep.mubr.f32.mxu1 %v27345_v15 }
 0xfb5   :  { %23853 = vmatprep.subr.bf16.mxu1 %v25946_v8  ;;  %v26040_v8 = vld [vmem:[%s27340_s6 + $0x10] sm:$0xff] }
 0xfb7   :  { %9660 = vmatmul.mubr.f32.vlgmr.msra.gmra.mrb[30].mxu1 %v25962_v30 }
 0xfb8   :  { %23855 = vmatpush1.bf16.msra.mxu1 %v25949_v12  ;;  %9665 = vmatprep.mubr.f32.mxu1 %v27345_v15  ;;  %v9812_v12 = vand.u32 4294901760, %v9792_v44 }
 0xfb9   :  { %23857 = vmatprep.subr.bf16.mxu1 %v25952_v11  ;;  %v9815_v11 = vand.u32 4294901760, %v9793_v45 }
 0xfba   :  { %v26089_v52 = vsub.f32 %v9792_v44, %v9812_v12  ;;  %v9960_v44 = vand.u32 4294901760, %v26137_v25 }
 0xfbb   :  { %9667 = vmatmul.mubr.f32.gmra.mrb[32].mxu1 %v9252_v23  ;;  %v26049_v3 = vpack.c.bf16 %v9815_v11, %v9812_v12  ;;  %v26091_v13 = vsub.f32 %v9793_v45, %v9815_v11  ;;  %v9948_v45 = vand.u32 4294901760, %v9947_v53  ;;  %v26188_v53 = vpack.c.bf16 %v26127_v38, %v26124_v46 }
 0xfbc   :  { %23859 = vmatpush1.bf16.msra.mxu1 %v25955_v18  ;;  %9745 = vmatprep.mubr.f32.mxu1 %v27345_v15  ;;  %v26045_v18 = vld [vmem:[%s27340_s6 + $0x18] sm:$0xff]  ;;  %v9911_v27 = vand.u32 4294901760, %v26089_v52  ;;  %v9961_v11 = vsub.f32 %v26137_v25, %v9960_v44 }
 0xfbd   :  { %v9821_v2 = vand.u32 4294901760, %v26045_v18  ;;  %23861 = vmatprep.subr.bf16.mxu0 %v26049_v3  ;;  %v9918_v60 = vand.u32 4294901760, %v26091_v13  ;;  %v26154_v50 = vpack.c.bf16 %v9948_v45, %v9941_v40  ;;  %v26184_v26 = vpack.c.bf16 %v26091_v13, %v26089_v52 }
 0xfbe   :  { %23863 = vmatpush3.bf16.msra.mxu0 %v26049_v3  ;;  %v9912_v32 = vsub.f32 %v26089_v52, %v9911_v27  ;;  %v26196_v45 = vpack.c.bf16 %v26152_v49, %v26150_v48 }
 0xfbf   :  { %9747 = vmatmul.mubr.f32.vlgmr.msra.gmra.mrb[30].mxu1 %v25962_v30  ;;  %v9818_v30 = vand.u32 4294901760, %v26040_v8  ;;  %v9919_v33 = vsub.f32 %v26091_v13, %v9918_v60 }
 0xfc0   :  { %9752 = vmatprep.mubr.f32.mxu1 %v27345_v15  ;;  %v9913_v34 = vand.u32 4294901760, %v9912_v32 }
 0xfc1   :  { %v26055_v47 = vpack.c.bf16 %v9821_v2, %v9818_v30  ;;  %v9920_v35 = vand.u32 4294901760, %v9919_v33  ;;  %v9981_v33 = vand.u32 4294901760, %v26166_v61 }
 0xfc3   :  { %9754 = vmatmul.mubr.f32.gmra.mrb[32].mxu1 %v9252_v23  ;;  %23865 = vmatprep.subr.bf16.mxu0 %v26055_v47  ;;  %v26122_v21 = vpack.c.bf16 %v9920_v35, %v9913_v34  ;;  %v26135_v23 = vsub.f32 %v9798_v56, %v9830_v19  ;;  %v9962_v56 = vand.u32 4294901760, %v9961_v11  ;;  %v9974_v19 = vand.u32 4294901760, %v26152_v49 }
 0xfc4   :  { %10548 = vmatprep.mubr.f32.mxu1 %v27345_v15  ;;  %23867 = vmatpush3.bf16.msra.mxu0 %v26055_v47  ;;  %v27347_v34 = vand.u32 4294901760, %v26168_v63 }
 0xfc5   :  { %23869 = vmatprep.subr.bf16.mxu0 %v26067_v55  ;;  %v9953_v42 = vand.u32 4294901760, %v26135_v23  ;;  %v9975_v59 = vsub.f32 %v26152_v49, %v9974_v19  ;;  %v26192_v40 = vpack.c.bf16 %v26137_v25, %v26135_v23  ;;  %v23972_v13 = vpack.c.bf16 %v9974_v19, %v9967_v57  ;;  %v21342_v25 = vld [vmem:[%s27337_s3 + $0x40] sm:$0xff] }
 0xfc6   :  { %v9989_v41 = vsub.f32 %v26168_v63, %v27347_v34 }
 0xfc7   :  { %v9954_v12 = vsub.f32 %v26135_v23, %v9953_v42  ;;  %v9976_v32 = vand.u32 4294901760, %v9975_v59  ;;  %v23968_v52 = vpack.c.bf16 %v9960_v44, %v9953_v42  ;;  %v21344_v42 = vld [vmem:[%s27337_s3 + $0x50] sm:$0xff]  ;;  %v10478_v44 = vand.u32 4294901760, %v21342_v25 }
 0xfc8   :  { %23871 = vmatpush3.bf16.msra.mxu0 %v26067_v55  ;;  %v9990_v24 = vand.u32 4294901760, %v9989_v41 }
 0xfc9   :  { %23873 = vmatprep.subr.bf16.mxu0 %v26077_v20  ;;  %v9955_v54 = vand.u32 4294901760, %v9954_v12  ;;  %v26200_v12 = vpack.c.bf16 %v26168_v63, %v26166_v61 }
 0xfcb   :  { %v26158_v58 = vpack.c.bf16 %v9962_v56, %v9955_v54 }
 0xfcc   :  { %23875 = vmatpush3.bf16.msra.mxu0 %v26077_v20 }
 0xfcd   :  { %23877 = vmatprep.subr.bf16.mxu0 %v26087_v6 }
 0xfd0   :  { %23879 = vmatpush3.bf16.msra.mxu0 %v26087_v6 }
 0xfd1   :  { %23881 = vmatprep.subr.bf16.mxu0 %v26107_v31 }
 0xfd4   :  { %23883 = vmatpush3.bf16.msra.mxu0 %v26107_v31 }
 0xfd5   :  { %23885 = vmatprep.subr.bf16.mxu0 %v26122_v21 }
0x1092   :  { %v26102_v28 = vpop.f32.mrb[30].mxu1 }
0x1093   :  { %9778 = vrot.lane.b32.xlu0 %v26102_v28, %s25074_s15  ;;  %v9750_v29 = vpop.f32.mrb[31].mxu1  ;;  %v9760_v11 = vsub.f32 0.0, %v26102_v28 }
0x1094   :  { %9780 = vrot.lane.b32.xlu1 %v9750_v29, %s25074_s15  ;;  %v9968_v29 = vsub.f32 %v26150_v48, %v9967_v57  ;;  %v10482_v48 = vand.u32 4294901760, %v21344_v42 }
0x1095   :  { %v9762_v54 = vmul.f32 1.442695, %v9760_v11 }
0x1096   :  { %v26117_v36 = vpop.f32.mrb[32].mxu1  ;;  %v9969_v4 = vand.u32 4294901760, %v9968_v29 }
0x1097   :  { %9782 = vrot.lane.b32.xlu0 %v26117_v36, %s25074_s15  ;;  %v9757_v10 = vpop.f32.mrb[33].mxu1  ;;  %v9761_v56 = vsub.f32 0.0, %v26117_v36  ;;  %24859 = vpow2.f32 %v9762_v54  ;;  %v26209_v54 = vsub.f32 %v26040_v8, %v9818_v30 }
0x1098   :  { %9784 = vrot.lane.b32.xlu1 %v9757_v10, %s25074_s15  ;;  %v26172_v35 = vpack.c.bf16 %v9976_v32, %v9969_v4  ;;  %v9982_v10 = vsub.f32 %v26166_v61, %v9981_v33  ;;  %v26338_v61 = vpack.c.bf16 %v10482_v48, %v10478_v44 }
0x1099   :  { %v9764_v29 = vmul.f32 1.442695, %v9761_v56  ;;  %v26214_v56 = vsub.f32 %v26045_v18, %v9821_v2 }
0x109a   :  { %v9983_v16 = vand.u32 4294901760, %v9982_v10 }
0x109b   :  { %24861 = vpow2.f32 %v9764_v29  ;;  %v9932_v8 = vand.u32 4294901760, %v26214_v56 }
0x109c   :  { %v26180_v22 = vpack.c.bf16 %v9990_v24, %v9983_v16 }
0x10a1   :  { %v24860_v59 = vpop.eup %24859 }
0x10a2   :  { %v9766_v4 = vadd.f32 1.0, %v24860_v59 }
0x10a4   :  { %24863 = vrcp.f32 %v9766_v4 }
0x10a5   :  { %v24862_v32 = vpop.eup %24861 }
0x10a6   :  { %v9767_v10 = vadd.f32 1.0, %v24862_v32 }
0x10a8   :  { %24865 = vrcp.f32 %v9767_v10 }
0x10ae   :  { %v24864_v41 = vpop.eup %24863 }
0x10af   :  { %v9772_v24 = vmul.f32 %v24864_v41, %v26102_v28  ;;  %v9925_v41 = vand.u32 4294901760, %v26209_v54 }
0x10b2   :  { %v24866_v15 = vpop.eup %24865 }
0x10b3   :  { %v9773_v4 = vmul.f32 %v24866_v15, %v26117_v36  ;;  %v9926_v15 = vsub.f32 %v26209_v54, %v9925_v41  ;;  %v9933_v36 = vsub.f32 %v26214_v56, %v9932_v8 }
0x10b5   :  { %v9927_v34 = vand.u32 4294901760, %v9926_v15 }
0x1105   :  { %v9779_v16 = vpop.permute.xlu0 %9778 }
0x1106   :  { %v9781_v43 = vpop.permute.xlu1 %9780 }
0x1107   :  { %v9786_v11 = vsel %vm111_vm0, %v9779_v16, %v9781_v43 }
0x1108   :  { %v9790_v29 = vmul.f32 %v9786_v11, %v9772_v24 }
0x1109   :  { %v9783_v59 = vpop.permute.xlu0 %9782 }
0x110a   :  { %v9806_v28 = vsel %vm9804_vm6, %v9790_v29, 0  ;;  %v9785_v32 = vpop.permute.xlu1 %9784 }
0x110b   :  { %v26218_v10 = vand.u32 4294901760, %v9806_v28  ;;  %v9787_v43 = vsel %vm111_vm0, %v9783_v59, %v9785_v32 }
0x110c   :  { %v9791_v30 = vmul.f32 %v9787_v43, %v9773_v4  ;;  %v9934_v4 = vand.u32 4294901760, %v9933_v36 }
0x110d   :  { %v9889_v16 = vsub.f32 %v9806_v28, %v26218_v10 }
0x110e   :  { %v9809_v18 = vsel %vm9804_vm6, %v9791_v30, 0  ;;  %v23888_v30 = vpack.c.bf16 %v9934_v4, %v9927_v34  ;;  %v23964_v34 = vpack.c.bf16 %v9946_v0, %v9939_v51 }
0x110f   :  { %v26225_v2 = vand.u32 4294901760, %v9809_v18  ;;  %v9890_v24 = vand.u32 4294901760, %v9889_v16 }
0x1111   :  { %v9899_v11 = vsub.f32 %v9809_v18, %v26225_v2  ;;  %v9891_v29 = vsub.f32 %v9889_v16, %v9890_v24 }
0x1113   :  { %v9892_v59 = vand.u32 4294901760, %v9891_v29  ;;  %v9900_v32 = vand.u32 4294901760, %v9899_v11 }
0x1115   :  { %22714 = vmatprep.mubr.f32.mxu0 %v9892_v59  ;;  %v9901_v28 = vsub.f32 %v9899_v11, %v9900_v32 }
0x1117   :  { %v9902_v43 = vand.u32 4294901760, %v9901_v28 }
0x1119   :  { %22715 = vmatmul.mubr.f32.vlgmr.msra.gmra.mrb[30].mxu0 %v9902_v43 }
0x111a   :  { %23887 = vmatpush3.bf16.msra.mxu0 %v26122_v21  ;;  %22741 = vmatprep.mubr.f32.mxu0 %v26218_v10  ;;  %v23912_v21 = vpack.c.bf16 %v26214_v56, %v26209_v54 }
0x111b   :  { %23889 = vmatprep.subr.bf16.mxu0 %v23888_v30 }
0x111e   :  { %23891 = vmatpush3.bf16.msra.mxu0 %v23888_v30 }
0x111f   :  { %23893 = vmatprep.subr.bf16.mxu0 %v26154_v50 }
0x1122   :  { %23895 = vmatpush3.bf16.msra.mxu0 %v26154_v50  ;;  %v23956_v50 = vpack.c.bf16 %v9918_v60, %v9911_v27  ;;  %v27350_v27 = vand.u32 4294901760, %v26168_v63  ;;  %v26340_v63 = vsub.f32 %v21342_v25, %v10478_v44 }
0x1123   :  { %23897 = vmatprep.subr.bf16.mxu0 %v26158_v58 }
0x1124   :  { %v23976_v60 = vpack.c.bf16 %v27350_v27, %v9981_v33  ;;  %v26342_v33 = vsub.f32 %v21344_v42, %v10482_v48 }
0x1126   :  { %23899 = vmatpush3.bf16.msra.mxu0 %v26158_v58  ;;  %v23960_v58 = vpack.c.bf16 %v9932_v8, %v9925_v41  ;;  %v10579_v41 = vand.u32 4294901760, %v26340_v63  ;;  %v10591_v8 = vand.u32 4294901760, %v26342_v33 }
0x1127   :  { %23901 = vmatprep.subr.bf16.mxu0 %v26172_v35 }
0x1128   :  { %v10592_v4 = vsub.f32 %v26342_v33, %v10591_v8  ;;  %v24038_v48 = vpack.c.bf16 %v10591_v8, %v10579_v41 }
0x112a   :  { %23903 = vmatpush3.bf16.msra.mxu0 %v26172_v35  ;;  %v21347_v35 = vld [vmem:[%s27337_s3 + $0x68] sm:$0xff] }
0x112b   :  { %23905 = vmatprep.subr.bf16.mxu0 %v26180_v22 }
0x112e   :  { %23907 = vmatpush3.bf16.msra.mxu0 %v26180_v22  ;;  %v21349_v22 = vld [vmem:[%s27337_s3 + $0x78] sm:$0xff] }
0x112f   :  { %23909 = vmatprep.subr.bf16.mxu0 %v26184_v26 }
0x1131   :  { %22742 = vmatmul.mubr.f32.vlgmr.msra.gmra.mrb[30].mxu0 %v26225_v2 }
0x1132   :  { %23911 = vmatpush3.bf16.msra.mxu0 %v26184_v26  ;;  %22768 = vmatprep.mubr.f32.mxu0 %v9889_v16  ;;  %v10484_v26 = vand.u32 4294901760, %v21347_v35 }
0x1133   :  { %23913 = vmatprep.subr.bf16.mxu0 %v23912_v21 }
0x1134   :  { %v26364_v18 = vsub.f32 %v21347_v35, %v10484_v26 }
0x1136   :  { %23915 = vmatpush3.bf16.msra.mxu0 %v23912_v21  ;;  %v10597_v28 = vand.u32 4294901760, %v26364_v18 }
0x1137   :  { %23917 = vmatprep.subr.bf16.mxu0 %v26188_v53 }
0x113a   :  { %23919 = vmatpush3.bf16.msra.mxu0 %v26188_v53  ;;  %v10488_v53 = vand.u32 4294901760, %v21349_v22 }
0x113b   :  { %23921 = vmatprep.subr.bf16.mxu0 %v26192_v40 }
0x113c   :  { %v26362_v16 = vpack.c.bf16 %v10488_v53, %v10484_v26 }
0x113e   :  { %23923 = vmatpush3.bf16.msra.mxu0 %v26192_v40  ;;  %v21346_v40 = vld [vmem:[%s27337_s3 + $0x60] sm:$0xff] }
0x113f   :  { %23925 = vmatprep.subr.bf16.mxu0 %v26196_v45  ;;  %v10486_v56 = vand.u32 4294901760, %v21346_v40 }
0x1141   :  { %v26371_v36 = vsub.f32 %v21346_v40, %v10486_v56 }
0x1142   :  { %23927 = vmatpush3.bf16.msra.mxu0 %v26196_v45  ;;  %v21348_v45 = vld [vmem:[%s27337_s3 + $0x70] sm:$0xff] }
0x1143   :  { %23929 = vmatprep.subr.bf16.mxu0 %v26200_v12  ;;  %v10603_v21 = vand.u32 4294901760, %v26371_v36 }
0x1146   :  { %23931 = vmatpush3.bf16.msra.mxu0 %v26200_v12 }
0x1147   :  { %23933 = vmatprep.subr.bf16.mxu0 %v26049_v3 }
0x1149   :  { %22769 = vmatmul.mubr.f32.vlgmr.msra.gmra.mrb[30].mxu0 %v9899_v11 }
0x114a   :  { %23935 = vmatpush3.bf16.msra.mxu0 %v26049_v3  ;;  %22795 = vmatprep.mubr.f32.mxu0 %v9890_v24 }
0x114b   :  { %23937 = vmatprep.subr.bf16.mxu0 %v26055_v47 }
0x114e   :  { %23939 = vmatpush3.bf16.msra.mxu0 %v26055_v47 }
0x114f   :  { %23941 = vmatprep.subr.bf16.mxu0 %v26067_v55 }
0x1152   :  { %23943 = vmatpush3.bf16.msra.mxu0 %v26067_v55 }
0x1153   :  { %23945 = vmatprep.subr.bf16.mxu0 %v26077_v20 }
0x1156   :  { %23947 = vmatpush3.bf16.msra.mxu0 %v26077_v20 }
0x1157   :  { %23949 = vmatprep.subr.bf16.mxu0 %v26087_v6 }
0x115a   :  { %23951 = vmatpush3.bf16.msra.mxu0 %v26087_v6 }
0x115b   :  { %23953 = vmatprep.subr.bf16.mxu0 %v26107_v31 }
0x115e   :  { %23955 = vmatpush3.bf16.msra.mxu0 %v26107_v31 }
0x115f   :  { %23957 = vmatprep.subr.bf16.mxu0 %v23956_v50 }
0x1161   :  { %22796 = vmatmul.mubr.f32.vlgmr.msra.gmra.mrb[30].mxu0 %v9900_v32  ;;  %v10580_v32 = vsub.f32 %v26340_v63, %v10579_v41 }
0x1162   :  { %23959 = vmatpush3.bf16.msra.mxu0 %v23956_v50  ;;  %22822 = vmatprep.mubr.f32.mxu0 %v26218_v10 }
0x1163   :  { %23961 = vmatprep.subr.bf16.mxu0 %v23960_v58 }
0x1166   :  { %23963 = vmatpush3.bf16.msra.mxu0 %v23960_v58  ;;  %v10581_v58 = vand.u32 4294901760, %v10580_v32 }
0x1167   :  { %23965 = vmatprep.subr.bf16.mxu0 %v23964_v34 }
0x116a   :  { %23967 = vmatpush3.bf16.msra.mxu0 %v23964_v34  ;;  %v10593_v34 = vand.u32 4294901760, %v10592_v4  ;;  %v24921_v4 = vld [vmem:[#allocation7] sm:$0xff] }
0x116b   :  { %23969 = vmatprep.subr.bf16.mxu0 %v23968_v52 }
0x116e   :  { %23971 = vmatpush3.bf16.msra.mxu0 %v23968_v52  ;;  %v10598_v52 = vsub.f32 %v26364_v18, %v10597_v28 }
0x116f   :  { %23973 = vmatprep.subr.bf16.mxu0 %v23972_v13 }
0x1172   :  { %23975 = vmatpush3.bf16.msra.mxu0 %v23972_v13 }
0x1173   :  { %23977 = vmatprep.subr.bf16.mxu0 %v23976_v60 }
0x1176   :  { %23979 = vmatpush3.bf16.msra.mxu0 %v23976_v60  ;;  %v10604_v60 = vsub.f32 %v26371_v36, %v10603_v21 }
0x1177   :  { %23981 = vmatprep.subr.bf16.mxu0 %v26049_v3 }
0x1179   :  { %22823 = vmatmul.mubr.f32.vlgmr.msra.gmra.mrb[30].mxu0 %v26225_v2 }
0x117a   :  { %23983 = vmatpush3.bf16.msra.mxu0 %v26049_v3  ;;  %22849 = vmatprep.mubr.f32.mxu0 %v26218_v10  ;;  %v27351_v3 = vmov 0.0   ;;  %v10490_v10 = vand.u32 4294901760, %v21348_v45 }
0x117b   :  { %23985 = vmatprep.subr.bf16.mxu0 %v26055_v47 }
0x117c   :  { %v26369_v15 = vpack.c.bf16 %v10490_v10, %v10486_v56  ;;  %v26373_v11 = vsub.f32 %v21348_v45, %v10490_v10 }
0x117e   :  { %23987 = vmatpush3.bf16.msra.mxu0 %v26055_v47  ;;  %v10615_v50 = vand.u32 4294901760, %v26373_v11  ;;  %v24026_v42 = vpack.c.bf16 %v26373_v11, %v26371_v36 }
0x117f   :  { %23989 = vmatprep.subr.bf16.mxu0 %v26067_v55 }
0x1182   :  { %23991 = vmatpush3.bf16.msra.mxu0 %v26067_v55 }
0x1183   :  { %23993 = vmatprep.subr.bf16.mxu0 %v26077_v20 }
0x1186   :  { %23995 = vmatpush3.bf16.msra.mxu0 %v26077_v20 }
0x1187   :  { %23997 = vmatprep.subr.bf16.mxu0 %v26087_v6 }
0x118a   :  { %23999 = vmatpush3.bf16.msra.mxu0 %v26087_v6 }
0x118b   :  { %24001 = vmatprep.subr.bf16.mxu0 %v26107_v31 }
0x118e   :  { %24003 = vmatpush3.bf16.msra.mxu0 %v26107_v31 }
0x118f   :  { %22912 = vmatprep.subr.mxu0 %v27351_v3 }
0x1191   :  { %22850 = vmatmul.mubr.f32.vlgmr.msra.gmra.mrb[30].mxu0 %v26225_v2  ;;  %v26366_v2 = vsub.f32 %v21349_v22, %v10488_v53  ;;  %v24042_v22 = vpack.c.bf16 %v10615_v50, %v10603_v21 }
0x1192   :  { %22914 = vmatprep.mubr.msk.f32.mxu0 %vm25075_vm1, %v27351_v3 }
0x1193   :  { %v10609_v30 = vand.u32 4294901760, %v26366_v2  ;;  %v24024_v25 = vpack.c.bf16 %v26366_v2, %v26364_v18 }
0x1195   :  { %v10610_v27 = vsub.f32 %v26366_v2, %v10609_v30  ;;  %v24040_v35 = vpack.c.bf16 %v10609_v30, %v10597_v28  ;;  %v24922_v30 = vld [vmem:[#allocation5] sm:$0xff] }
0x1264   :  { %v22851_v47 = vpop.f32.mrb[30].mxu0 }
0x1265   :  { %v26309_v55 = vadd.f32 %v25972_v37, %v22851_v47  ;;  %v10433_v20 = vpop.f32.mrb[31].mxu0  ;;  %v21343_v37 = vld [vmem:[%s27337_s3 + $0x48] sm:$0xff]  ;;  %v10616_v47 = vsub.f32 %v26373_v11, %v10615_v50 }
0x1266   :  { %v26312_v46 = vadd.f32 %v25872_v14, %v10433_v20  ;;  %v21345_v14 = vld [vmem:[%s27337_s3 + $0x58] sm:$0xff]  ;;  %v10476_v0 = vand.u32 4294901760, %v21343_v37  ;;  %v24014_v20 = vpack.c.bf16 %v10593_v34, %v10581_v58 }
0x1267   :  { %v10446_v6 = vmul.f32 %v26309_v55, %v26309_v55  ;;  %v10480_v23 = vand.u32 4294901760, %v21345_v14 }
0x1268   :  { %v10445_v31 = vmul.f32 %v26312_v46, %v26312_v46  ;;  %v26334_v57 = vsub.f32 %v21343_v37, %v10476_v0 }
0x1269   :  { %v10450_v38 = vsel %vm111_vm0, %v10446_v6, 0.0  ;;  %v26332_v49 = vpack.c.bf16 %v10480_v23, %v10476_v0  ;;  %v26336_v19 = vsub.f32 %v21345_v14, %v10480_v23  ;;  %v10599_v6 = vand.u32 4294901760, %v10598_v52 }
0x126a   :  { %10451 = vadd.xlane.f32.xlu1 %v10450_v38  ;;  %v10447_v51 = vsel %vm111_vm0, %v10445_v31, 0.0  ;;  %v10573_v12 = vand.u32 4294901760, %v26334_v57  ;;  %v10611_v31 = vand.u32 4294901760, %v10610_v27  ;;  %v10605_v38 = vand.u32 4294901760, %v10604_v60 }
0x126b   :  { %10448 = vadd.xlane.f32.xlu0 %v10447_v51  ;;  %24005 = vmatprep.subr.bf16.mxu1 %v26332_v49  ;;  %v10585_v54 = vand.u32 4294901760, %v26336_v19  ;;  %v10617_v51 = vand.u32 4294901760, %v10616_v47  ;;  %v24020_v0 = vpack.c.bf16 %v26336_v19, %v26334_v57  ;;  %v24022_v23 = vpack.c.bf16 %v26342_v33, %v26340_v63 }
0x126c   :  { %24007 = vmatpush1.bf16.msra.mxu1 %v26338_v61  ;;  %v10574_v24 = vsub.f32 %v26334_v57, %v10573_v12  ;;  %v24016_v37 = vpack.c.bf16 %v10611_v31, %v10599_v6 }
0x126d   :  { %v10586_v29 = vsub.f32 %v26336_v19, %v10585_v54  ;;  %24009 = vmatprep.subr.bf16.mxu1 %v26362_v16  ;;  %v24018_v14 = vpack.c.bf16 %v10617_v51, %v10605_v38  ;;  %v24036_v44 = vpack.c.bf16 %v10585_v54, %v10573_v12 }
0x126e   :  { %v10575_v59 = vand.u32 4294901760, %v10574_v24 }
0x126f   :  { %v10587_v43 = vand.u32 4294901760, %v10586_v29 }
0x1270   :  { %24011 = vmatpush1.bf16.msra.mxu1 %v26369_v15 }
0x1271   :  { %v24012_v13 = vpack.c.bf16 %v10587_v43, %v10575_v59 }
0x1273   :  { %24013 = vmatprep.subr.bf16.mxu1 %v24012_v13 }
0x12f7   :  { %v10452_v26 = vpop.xlane.xlu1 %10451 }
0x12f8   :  { %v10454_v53 = vmul.f32 0.03125, %v10452_v26  ;;  %v10449_v40 = vpop.xlane.xlu0 %10448 }
0x12f9   :  { %v10453_v45 = vmul.f32 0.03125, %v10449_v40 }
0x12fa   :  { %v10456_v56 = vadd.f32 1e-05, %v10454_v53 }
0x12fb   :  { %v10455_v10 = vadd.f32 1e-05, %v10453_v45 }
0x12fc   :  { %24867 = vrsqrt.f32 %v10456_v56 }
0x12fd   :  { %24869 = vrsqrt.f32 %v10455_v10 }
0x1306   :  { %v24868_v57 = vpop.eup %24867 }
0x1307   :  { %v24870_v19 = vpop.eup %24869  ;;  %v10460_v63 = vmul.f32 %v24868_v57, %v26309_v55 }
0x1308   :  { %v10459_v33 = vmul.f32 %v24870_v19, %v26312_v46 }
0x1309   :  { %v10474_v18 = vsel %vm111_vm0, %v10460_v63, 0 }
0x130a   :  { %v10471_v12 = vsel %vm111_vm0, %v10459_v33, 0  ;;  %v10560_v54 = vand.u32 4294901760, %v10474_v18 }
0x130b   :  { %v10549_v41 = vand.u32 4294901760, %v10471_v12 }
0x130c   :  { %v10561_v8 = vsub.f32 %v10474_v18, %v10560_v54 }
0x130d   :  { %v10550_v2 = vsub.f32 %v10471_v12, %v10549_v41 }
0x130e   :  { %v10562_v36 = vand.u32 4294901760, %v10561_v8 }
0x130f   :  { %v10551_v24 = vand.u32 4294901760, %v10550_v2 }
0x1310   :  { %v10563_v59 = vsub.f32 %v10561_v8, %v10562_v36 }
0x1311   :  { %v10552_v11 = vsub.f32 %v10550_v2, %v10551_v24 }
0x1312   :  { %v10564_v32 = vand.u32 4294901760, %v10563_v59 }
0x1313   :  { %v10553_v29 = vand.u32 4294901760, %v10552_v11 }
0x1315   :  { %10554 = vmatmul.mubr.f32.vlgmr.msra.gmra.mrb[34].mxu1 %v10553_v29 }
0x1316   :  { %24015 = vmatpush1.bf16.msra.mxu1 %v24014_v20  ;;  %10559 = vmatprep.mubr.f32.mxu1 %v27351_v3 }
0x1317   :  { %24017 = vmatprep.subr.bf16.mxu1 %v24016_v37 }
0x1319   :  { %10565 = vmatmul.mubr.f32.gmra.mrb[36].mxu1 %v10564_v32 }
0x131a   :  { %24019 = vmatpush1.bf16.msra.mxu1 %v24018_v14  ;;  %10675 = vmatprep.mubr.f32.mxu1 %v27351_v3 }
0x131b   :  { %24021 = vmatprep.subr.bf16.mxu1 %v24020_v0 }
0x131d   :  { %10677 = vmatmul.mubr.f32.vlgmr.msra.gmra.mrb[34].mxu1 %v10549_v41 }
0x131e   :  { %24023 = vmatpush1.bf16.msra.mxu1 %v24022_v23  ;;  %10682 = vmatprep.mubr.f32.mxu1 %v27351_v3 }
0x131f   :  { %24025 = vmatprep.subr.bf16.mxu1 %v24024_v25 }
0x1321   :  { %10684 = vmatmul.mubr.f32.gmra.mrb[36].mxu1 %v10560_v54 }
0x1322   :  { %24027 = vmatpush1.bf16.msra.mxu1 %v24026_v42  ;;  %10770 = vmatprep.mubr.f32.mxu1 %v27351_v3 }
0x1323   :  { %24029 = vmatprep.subr.bf16.mxu1 %v26332_v49 }
0x1325   :  { %10773 = vmatmul.mubr.f32.vlgmr.msra.gmra.mrb[34].mxu1 %v10550_v2 }
0x1326   :  { %24031 = vmatpush1.bf16.msra.mxu1 %v26338_v61  ;;  %10778 = vmatprep.mubr.f32.mxu1 %v27351_v3 }
0x1327   :  { %24033 = vmatprep.subr.bf16.mxu1 %v26362_v16 }
0x1329   :  { %10781 = vmatmul.mubr.f32.gmra.mrb[36].mxu1 %v10561_v8 }
0x132a   :  { %24035 = vmatpush1.bf16.msra.mxu1 %v26369_v15  ;;  %10859 = vmatprep.mubr.f32.mxu1 %v27351_v3 }
0x132b   :  { %24037 = vmatprep.subr.bf16.mxu1 %v24036_v44 }
0x132d   :  { %10863 = vmatmul.mubr.f32.vlgmr.msra.gmra.mrb[34].mxu1 %v10551_v24 }
0x132e   :  { %24039 = vmatpush1.bf16.msra.mxu1 %v24038_v48  ;;  %10868 = vmatprep.mubr.f32.mxu1 %v27351_v3 }
0x132f   :  { %24041 = vmatprep.subr.bf16.mxu1 %v24040_v35 }
0x1331   :  { %10872 = vmatmul.mubr.f32.gmra.mrb[36].mxu1 %v10562_v36 }
0x1332   :  { %24043 = vmatpush1.bf16.msra.mxu1 %v24042_v22  ;;  %10966 = vmatprep.mubr.f32.mxu1 %v27351_v3 }
0x1333   :  { %24045 = vmatprep.subr.bf16.mxu1 %v26332_v49 }
0x1335   :  { %10968 = vmatmul.mubr.f32.vlgmr.msra.gmra.mrb[34].mxu1 %v10549_v41 }
0x1336   :  { %24047 = vmatpush1.bf16.msra.mxu1 %v26338_v61  ;;  %10973 = vmatprep.mubr.f32.mxu1 %v27351_v3 }
0x1337   :  { %24049 = vmatprep.subr.bf16.mxu1 %v26362_v16 }
0x1339   :  { %10975 = vmatmul.mubr.f32.gmra.mrb[36].mxu1 %v10560_v54 }
0x133a   :  { %24051 = vmatpush1.bf16.msra.mxu1 %v26369_v15  ;;  %11053 = vmatprep.mubr.f32.mxu1 %v27351_v3 }
0x133b   :  { %22852 = vmatprep.subr.mxu1 %v27351_v3 }
0x133d   :  { %11055 = vmatmul.mubr.f32.vlgmr.msra.gmra.mrb[34].mxu1 %v10549_v41 }
0x133e   :  { %11060 = vmatprep.mubr.f32.mxu1 %v27351_v3 }
0x1341   :  { %11062 = vmatmul.mubr.f32.gmra.mrb[36].mxu1 %v10560_v54 }
0x1342   :  { %22854 = vmatprep.mubr.msk.f32.mxu1 %vm25075_vm1, %v27351_v3 }
0x1410   :  { %v26422_v49 = vpop.f32.mrb[34].mxu1 }
0x1411   :  { %v11058_v61 = vpop.f32.mrb[35].mxu1  ;;  %v11070_v16 = vmul.f32 %v26422_v49, %v25344_v1  ;;  %v11068_v21 = vmul.f32 %v24922_v30, %v26422_v49  ;;  %v11082_v58 = vmul.f32 %v26422_v49, %v25361_v39 }
0x1412   :  { %v11084_v28 = vmul.f32 %v24921_v4, %v11058_v61 }
0x1413   :  { %11074 = vrot.lane.b32.xlu1 %v11070_v16, %s25074_s15 }
0x1414   :  { %11088 = vrot.lane.b32.xlu0 %v11084_v28, %s25074_s15  ;;  %v26428_v15 = vpop.f32.mrb[36].mxu1 }
0x1415   :  { %v26430_v43 = vpop.f32.mrb[37].mxu1 }
0x1485   :  { %v11075_v50 = vpop.permute.xlu1 %11074 }
0x1486   :  { %v11080_v34 = vadd.f32 %v11075_v50, %v11068_v21  ;;  %v11089_v52 = vpop.permute.xlu0 %11088 }
0x1487   :  { %v11094_v1 = vadd.f32 %v11089_v52, %v11082_v58 }
0x1488   :  { %12020 = vrot.lane.b32.xlu1 %v11080_v34, %s25081_s2  ;;  %v11105_v13 = vsel %vm784_vm2, %v11080_v34, 0 }
0x1489   :  { %11102 = vrot.lane.b32.xlu0 %v11094_v1, %s25073_s14  ;;  %v26443_v39 = vand.u32 4294901760, %v11105_v13 }
0x148b   :  { %v11176_v27 = vsub.f32 %v11105_v13, %v26443_v39 }
0x148c   :  { %12938 = vrot.lane.b32.xlu1 %v11080_v34, %s25078_s20 }
0x148d   :  { %12022 = vrot.lane.b32.xlu0 %v11094_v1, %s25077_s19  ;;  %v11177_v60 = vand.u32 4294901760, %v11176_v27 }
0x148f   :  { %v11178_v51 = vsub.f32 %v11176_v27, %v11177_v60 }
0x1490   :  { %13856 = vrot.lane.b32.xlu1 %v11080_v34, %s25080_s4 }
0x1491   :  { %12940 = vrot.lane.b32.xlu0 %v11094_v1, %s25079_s21  ;;  %v11179_v44 = vand.u32 4294901760, %v11178_v51 }
0x1495   :  { %13858 = vrot.lane.b32.xlu0 %v11094_v1, %s25082_s12 }
0x14fa   :  { %v12021_v47 = vpop.permute.xlu1 %12020 }
0x14fb   :  { %v12024_v20 = vsel %vm784_vm2, %v12021_v47, 0  ;;  %v11103_v6 = vpop.permute.xlu0 %11102 }
0x14fc   :  { %v26447_v31 = vand.u32 4294901760, %v12024_v20  ;;  %v11107_v38 = vsel %vm784_vm2, %v11103_v6, 0 }
0x14fd   :  { %v11110_v37 = vand.u32 4294901760, %v11107_v38 }
0x14fe   :  { %v12095_v14 = vsub.f32 %v12024_v20, %v26447_v31  ;;  %v12939_v19 = vpop.permute.xlu1 %12938 }
0x14ff   :  { %v11187_v0 = vsub.f32 %v11107_v38, %v11110_v37  ;;  %22853 = vmatpush3.xpose.msra.mxu1 %v11110_v37  ;;  %v12023_v23 = vpop.permute.xlu0 %12022  ;;  %v12942_v33 = vsel %vm784_vm2, %v12939_v19, 0 }
0x1500   :  { %v12096_v25 = vand.u32 4294901760, %v12095_v14  ;;  %v12026_v42 = vsel %vm784_vm2, %v12023_v23, 0  ;;  %22857 = vmatprep.subr.mxu1 %v27351_v3  ;;  %v13012_v12 = vand.u32 4294901760, %v12942_v33 }
0x1501   :  { %v11188_v48 = vand.u32 4294901760, %v11187_v0  ;;  %v12029_v35 = vand.u32 4294901760, %v12026_v42 }
0x1502   :  { %v12097_v22 = vsub.f32 %v12095_v14, %v12096_v25  ;;  %22855 = vmatmul.mubr.f32.vlgmr.msra.gmra.mrb[38].mxu1 %v11179_v44  ;;  %v13013_v41 = vsub.f32 %v12942_v33, %v13012_v12  ;;  %v13857_v32 = vpop.permute.xlu1 %13856 }
0x1503   :  { %v11189_v26 = vsub.f32 %v11187_v0, %v11188_v48  ;;  %v12106_v53 = vsub.f32 %v12026_v42, %v12029_v35  ;;  %22913 = vmatpush3.xpose.msra.mxu0 %v12029_v35  ;;  %22859 = vmatprep.mubr.msk.f32.mxu1 %vm25075_vm1, %v27351_v3  ;;  %v12941_v63 = vpop.permute.xlu0 %12940  ;;  %v13860_v16 = vsel %vm784_vm2, %v13857_v32, 0  ;;  %v11071_v32 = vmul.f32 %v26428_v15, %v25538_v5 }
0x1504   :  { %v12098_v40 = vand.u32 4294901760, %v12097_v22  ;;  %22917 = vmatprep.subr.mxu0 %v27351_v3  ;;  %v12944_v18 = vsel %vm784_vm2, %v12941_v63, 0  ;;  %v13014_v2 = vand.u32 4294901760, %v13013_v41  ;;  %v13930_v28 = vand.u32 4294901760, %v13860_v16 }
0x1505   :  { %v11190_v45 = vand.u32 4294901760, %v11189_v26  ;;  %v12107_v56 = vand.u32 4294901760, %v12106_v53  ;;  %v12947_v54 = vand.u32 4294901760, %v12944_v18 }
0x1506   :  { %22915 = vmatmul.mubr.f32.vlgmr.msra.gmra.mrb[32].mxu0 %v12098_v40  ;;  %v13015_v36 = vsub.f32 %v13013_v41, %v13014_v2  ;;  %v13931_v21 = vsub.f32 %v13860_v16, %v13930_v28 }
0x1507   :  { %v12108_v10 = vsub.f32 %v12106_v53, %v12107_v56  ;;  %22858 = vmatpush3.xpose.msra.mxu1 %v11190_v45  ;;  %22919 = vmatprep.mubr.msk.f32.mxu0 %vm25075_vm1, %v27351_v3  ;;  %v13024_v8 = vsub.f32 %v12944_v18, %v12947_v54  ;;  %v13859_v61 = vpop.permute.xlu0 %13858 }
0x1508   :  { %22862 = vmatprep.subr.mxu1 %v27351_v3  ;;  %v13016_v29 = vand.u32 4294901760, %v13015_v36  ;;  %v13862_v4 = vsel %vm784_vm2, %v13859_v61, 0  ;;  %v13932_v58 = vand.u32 4294901760, %v13931_v21 }
0x1509   :  { %v12109_v57 = vand.u32 4294901760, %v12108_v10  ;;  %v13025_v24 = vand.u32 4294901760, %v13024_v8  ;;  %v13865_v30 = vand.u32 4294901760, %v13862_v4 }
0x150a   :  { %22860 = vmatmul.mubr.f32.vlgmr.msra.gmra.mrb[38].mxu1 %v26443_v39  ;;  %v13933_v52 = vsub.f32 %v13931_v21, %v13932_v58 }
0x150b   :  { %22863 = vmatpush3.xpose.msra.mxu1 %v11187_v0  ;;  %22918 = vmatpush3.xpose.msra.mxu0 %v12109_v57  ;;  %v13026_v11 = vsub.f32 %v13024_v8, %v13025_v24  ;;  %v13942_v50 = vsub.f32 %v13862_v4, %v13865_v30 }
0x150c   :  { %22922 = vmatprep.subr.mxu0 %v27351_v3  ;;  %22864 = vmatprep.mubr.msk.f32.mxu1 %vm25075_vm1, %v27351_v3  ;;  %v13934_v13 = vand.u32 4294901760, %v13933_v52 }
0x150d   :  { %22867 = vmatprep.subr.mxu1 %v27351_v3  ;;  %v13027_v59 = vand.u32 4294901760, %v13026_v11  ;;  %v13943_v34 = vand.u32 4294901760, %v13942_v50 }
0x150e   :  { %22920 = vmatmul.mubr.f32.vlgmr.msra.gmra.mrb[32].mxu0 %v26447_v31 }
0x150f   :  { %22923 = vmatpush3.xpose.msra.mxu0 %v12106_v53  ;;  %22924 = vmatprep.mubr.msk.f32.mxu0 %vm25075_vm1, %v27351_v3  ;;  %v13944_v1 = vsub.f32 %v13942_v50, %v13943_v34 }
0x1510   :  { %22927 = vmatprep.subr.mxu0 %v27351_v3 }
0x1512   :  { %22865 = vmatmul.mubr.f32.vlgmr.msra.gmra.mrb[38].mxu1 %v11176_v27  ;;  %v27352_v27 = vmov 0.0|0.0  }
0x1513   :  { %22868 = vmatpush3.xpose.msra.mxu1 %v11110_v37  ;;  %22869 = vmatprep.mubr.msk.f32.mxu1 %vm25075_vm1, %v27351_v3 }
0x1514   :  { %22872 = vmatprep.subr.mxu1 %v27351_v3 }
0x1516   :  { %22925 = vmatmul.mubr.f32.vlgmr.msra.gmra.mrb[32].mxu0 %v12095_v14 }
0x1517   :  { %22928 = vmatpush3.xpose.msra.mxu0 %v12029_v35  ;;  %22929 = vmatprep.mubr.msk.f32.mxu0 %vm25075_vm1, %v27351_v3 }
0x1518   :  { %22932 = vmatprep.subr.mxu0 %v27351_v3 }
0x151a   :  { %22870 = vmatmul.mubr.f32.vlgmr.msra.gmra.mrb[38].mxu1 %v11177_v60 }
0x151b   :  { %22873 = vmatpush3.xpose.msra.mxu1 %v11188_v48  ;;  %22874 = vmatprep.mubr.msk.f32.mxu1 %vm25075_vm1, %v27351_v3 }
0x151c   :  { %22877 = vmatprep.subr.mxu1 %v27351_v3 }
0x151e   :  { %22930 = vmatmul.mubr.f32.vlgmr.msra.gmra.mrb[32].mxu0 %v12096_v25 }
0x151f   :  { %22933 = vmatpush3.xpose.msra.mxu0 %v12107_v56  ;;  %22934 = vmatprep.mubr.msk.f32.mxu0 %vm25075_vm1, %v27351_v3 }
0x1520   :  { %22937 = vmatprep.subr.mxu0 %v27351_v3 }
0x1522   :  { %22875 = vmatmul.mubr.f32.vlgmr.msra.gmra.mrb[38].mxu1 %v26443_v39 }
0x1523   :  { %22878 = vmatpush3.xpose.msra.mxu1 %v11110_v37  ;;  %22879 = vmatprep.mubr.msk.f32.mxu1 %vm25075_vm1, %v27351_v3 }
0x1524   :  { %22882 = vmatprep.subr.mxu1 %v27351_v3 }
0x1526   :  { %22935 = vmatmul.mubr.f32.vlgmr.msra.gmra.mrb[32].mxu0 %v26447_v31 }
0x1527   :  { %22938 = vmatpush3.xpose.msra.mxu0 %v12029_v35  ;;  %22939 = vmatprep.mubr.msk.f32.mxu0 %vm25075_vm1, %v27351_v3 }
0x1528   :  { %22972 = vmatprep.subr.mxu0 %v27351_v3 }
0x152a   :  { %22880 = vmatmul.mubr.f32.vlgmr.msra.gmra.mrb[38].mxu1 %v26443_v39  ;;  %v13945_v39 = vand.u32 4294901760, %v13944_v1 }
0x152b   :  { %22884 = vmatprep.mubr.msk.f32.mxu1 %vm25075_vm1, %v27351_v3 }
0x152e   :  { %22940 = vmatmul.mubr.f32.vlgmr.msra.gmra.mrb[32].mxu0 %v26447_v31 }
0x152f   :  { %22973 = vmatpush3.xpose.msra.mxu0 %v12947_v54  ;;  %22974 = vmatprep.mubr.msk.f32.mxu0 %vm25075_vm1, %v27351_v3 }
0x1530   :  { %22977 = vmatprep.subr.mxu0 %v27351_v3 }
0x1532   :  { %22975 = vmatmul.mubr.f32.vlgmr.msra.gmra.mrb[34].mxu0 %v13016_v29  ;;  %v24923_v29 = vld [vmem:[#allocation7 + $0x8] sm:$0xff] }
0x1533   :  { %22978 = vmatpush3.xpose.msra.mxu0 %v13027_v59  ;;  %22979 = vmatprep.mubr.msk.f32.mxu0 %vm25075_vm1, %v27351_v3  ;;  %v11085_v59 = vmul.f32 %v24923_v29, %v26430_v43 }
0x1534   :  { %22982 = vmatprep.subr.mxu0 %v27351_v3 }
0x153a   :  { %22980 = vmatmul.mubr.f32.vlgmr.msra.gmra.mrb[34].mxu0 %v13012_v12 }
0x153b   :  { %22983 = vmatpush3.xpose.msra.mxu0 %v13024_v8  ;;  %22984 = vmatprep.mubr.msk.f32.mxu0 %vm25075_vm1, %v27351_v3 }
0x153c   :  { %22987 = vmatprep.subr.mxu0 %v27351_v3 }
0x1542   :  { %22985 = vmatmul.mubr.f32.vlgmr.msra.gmra.mrb[34].mxu0 %v13013_v41 }
0x1543   :  { %22988 = vmatpush3.xpose.msra.mxu0 %v12947_v54  ;;  %22989 = vmatprep.mubr.msk.f32.mxu0 %vm25075_vm1, %v27351_v3 }
0x1544   :  { %22992 = vmatprep.subr.mxu0 %v27351_v3 }
0x154a   :  { %22990 = vmatmul.mubr.f32.vlgmr.msra.gmra.mrb[34].mxu0 %v13014_v2 }
0x154b   :  { %22993 = vmatpush3.xpose.msra.mxu0 %v13025_v24  ;;  %22994 = vmatprep.mubr.msk.f32.mxu0 %vm25075_vm1, %v27351_v3 }
0x154c   :  { %22997 = vmatprep.subr.mxu0 %v27351_v3 }
0x1552   :  { %22995 = vmatmul.mubr.f32.vlgmr.msra.gmra.mrb[34].mxu0 %v13012_v12 }
0x1553   :  { %22998 = vmatpush3.xpose.msra.mxu0 %v12947_v54  ;;  %22999 = vmatprep.mubr.msk.f32.mxu0 %vm25075_vm1, %v27351_v3 }
0x1554   :  { %23032 = vmatprep.subr.mxu0 %v27351_v3 }
0x155a   :  { %23000 = vmatmul.mubr.f32.vlgmr.msra.gmra.mrb[34].mxu0 %v13012_v12 }
0x155b   :  { %23033 = vmatpush3.xpose.msra.mxu0 %v13865_v30  ;;  %23034 = vmatprep.mubr.msk.f32.mxu0 %vm25075_vm1, %v27351_v3 }
0x155c   :  { %23037 = vmatprep.subr.mxu0 %v27351_v3 }
0x155e   :  { %23035 = vmatmul.mubr.f32.vlgmr.msra.gmra.mrb[36].mxu0 %v13934_v13 }
0x155f   :  { %23038 = vmatpush3.xpose.msra.mxu0 %v13945_v39  ;;  %23039 = vmatprep.mubr.msk.f32.mxu0 %vm25075_vm1, %v27351_v3 }
0x1560   :  { %23042 = vmatprep.subr.mxu0 %v27351_v3 }
0x1566   :  { %23040 = vmatmul.mubr.f32.vlgmr.msra.gmra.mrb[36].mxu0 %v13930_v28 }
0x1567   :  { %23043 = vmatpush3.xpose.msra.mxu0 %v13942_v50  ;;  %23044 = vmatprep.mubr.msk.f32.mxu0 %vm25075_vm1, %v27351_v3 }
0x1568   :  { %23047 = vmatprep.subr.mxu0 %v27351_v3 }
0x156e   :  { %23045 = vmatmul.mubr.f32.vlgmr.msra.gmra.mrb[36].mxu0 %v13931_v21 }
0x156f   :  { %23048 = vmatpush3.xpose.msra.mxu0 %v13865_v30  ;;  %23049 = vmatprep.mubr.msk.f32.mxu0 %vm25075_vm1, %v27351_v3 }
0x1570   :  { %23052 = vmatprep.subr.mxu0 %v27351_v3 }
0x1576   :  { %23050 = vmatmul.mubr.f32.vlgmr.msra.gmra.mrb[36].mxu0 %v13932_v58 }
0x1577   :  { %23053 = vmatpush3.xpose.msra.mxu0 %v13943_v34  ;;  %23054 = vmatprep.mubr.msk.f32.mxu0 %vm25075_vm1, %v27351_v3 }
0x1578   :  { %23057 = vmatprep.subr.mxu0 %v27351_v3 }
0x157e   :  { %23055 = vmatmul.mubr.f32.vlgmr.msra.gmra.mrb[36].mxu0 %v13930_v28 }
0x157f   :  { %23058 = vmatpush3.xpose.msra.mxu0 %v13865_v30  ;;  %23059 = vmatprep.mubr.msk.f32.mxu0 %vm25075_vm1, %v27351_v3 }
0x1580   :  { %24052 = vmatprep.subr.bf16.mxu0 %v27352_v27 }
0x1586   :  { %23060 = vmatmul.mubr.f32.vlgmr.msra.gmra.mrb[36].mxu0 %v13930_v28 }
0x1587   :  { %23100 = vmatprep.mubr.msk.f32.mxu0 %vm25075_vm1, %v27351_v3 }
0x15fd   :  { %v11551_v60 = vpop.f32.mrb[38].mxu1 }
0x15fe   :  { %v11555_v47 = vsel %vm25394_vm3, %v11551_v60, -3.4028235e+38  ;;  %v22881_v20 = vpop.f32.mrb[39].mxu1 }
0x15ff   :  { %v11556_v6 = vsel %vm784_vm2, %v11555_v47, -inf }
0x1600   :  { %11557 = vmax.xlane.f32.xlu1 %v11556_v6 }
0x1601   :  { %v12470_v31 = vpop.f32.mrb[32].mxu0 }
0x1602   :  { %v12474_v38 = vsel %vm25394_vm3, %v12470_v31, -3.4028235e+38  ;;  %v22941_v51 = vpop.f32.mrb[33].mxu0 }
0x1603   :  { %v12475_v37 = vsel %vm784_vm2, %v12474_v38, -inf }
0x1604   :  { %12476 = vmax.xlane.f32.xlu0 %v12475_v37 }
0x162d   :  { %v13388_v14 = vpop.f32.mrb[34].mxu0 }
0x162e   :  { %v13392_v0 = vsel %vm25394_vm3, %v13388_v14, -3.4028235e+38  ;;  %v23001_v23 = vpop.f32.mrb[35].mxu0 }
0x162f   :  { %v13393_v25 = vsel %vm784_vm2, %v13392_v0, -inf }
0x1630   :  { %13394 = vmax.xlane.f32.xlu1 %v13393_v25 }
0x1659   :  { %v14306_v42 = vpop.f32.mrb[36].mxu0 }
0x165a   :  { %v14310_v44 = vsel %vm25394_vm3, %v14306_v42, -3.4028235e+38  ;;  %v23061_v48 = vpop.f32.mrb[37].mxu0 }
0x165b   :  { %v14311_v35 = vsel %vm784_vm2, %v14310_v44, -inf }
0x165c   :  { %14312 = vmax.xlane.f32.xlu1 %v14311_v35 }
0x168d   :  { %v11558_v22 = vpop.xlane.xlu1 %11557 }
0x168e   :  { %v11559_v26 = vsub.f32 %v11555_v47, %v11558_v22 }
0x1690   :  { %v11560_v53 = vmul.f32 1.442695, %v11559_v26 }
0x1691   :  { %v12477_v40 = vpop.xlane.xlu0 %12476 }
0x1692   :  { %24871 = vpow2.f32 %v11560_v53  ;;  %v12478_v45 = vsub.f32 %v12474_v38, %v12477_v40 }
0x1694   :  { %v12479_v56 = vmul.f32 1.442695, %v12478_v45  ;;  %v11083_v45 = vmul.f32 %v26428_v15, %v25544_v9 }
0x1696   :  { %24873 = vpow2.f32 %v12479_v56 }
0x169c   :  { %v24872_v10 = vpop.eup %24871 }
0x169d   :  { %v11562_v57 = vsel %vm784_vm2, %v24872_v10, 0.0 }
0x169e   :  { %11563 = vadd.xlane.f32.xlu0 %v11562_v57 }
0x16a0   :  { %v24874_v19 = vpop.eup %24873 }
0x16a1   :  { %v12481_v63 = vsel %vm784_vm2, %v24874_v19, 0.0 }
0x16a2   :  { %12482 = vadd.xlane.f32.xlu1 %v12481_v63  ;;  %v24924_v63 = vld [vmem:[#allocation5 + $0x8] sm:$0xff] }
0x16b3   :  { %12486 = vrot.lane.b32.xlu1 %v26422_v49, %s25083_s7 }
0x16b4   :  { %11568 = vrot.lane.b32.xlu0 %v26422_v49, %s25076_s16 }
0x16b7   :  { %13404 = vrot.lane.b32.xlu1 %v26422_v49, %s25084_s30 }
0x16bd   :  { %v13395_v33 = vpop.xlane.xlu1 %13394 }
0x16be   :  { %v13396_v18 = vsub.f32 %v13392_v0, %v13395_v33  ;;  %v11069_v33 = vmul.f32 %v24924_v63, %v26428_v15 }
0x16c0   :  { %v13397_v12 = vmul.f32 1.442695, %v13396_v18 }
0x16c2   :  { %24875 = vpow2.f32 %v13397_v12 }
0x16cc   :  { %v26554_v54 = vpop.eup %24875 }
0x16cd   :  { %v13399_v41 = vsel %vm784_vm2, %v26554_v54, 0.0 }
0x16d3   :  { %13400 = vadd.xlane.f32.xlu0 %v13399_v41 }
0x16e9   :  { %14322 = vrot.lane.b32.xlu0 %v26422_v49, %s25085_s22  ;;  %v14313_v8 = vpop.xlane.xlu1 %14312 }
0x16ea   :  { %v14314_v2 = vsub.f32 %v14310_v44, %v14313_v8 }
0x16ec   :  { %v14315_v24 = vmul.f32 1.442695, %v14314_v2 }
0x16ee   :  { %24877 = vpow2.f32 %v14315_v24 }
0x16f8   :  { %v26560_v36 = vpop.eup %24877 }
0x16f9   :  { %v14317_v11 = vsel %vm784_vm2, %v26560_v36, 0.0 }
0x16fa   :  { %14318 = vadd.xlane.f32.xlu1 %v14317_v11 }
0x170b   :  { %11090 = vrot.lane.b32.xlu1 %v11085_v59, %s25074_s15 }
0x170f   :  { %11076 = vrot.lane.b32.xlu1 %v11071_v32, %s25074_s15 }
0x172b   :  { %v11564_v49 = vpop.xlane.xlu0 %11563 }
0x172c   :  { %24879 = vrcp.f32 %v11564_v49 }
0x172f   :  { %v11569_v61 = vpop.permute.xlu0 %11568  ;;  %v12483_v39 = vpop.xlane.xlu1 %12482 }
0x1730   :  { %v11575_v16 = vand.u32 4294901760, %v11569_v61  ;;  %24881 = vrcp.f32 %v12483_v39  ;;  %v11097_v39 = vld [vmem:[#allocation8 + $0x20] sm:$0xff] }
0x1732   :  { %22883 = vmatpush3.msra.mxu1 %v11575_v16  ;;  %v11652_v30 = vsub.f32 %v11569_v61, %v11575_v16 }
0x1733   :  { %22887 = vmatprep.subr.mxu1 %v27351_v3  ;;  %v12487_v6 = vpop.permute.xlu1 %12486 }
0x1734   :  { %v11653_v50 = vand.u32 4294901760, %v11652_v30  ;;  %v12493_v38 = vand.u32 4294901760, %v12487_v6 }
0x1736   :  { %v24880_v4 = vpop.eup %24879  ;;  %v11654_v52 = vsub.f32 %v11652_v30, %v11653_v50  ;;  %v12570_v37 = vsub.f32 %v12487_v6, %v12493_v38 }
0x1737   :  { %v11566_v28 = vmul.f32 %v24880_v4, %v24872_v10  ;;  %v13405_v22 = vpop.permute.xlu1 %13404 }
0x1738   :  { %v11655_v13 = vand.u32 4294901760, %v11654_v52  ;;  %v12571_v0 = vand.u32 4294901760, %v12570_v37  ;;  %v13411_v10 = vand.u32 4294901760, %v13405_v22 }
0x1739   :  { %v11572_v21 = vsel %vm784_vm2, %v11566_v28, 0 }
0x173a   :  { %v11640_v43 = vand.u32 4294901760, %v11572_v21  ;;  %v24882_v60 = vpop.eup %24881  ;;  %v12572_v25 = vsub.f32 %v12570_v37, %v12571_v0  ;;  %v13488_v12 = vsub.f32 %v13405_v22, %v13411_v10 }
0x173b   :  { %v12485_v47 = vmul.f32 %v24882_v60, %v24874_v19  ;;  %v11098_v60 = vld [vmem:[#allocation8 + $0x28] sm:$0xff] }
0x173c   :  { %v11641_v58 = vsub.f32 %v11572_v21, %v11640_v43  ;;  %v12573_v44 = vand.u32 4294901760, %v12572_v25  ;;  %v13489_v8 = vand.u32 4294901760, %v13488_v12 }
0x173d   :  { %v12490_v20 = vsel %vm784_vm2, %v12485_v47, 0  ;;  %v14793_v47 = vand.u32 4294901760, %v11097_v39 }
0x173e   :  { %v11642_v34 = vand.u32 4294901760, %v11641_v58  ;;  %v12558_v31 = vand.u32 4294901760, %v12490_v20  ;;  %v13490_v24 = vsub.f32 %v13488_v12, %v13489_v8 }
0x173f   :  { %v14873_v6 = vsub.f32 %v11097_v39, %v14793_v47 }
0x1740   :  { %v11643_v5 = vsub.f32 %v11641_v58, %v11642_v34  ;;  %v12559_v51 = vsub.f32 %v12490_v20, %v12558_v31  ;;  %v13491_v29 = vand.u32 4294901760, %v13490_v24  ;;  %v14796_v20 = vand.u32 4294901760, %v11098_v60 }
0x1742   :  { %v11644_v1 = vand.u32 4294901760, %v11643_v5  ;;  %v12560_v14 = vand.u32 4294901760, %v12559_v51 }
0x1744   :  { %22885 = vmatmul.mubr.f32.vlgmr.msra.gmra.mrb[40].mxu1 %v11644_v1  ;;  %v12561_v23 = vsub.f32 %v12559_v51, %v12560_v14 }
0x1745   :  { %22888 = vmatpush3.msra.mxu1 %v11655_v13  ;;  %22889 = vmatprep.mubr.msk.f32.mxu1 %vm25075_vm1, %v27351_v3 }
0x1746   :  { %22892 = vmatprep.subr.mxu1 %v27351_v3  ;;  %v12562_v42 = vand.u32 4294901760, %v12561_v23 }
0x174c   :  { %22890 = vmatmul.mubr.f32.vlgmr.msra.gmra.mrb[40].mxu1 %v11640_v43 }
0x174d   :  { %22893 = vmatpush3.msra.mxu1 %v11652_v30  ;;  %22894 = vmatprep.mubr.msk.f32.mxu1 %vm25075_vm1, %v27351_v3 }
0x174e   :  { %22897 = vmatprep.subr.mxu1 %v27351_v3 }
0x1754   :  { %22895 = vmatmul.mubr.f32.vlgmr.msra.gmra.mrb[40].mxu1 %v11641_v58 }
0x1755   :  { %22898 = vmatpush3.msra.mxu1 %v11575_v16  ;;  %22899 = vmatprep.mubr.msk.f32.mxu1 %vm25075_vm1, %v27351_v3 }
0x1756   :  { %22902 = vmatprep.subr.mxu1 %v27351_v3 }
0x175c   :  { %22900 = vmatmul.mubr.f32.vlgmr.msra.gmra.mrb[40].mxu1 %v11642_v34 }
0x175d   :  { %22903 = vmatpush3.msra.mxu1 %v11653_v50  ;;  %22904 = vmatprep.mubr.msk.f32.mxu1 %vm25075_vm1, %v27351_v3 }
0x175e   :  { %22907 = vmatprep.subr.mxu1 %v27351_v3 }
0x1760   :  { %v13401_v48 = vpop.xlane.xlu0 %13400 }
0x1761   :  { %24883 = vrcp.f32 %v13401_v48  ;;  %v11099_v48 = vld [vmem:[#allocation8 + $0x30] sm:$0xff] }
0x1762   :  { %v14799_v22 = vand.u32 4294901760, %v11099_v48 }
0x1764   :  { %22905 = vmatmul.mubr.f32.vlgmr.msra.gmra.mrb[40].mxu1 %v11640_v43  ;;  %v14323_v61 = vpop.permute.xlu0 %14322 }
0x1765   :  { %22908 = vmatpush3.msra.mxu1 %v11575_v16  ;;  %22909 = vmatprep.mubr.msk.f32.mxu1 %vm25075_vm1, %v27351_v3  ;;  %v14329_v4 = vand.u32 4294901760, %v14323_v61 }
0x1766   :  { %22942 = vmatprep.subr.mxu1 %v27351_v3 }
0x1767   :  { %v14406_v30 = vsub.f32 %v14323_v61, %v14329_v4 }
0x1769   :  { %v14407_v21 = vand.u32 4294901760, %v14406_v30 }
0x176b   :  { %v24884_v35 = vpop.eup %24883  ;;  %v14408_v50 = vsub.f32 %v14406_v30, %v14407_v21 }
0x176c   :  { %22910 = vmatmul.mubr.f32.vlgmr.msra.gmra.mrb[40].mxu1 %v11640_v43  ;;  %v13403_v26 = vmul.f32 %v24884_v35, %v26554_v54  ;;  %v11100_v35 = vld [vmem:[#allocation8 + $0x38] sm:$0xff] }
0x176d   :  { %22943 = vmatpush3.msra.mxu1 %v12493_v38  ;;  %22944 = vmatprep.mubr.msk.f32.mxu1 %vm25075_vm1, %v27351_v3  ;;  %v14409_v34 = vand.u32 4294901760, %v14408_v50 }
0x176e   :  { %22947 = vmatprep.subr.mxu1 %v27351_v3  ;;  %v13408_v40 = vsel %vm784_vm2, %v13403_v26, 0  ;;  %v14802_v26 = vand.u32 4294901760, %v11100_v35 }
0x176f   :  { %v13476_v56 = vand.u32 4294901760, %v13408_v40 }
0x1770   :  { %22945 = vmatmul.mubr.f32.vlgmr.msra.gmra.mrb[42].mxu1 %v12562_v42 }
0x1771   :  { %22948 = vmatpush3.msra.mxu1 %v12573_v44  ;;  %22949 = vmatprep.mubr.msk.f32.mxu1 %vm25075_vm1, %v27351_v3  ;;  %v13477_v18 = vsub.f32 %v13408_v40, %v13476_v56  ;;  %v14894_v40 = vsub.f32 %v11100_v35, %v14802_v26 }
0x1772   :  { %22952 = vmatprep.subr.mxu1 %v27351_v3 }
0x1773   :  { %v13478_v9 = vand.u32 4294901760, %v13477_v18 }
0x1775   :  { %v13479_v2 = vsub.f32 %v13477_v18, %v13478_v9 }
0x1777   :  { %v13480_v11 = vand.u32 4294901760, %v13479_v2 }
0x1778   :  { %22950 = vmatmul.mubr.f32.vlgmr.msra.gmra.mrb[42].mxu1 %v12558_v31 }
0x1779   :  { %22953 = vmatpush3.msra.mxu1 %v12570_v37  ;;  %22954 = vmatprep.mubr.msk.f32.mxu1 %vm25075_vm1, %v27351_v3 }
0x177a   :  { %22957 = vmatprep.subr.mxu1 %v27351_v3 }
0x1780   :  { %22955 = vmatmul.mubr.f32.vlgmr.msra.gmra.mrb[42].mxu1 %v12559_v51 }
0x1781   :  { %22958 = vmatpush3.msra.mxu1 %v12493_v38  ;;  %22959 = vmatprep.mubr.msk.f32.mxu1 %vm25075_vm1, %v27351_v3 }
0x1782   :  { %22962 = vmatprep.subr.mxu1 %v27351_v3 }
0x1787   :  { %v14319_v53 = vpop.xlane.xlu1 %14318 }
0x1788   :  { %22960 = vmatmul.mubr.f32.vlgmr.msra.gmra.mrb[42].mxu1 %v12560_v14  ;;  %24885 = vrcp.f32 %v14319_v53  ;;  %v14887_v53 = vsub.f32 %v11099_v48, %v14799_v22 }
0x1789   :  { %22963 = vmatpush3.msra.mxu1 %v12571_v0  ;;  %22964 = vmatprep.mubr.msk.f32.mxu1 %vm25075_vm1, %v27351_v3 }
0x178a   :  { %22967 = vmatprep.subr.mxu1 %v27351_v3  ;;  %v26681_v24 = vpack.c.bf16 %v14894_v40, %v14887_v53 }
0x178b   :  { %v11091_v57 = vpop.permute.xlu1 %11090 }
0x178c   :  { %v26606_v19 = vadd.f32 %v11091_v57, %v11083_v45  ;;  %v14888_v45 = vand.u32 4294901760, %v14887_v53 }
0x178f   :  { %v11077_v54 = vpop.permute.xlu1 %11076 }
0x1790   :  { %v26609_v41 = vadd.f32 %v11077_v54, %v11069_v33  ;;  %22965 = vmatmul.mubr.f32.vlgmr.msra.gmra.mrb[42].mxu1 %v12558_v31  ;;  %v26674_v54 = vpack.c.bf16 %v14802_v26, %v14799_v22 }
0x1791   :  { %22968 = vmatpush3.msra.mxu1 %v12493_v38  ;;  %22969 = vmatprep.mubr.msk.f32.mxu1 %vm25075_vm1, %v27351_v3  ;;  %v14874_v38 = vand.u32 4294901760, %v14873_v6 }
0x1792   :  { %16197 = vrot.lane.b32.xlu1 %v26609_v41, %s25081_s2  ;;  %23002 = vmatprep.subr.mxu1 %v27351_v3  ;;  %v24886_v59 = vpop.eup %24885 }
0x1793   :  { %v14321_v32 = vmul.f32 %v24886_v59, %v26560_v36  ;;  %v14875_v37 = vsub.f32 %v14873_v6, %v14874_v38 }
0x1795   :  { %v14326_v49 = vsel %vm784_vm2, %v14321_v32, 0  ;;  %v14876_v0 = vand.u32 4294901760, %v14875_v37 }
0x1796   :  { %17115 = vrot.lane.b32.xlu1 %v26609_v41, %s25078_s20  ;;  %v14394_v16 = vand.u32 4294901760, %v14326_v49 }
0x1798   :  { %22970 = vmatmul.mubr.f32.vlgmr.msra.gmra.mrb[42].mxu1 %v12558_v31  ;;  %v14395_v28 = vsub.f32 %v14326_v49, %v14394_v16  ;;  %v14880_v31 = vsub.f32 %v11098_v60, %v14796_v20 }
0x1799   :  { %23003 = vmatpush3.msra.mxu1 %v13411_v10  ;;  %23004 = vmatprep.mubr.msk.f32.mxu1 %vm25075_vm1, %v27351_v3 }
0x179a   :  { %18033 = vrot.lane.b32.xlu1 %v26609_v41, %s25080_s4  ;;  %23007 = vmatprep.subr.mxu1 %v27351_v3  ;;  %v14396_v36 = vand.u32 4294901760, %v14395_v28  ;;  %v14881_v51 = vand.u32 4294901760, %v14880_v31 }
0x179c   :  { %23005 = vmatmul.mubr.f32.vlgmr.msra.gmra.mrb[44].mxu1 %v13480_v11  ;;  %v14397_v43 = vsub.f32 %v14395_v28, %v14396_v36  ;;  %v14882_v14 = vsub.f32 %v14880_v31, %v14881_v51  ;;  %v26685_v11 = vpack.c.bf16 %v14881_v51, %v14874_v38 }
0x179d   :  { %23008 = vmatpush3.msra.mxu1 %v13491_v29  ;;  %23009 = vmatprep.mubr.msk.f32.mxu1 %vm25075_vm1, %v27351_v3 }
0x179e   :  { %23012 = vmatprep.subr.mxu1 %v27351_v3  ;;  %v14398_v58 = vand.u32 4294901760, %v14397_v43  ;;  %v14883_v23 = vand.u32 4294901760, %v14882_v14 }
0x17a0   :  { %v26661_v25 = vpack.c.bf16 %v14883_v23, %v14876_v0 }
0x17a4   :  { %23010 = vmatmul.mubr.f32.vlgmr.msra.gmra.mrb[44].mxu1 %v13476_v56 }
0x17a5   :  { %23013 = vmatpush3.msra.mxu1 %v13488_v12  ;;  %23014 = vmatprep.mubr.msk.f32.mxu1 %vm25075_vm1, %v27351_v3  ;;  %v26670_v12 = vpack.c.bf16 %v14796_v20, %v14793_v47 }
0x17a6   :  { %23017 = vmatprep.subr.mxu1 %v27351_v3 }
0x17a7   :  { %24054 = vmatpush3.bf16.msra.mxu0 %v26670_v12 }
0x17a8   :  { %24055 = vmatprep.subr.bf16.mxu0 %v27352_v27 }
0x17ab   :  { %24057 = vmatpush3.bf16.msra.mxu0 %v26674_v54 }
0x17ac   :  { %23015 = vmatmul.mubr.f32.vlgmr.msra.gmra.mrb[44].mxu1 %v13477_v18  ;;  %24064 = vmatprep.subr.bf16.mxu0 %v27352_v27 }
0x17ad   :  { %23018 = vmatpush3.msra.mxu1 %v13411_v10  ;;  %23019 = vmatprep.mubr.msk.f32.mxu1 %vm25075_vm1, %v27351_v3 }
0x17ae   :  { %23022 = vmatprep.subr.mxu1 %v27351_v3 }
0x17b4   :  { %23020 = vmatmul.mubr.f32.vlgmr.msra.gmra.mrb[44].mxu1 %v13478_v9  ;;  %v26678_v9 = vpack.c.bf16 %v14880_v31, %v14873_v6 }
0x17b5   :  { %23023 = vmatpush3.msra.mxu1 %v13489_v8  ;;  %23024 = vmatprep.mubr.msk.f32.mxu1 %vm25075_vm1, %v27351_v3 }
0x17b6   :  { %23027 = vmatprep.subr.mxu1 %v27351_v3 }
0x17bc   :  { %23025 = vmatmul.mubr.f32.vlgmr.msra.gmra.mrb[44].mxu1 %v13476_v56 }
0x17bd   :  { %23028 = vmatpush3.msra.mxu1 %v13411_v10  ;;  %23029 = vmatprep.mubr.msk.f32.mxu1 %vm25075_vm1, %v27351_v3  ;;  %v14889_v10 = vsub.f32 %v14887_v53, %v14888_v45 }
0x17be   :  { %23062 = vmatprep.subr.mxu1 %v27351_v3 }
0x17bf   :  { %v14890_v63 = vand.u32 4294901760, %v14889_v10 }
0x17c4   :  { %23030 = vmatmul.mubr.f32.vlgmr.msra.gmra.mrb[44].mxu1 %v13476_v56  ;;  %v14895_v56 = vand.u32 4294901760, %v14894_v40 }
0x17c5   :  { %23063 = vmatpush3.msra.mxu1 %v14329_v4  ;;  %23064 = vmatprep.mubr.msk.f32.mxu1 %vm25075_vm1, %v27351_v3 }
0x17c6   :  { %23067 = vmatprep.subr.mxu1 %v27351_v3  ;;  %v14896_v57 = vsub.f32 %v14894_v40, %v14895_v56  ;;  %v26689_v29 = vpack.c.bf16 %v14895_v56, %v14888_v45 }
0x17c8   :  { %23065 = vmatmul.mubr.f32.vlgmr.msra.gmra.mrb[46].mxu1 %v14398_v58  ;;  %v14897_v33 = vand.u32 4294901760, %v14896_v57  ;;  %v15282_v58 = vsel %vm784_vm2, %v26609_v41, 0 }
0x17c9   :  { %23068 = vmatpush3.msra.mxu1 %v14409_v34  ;;  %23069 = vmatprep.mubr.msk.f32.mxu1 %vm25075_vm1, %v27351_v3 }
0x17ca   :  { %23072 = vmatprep.subr.mxu1 %v27351_v3  ;;  %v26666_v18 = vpack.c.bf16 %v14897_v33, %v14890_v63 }
0x17d0   :  { %23070 = vmatmul.mubr.f32.vlgmr.msra.gmra.mrb[46].mxu1 %v14394_v16 }
0x17d1   :  { %23073 = vmatpush3.msra.mxu1 %v14406_v30  ;;  %23074 = vmatprep.mubr.msk.f32.mxu1 %vm25075_vm1, %v27351_v3 }
0x17d2   :  { %23077 = vmatprep.subr.mxu1 %v27351_v3 }
0x17d8   :  { %23075 = vmatmul.mubr.f32.vlgmr.msra.gmra.mrb[46].mxu1 %v14395_v28 }
0x17d9   :  { %23078 = vmatpush3.msra.mxu1 %v14329_v4  ;;  %23079 = vmatprep.mubr.msk.f32.mxu1 %vm25075_vm1, %v27351_v3 }
0x17da   :  { %23082 = vmatprep.subr.mxu1 %v27351_v3 }
0x17e0   :  { %23080 = vmatmul.mubr.f32.vlgmr.msra.gmra.mrb[46].mxu1 %v14396_v36 }
0x17e1   :  { %23083 = vmatpush3.msra.mxu1 %v14407_v21  ;;  %23084 = vmatprep.mubr.msk.f32.mxu1 %vm25075_vm1, %v27351_v3 }
0x17e2   :  { %23087 = vmatprep.subr.mxu1 %v27351_v3 }
0x17e8   :  { %23085 = vmatmul.mubr.f32.vlgmr.msra.gmra.mrb[46].mxu1 %v14394_v16 }
0x17e9   :  { %23088 = vmatpush3.msra.mxu1 %v14329_v4  ;;  %23089 = vmatprep.mubr.msk.f32.mxu1 %vm25075_vm1, %v27351_v3 }
0x17ea   :  { %24058 = vmatprep.subr.bf16.mxu1 %v27352_v27 }
0x17f0   :  { %23090 = vmatmul.mubr.f32.vlgmr.msra.gmra.mrb[46].mxu1 %v14394_v16 }
0x17f1   :  { %23111 = vmatprep.mubr.msk.f32.mxu1 %vm25075_vm1, %v27351_v3  ;;  %24060 = vmatpush3.bf16.msra.mxu1 %v26661_v25 }
0x17f2   :  { %24061 = vmatprep.subr.bf16.mxu1 %v27352_v27 }
0x17f5   :  { %24063 = vmatpush3.bf16.msra.mxu1 %v26666_v18 }
0x17f6   :  { %24070 = vmatprep.subr.bf16.mxu1 %v27352_v27 }
0x1804   :  { %v16198_v31 = vpop.permute.xlu1 %16197 }
0x1805   :  { %v16201_v51 = vsel %vm784_vm2, %v16198_v31, 0 }
0x1806   :  { %v16271_v14 = vand.u32 4294901760, %v16201_v51 }
0x1808   :  { %v16272_v23 = vsub.f32 %v16201_v51, %v16271_v14  ;;  %v17116_v40 = vpop.permute.xlu1 %17115 }
0x1809   :  { %v17119_v56 = vsel %vm784_vm2, %v17116_v40, 0 }
0x180a   :  { %v17189_v57 = vand.u32 4294901760, %v17119_v56 }
0x180c   :  { %v17190_v33 = vsub.f32 %v17119_v56, %v17189_v57 }
0x183f   :  { %v12016_v52 = vpop.f32.mrb[40].mxu1 }
0x1840   :  { %v22911_v5 = vpop.f32.mrb[41].mxu1 }
0x186b   :  { %v12934_v1 = vpop.f32.mrb[42].mxu1 }
0x186c   :  { %14775 = vrot.lane.b32.xlu0 %v12934_v1, %s25068_s18  ;;  %v22971_v13 = vpop.f32.mrb[43].mxu1 }
0x1897   :  { %v13852_v42 = vpop.f32.mrb[44].mxu1 }
0x1898   :  { %14779 = vrot.lane.b32.xlu0 %v13852_v42, %s25087_s23  ;;  %v23031_v44 = vpop.f32.mrb[45].mxu1 }
0x1899   :  { %v16273_v44 = vand.u32 4294901760, %v16272_v23 }
0x189b   :  { %v16274_v35 = vsub.f32 %v16272_v23, %v16273_v44 }
0x189d   :  { %v16275_v26 = vand.u32 4294901760, %v16274_v35 }
0x18c3   :  { %v14770_v8 = vpop.f32.mrb[46].mxu1 }
0x18c4   :  { %14783 = vrot.lane.b32.xlu0 %v14770_v8, %s25088_s24  ;;  %v23091_v2 = vpop.f32.mrb[47].mxu1 }
0x18c5   :  { %v17191_v2 = vand.u32 4294901760, %v17190_v33 }
0x18c8   :  { %15279 = vrot.lane.b32.xlu0 %v26606_v19, %s25073_s14 }
0x18cc   :  { %16199 = vrot.lane.b32.xlu0 %v26606_v19, %s25077_s19 }
0x18d0   :  { %17117 = vrot.lane.b32.xlu0 %v26606_v19, %s25079_s21 }
0x18d4   :  { %18035 = vrot.lane.b32.xlu0 %v26606_v19, %s25082_s12 }
0x18de   :  { %v14776_v59 = vpop.permute.xlu0 %14775 }
0x18df   :  { %v14786_v49 = vsel %vm784_vm2, %v12016_v52, %v14776_v59  ;;  %v15352_v52 = vand.u32 4294901760, %v15282_v58 }
0x18e1   :  { %v15353_v41 = vsub.f32 %v15282_v58, %v15352_v52 }
0x18e3   :  { %v15354_v13 = vand.u32 4294901760, %v15353_v41 }
0x18e5   :  { %v15355_v60 = vsub.f32 %v15353_v41, %v15354_v13 }
0x18e7   :  { %v15356_v20 = vand.u32 4294901760, %v15355_v60 }
0x190a   :  { %v14780_v32 = vpop.permute.xlu0 %14779 }
0x190b   :  { %v14787_v61 = vsel %vm4468_vm4, %v14786_v49, %v14780_v32  ;;  %v17192_v32 = vsub.f32 %v17190_v33, %v17191_v2 }
0x1936   :  { %v14784_v16 = vpop.permute.xlu0 %14783 }
0x1937   :  { %v14788_v4 = vsel %vm4470_vm5, %v14787_v61, %v14784_v16  ;;  %v17193_v61 = vand.u32 4294901760, %v17192_v32 }
0x1938   :  { %v14790_v28 = vsel %vm111_vm0, %v14788_v4, 0  ;;  %v18034_v4 = vpop.permute.xlu1 %18033 }
0x1939   :  { %v14861_v30 = vand.u32 4294901760, %v14790_v28 }
0x193a   :  { %v15280_v50 = vpop.permute.xlu0 %15279 }
0x193b   :  { %v14862_v36 = vsub.f32 %v14790_v28, %v14861_v30  ;;  %23112 = vmatmul.mubr.f32.vlgmr.msra.gmra.mrb[48].mxu1 %v14861_v30  ;;  %v15284_v34 = vsel %vm784_vm2, %v15280_v50, 0 }
0x193c   :  { %24072 = vmatpush3.bf16.msra.mxu1 %v26670_v12  ;;  %23133 = vmatprep.mubr.msk.f32.mxu1 %vm25075_vm1, %v27351_v3  ;;  %v15287_v5 = vand.u32 4294901760, %v15284_v34 }
0x193d   :  { %24073 = vmatprep.subr.bf16.mxu1 %v27352_v27  ;;  %v14863_v19 = vand.u32 4294901760, %v14862_v36 }
0x193e   :  { %v15364_v1 = vsub.f32 %v15284_v34, %v15287_v5  ;;  %v16200_v38 = vpop.permute.xlu0 %16199 }
0x193f   :  { %v14864_v21 = vsub.f32 %v14862_v36, %v14863_v19  ;;  %v16203_v37 = vsel %vm784_vm2, %v16200_v38, 0 }
0x1940   :  { %24075 = vmatpush3.bf16.msra.mxu1 %v26674_v54  ;;  %v15365_v39 = vand.u32 4294901760, %v15364_v1  ;;  %v16206_v0 = vand.u32 4294901760, %v16203_v37 }
0x1941   :  { %24082 = vmatprep.subr.bf16.mxu1 %v27352_v27  ;;  %v14865_v43 = vand.u32 4294901760, %v14864_v21 }
0x1942   :  { %v15366_v47 = vsub.f32 %v15364_v1, %v15365_v39  ;;  %v16283_v42 = vsub.f32 %v16203_v37, %v16206_v0  ;;  %v17118_v45 = vpop.permute.xlu0 %17117 }
0x1943   :  { %23134 = vmatmul.mubr.f32.vlgmr.msra.gmra.mrb[50].mxu1 %v14863_v19  ;;  %23101 = vmatmul.mubr.f32.vlgmr.msra.gmra.mrb[38].mxu0 %v14865_v43  ;;  %v17121_v10 = vsel %vm784_vm2, %v17118_v45, 0 }
0x1944   :  { %24066 = vmatpush3.bf16.msra.mxu0 %v26678_v9  ;;  %24084 = vmatpush3.bf16.msra.mxu1 %v26670_v12  ;;  %v15367_v6 = vand.u32 4294901760, %v15366_v47  ;;  %v16284_v48 = vand.u32 4294901760, %v16283_v42  ;;  %v17124_v63 = vand.u32 4294901760, %v17121_v10 }
0x1945   :  { %24067 = vmatprep.subr.bf16.mxu0 %v27352_v27  ;;  %24085 = vmatprep.subr.bf16.mxu1 %v27352_v27 }
0x1946   :  { %23122 = vmatprep.mubr.msk.f32.mxu0 %vm25075_vm1, %v27351_v3  ;;  %23155 = vmatprep.mubr.msk.f32.mxu1 %vm25075_vm1, %v27351_v3  ;;  %v16285_v22 = vsub.f32 %v16283_v42, %v16284_v48  ;;  %v17201_v8 = vsub.f32 %v17121_v10, %v17124_v63  ;;  %v18036_v28 = vpop.permute.xlu0 %18035 }
0x1948   :  { %24069 = vmatpush3.bf16.msra.mxu0 %v26681_v24  ;;  %24087 = vmatpush3.bf16.msra.mxu1 %v26674_v54  ;;  %v16286_v53 = vand.u32 4294901760, %v16285_v22  ;;  %v17202_v59 = vand.u32 4294901760, %v17201_v8 }
0x1949   :  { %24076 = vmatprep.subr.bf16.mxu0 %v27352_v27  ;;  %23188 = vmatprep.subr.mxu1 %v27351_v3 }
0x194a   :  { %v17203_v49 = vsub.f32 %v17201_v8, %v17202_v59 }
0x194b   :  { %23123 = vmatmul.mubr.f32.vlgmr.msra.gmra.mrb[40].mxu0 %v14862_v36  ;;  %23156 = vmatmul.mubr.f32.vlgmr.msra.gmra.mrb[52].mxu1 %v14861_v30  ;;  %v18039_v36 = vsel %vm784_vm2, %v18036_v28, 0 }
0x194c   :  { %24078 = vmatpush3.bf16.msra.mxu0 %v26685_v11  ;;  %23144 = vmatprep.mubr.msk.f32.mxu0 %vm25075_vm1, %v27351_v3  ;;  %v17204_v16 = vand.u32 4294901760, %v17203_v49  ;;  %v18042_v21 = vand.u32 4294901760, %v18039_v36 }
0x194d   :  { %24079 = vmatprep.subr.bf16.mxu0 %v27352_v27  ;;  %23190 = vmatprep.mubr.msk.f32.mxu1 %vm25075_vm1, %v27351_v3 }
0x194e   :  { %v18119_v50 = vsub.f32 %v18039_v36, %v18042_v21 }
0x1950   :  { %24081 = vmatpush3.bf16.msra.mxu0 %v26689_v29  ;;  %v18120_v34 = vand.u32 4294901760, %v18119_v50 }
0x1951   :  { %23158 = vmatprep.subr.mxu0 %v27351_v3 }
0x1953   :  { %23145 = vmatmul.mubr.f32.vlgmr.msra.gmra.mrb[42].mxu0 %v14861_v30  ;;  %v18037_v30 = vsel %vm784_vm2, %v18034_v4, 0 }
0x1954   :  { %23160 = vmatprep.mubr.msk.f32.mxu0 %vm25075_vm1, %v27351_v3  ;;  %v18107_v19 = vand.u32 4294901760, %v18037_v30 }
0x1956   :  { %v18108_v43 = vsub.f32 %v18037_v30, %v18107_v19 }
0x1958   :  { %v18109_v58 = vand.u32 4294901760, %v18108_v43 }
0x1959   :  { %23159 = vmatpush3.xpose.msra.mxu0 %v15287_v5 }
0x195a   :  { %23163 = vmatprep.subr.mxu0 %v27351_v3 }
0x195c   :  { %23161 = vmatmul.mubr.f32.vlgmr.msra.gmra.mrb[44].mxu0 %v15356_v20 }
0x195d   :  { %23164 = vmatpush3.xpose.msra.mxu0 %v15367_v6  ;;  %23165 = vmatprep.mubr.msk.f32.mxu0 %vm25075_vm1, %v27351_v3 }
0x195e   :  { %23168 = vmatprep.subr.mxu0 %v27351_v3 }
0x1964   :  { %23166 = vmatmul.mubr.f32.vlgmr.msra.gmra.mrb[44].mxu0 %v15352_v52 }
0x1965   :  { %23169 = vmatpush3.xpose.msra.mxu0 %v15364_v1  ;;  %23170 = vmatprep.mubr.msk.f32.mxu0 %vm25075_vm1, %v27351_v3 }
0x1966   :  { %23173 = vmatprep.subr.mxu0 %v27351_v3 }
0x196c   :  { %23171 = vmatmul.mubr.f32.vlgmr.msra.gmra.mrb[44].mxu0 %v15353_v41 }
0x196d   :  { %23174 = vmatpush3.xpose.msra.mxu0 %v15287_v5  ;;  %23175 = vmatprep.mubr.msk.f32.mxu0 %vm25075_vm1, %v27351_v3 }
0x196e   :  { %23178 = vmatprep.subr.mxu0 %v27351_v3 }
0x1974   :  { %23176 = vmatmul.mubr.f32.vlgmr.msra.gmra.mrb[44].mxu0 %v15354_v13 }
0x1975   :  { %23179 = vmatpush3.xpose.msra.mxu0 %v15365_v39  ;;  %23180 = vmatprep.mubr.msk.f32.mxu0 %vm25075_vm1, %v27351_v3 }
0x1976   :  { %23183 = vmatprep.subr.mxu0 %v27351_v3 }
0x197c   :  { %23181 = vmatmul.mubr.f32.vlgmr.msra.gmra.mrb[44].mxu0 %v15352_v52 }
0x197d   :  { %23184 = vmatpush3.xpose.msra.mxu0 %v15287_v5  ;;  %23185 = vmatprep.mubr.msk.f32.mxu0 %vm25075_vm1, %v27351_v3  ;;  %v18121_v5 = vsub.f32 %v18119_v50, %v18120_v34 }
0x197e   :  { %23218 = vmatprep.subr.mxu0 %v27351_v3 }
0x197f   :  { %v18122_v1 = vand.u32 4294901760, %v18121_v5 }
0x1984   :  { %23186 = vmatmul.mubr.f32.vlgmr.msra.gmra.mrb[44].mxu0 %v15352_v52  ;;  %v18110_v52 = vsub.f32 %v18108_v43, %v18109_v58 }
0x1985   :  { %23219 = vmatpush3.xpose.msra.mxu0 %v16206_v0  ;;  %23220 = vmatprep.mubr.msk.f32.mxu0 %vm25075_vm1, %v27351_v3 }
0x1986   :  { %23223 = vmatprep.subr.mxu0 %v27351_v3  ;;  %v18111_v41 = vand.u32 4294901760, %v18110_v52 }
0x1988   :  { %23221 = vmatmul.mubr.f32.vlgmr.msra.gmra.mrb[46].mxu0 %v16275_v26 }
0x1989   :  { %23224 = vmatpush3.xpose.msra.mxu0 %v16286_v53  ;;  %23225 = vmatprep.mubr.msk.f32.mxu0 %vm25075_vm1, %v27351_v3 }
0x198a   :  { %23228 = vmatprep.subr.mxu0 %v27351_v3 }
0x1990   :  { %23226 = vmatmul.mubr.f32.vlgmr.msra.gmra.mrb[46].mxu0 %v16271_v14 }
0x1991   :  { %23229 = vmatpush3.xpose.msra.mxu0 %v16283_v42  ;;  %23230 = vmatprep.mubr.msk.f32.mxu0 %vm25075_vm1, %v27351_v3 }
0x1992   :  { %23233 = vmatprep.subr.mxu0 %v27351_v3 }
0x1998   :  { %23231 = vmatmul.mubr.f32.vlgmr.msra.gmra.mrb[46].mxu0 %v16272_v23 }
0x1999   :  { %23234 = vmatpush3.xpose.msra.mxu0 %v16206_v0  ;;  %23235 = vmatprep.mubr.msk.f32.mxu0 %vm25075_vm1, %v27351_v3 }
0x199a   :  { %23238 = vmatprep.subr.mxu0 %v27351_v3 }
0x19a0   :  { %23236 = vmatmul.mubr.f32.vlgmr.msra.gmra.mrb[46].mxu0 %v16273_v44 }
0x19a1   :  { %23239 = vmatpush3.xpose.msra.mxu0 %v16284_v48  ;;  %23240 = vmatprep.mubr.msk.f32.mxu0 %vm25075_vm1, %v27351_v3 }
0x19a2   :  { %23243 = vmatprep.subr.mxu0 %v27351_v3 }
0x19a8   :  { %23241 = vmatmul.mubr.f32.vlgmr.msra.gmra.mrb[46].mxu0 %v16271_v14 }
0x19a9   :  { %23244 = vmatpush3.xpose.msra.mxu0 %v16206_v0  ;;  %23245 = vmatprep.mubr.msk.f32.mxu0 %vm25075_vm1, %v27351_v3 }
0x19aa   :  { %23278 = vmatprep.subr.mxu0 %v27351_v3 }
0x19b0   :  { %23246 = vmatmul.mubr.f32.vlgmr.msra.gmra.mrb[46].mxu0 %v16271_v14 }
0x19b1   :  { %23279 = vmatpush3.xpose.msra.mxu0 %v17124_v63  ;;  %23280 = vmatprep.mubr.msk.f32.mxu0 %vm25075_vm1, %v27351_v3 }
0x19b2   :  { %23283 = vmatprep.subr.mxu0 %v27351_v3 }
0x19b4   :  { %23281 = vmatmul.mubr.f32.vlgmr.msra.gmra.mrb[48].mxu0 %v17193_v61 }
0x19b5   :  { %23284 = vmatpush3.xpose.msra.mxu0 %v17204_v16  ;;  %23285 = vmatprep.mubr.msk.f32.mxu0 %vm25075_vm1, %v27351_v3 }
0x19b6   :  { %23288 = vmatprep.subr.mxu0 %v27351_v3 }
0x19bc   :  { %23286 = vmatmul.mubr.f32.vlgmr.msra.gmra.mrb[48].mxu0 %v17189_v57 }
0x19bd   :  { %23289 = vmatpush3.xpose.msra.mxu0 %v17201_v8  ;;  %23290 = vmatprep.mubr.msk.f32.mxu0 %vm25075_vm1, %v27351_v3 }
0x19be   :  { %23293 = vmatprep.subr.mxu0 %v27351_v3 }
0x19c4   :  { %23291 = vmatmul.mubr.f32.vlgmr.msra.gmra.mrb[48].mxu0 %v17190_v33 }
0x19c5   :  { %23294 = vmatpush3.xpose.msra.mxu0 %v17124_v63  ;;  %23295 = vmatprep.mubr.msk.f32.mxu0 %vm25075_vm1, %v27351_v3 }
0x19c6   :  { %23298 = vmatprep.subr.mxu0 %v27351_v3 }
0x19cc   :  { %23296 = vmatmul.mubr.f32.vlgmr.msra.gmra.mrb[48].mxu0 %v17191_v2 }
0x19cd   :  { %23299 = vmatpush3.xpose.msra.mxu0 %v17202_v59  ;;  %23300 = vmatprep.mubr.msk.f32.mxu0 %vm25075_vm1, %v27351_v3 }
0x19ce   :  { %23303 = vmatprep.subr.mxu0 %v27351_v3 }
0x19d4   :  { %23301 = vmatmul.mubr.f32.vlgmr.msra.gmra.mrb[48].mxu0 %v17189_v57 }
0x19d5   :  { %23304 = vmatpush3.xpose.msra.mxu0 %v17124_v63  ;;  %23305 = vmatprep.mubr.msk.f32.mxu0 %vm25075_vm1, %v27351_v3 }
0x19d6   :  { %23338 = vmatprep.subr.mxu0 %v27351_v3 }
0x19dc   :  { %23306 = vmatmul.mubr.f32.vlgmr.msra.gmra.mrb[48].mxu0 %v17189_v57 }
0x19dd   :  { %23339 = vmatpush3.xpose.msra.mxu0 %v18042_v21  ;;  %23340 = vmatprep.mubr.msk.f32.mxu0 %vm25075_vm1, %v27351_v3 }
0x19de   :  { %23343 = vmatprep.subr.mxu0 %v27351_v3 }
0x19e0   :  { %23341 = vmatmul.mubr.f32.vlgmr.msra.gmra.mrb[50].mxu0 %v18111_v41 }
0x19e1   :  { %23344 = vmatpush3.xpose.msra.mxu0 %v18122_v1  ;;  %23345 = vmatprep.mubr.msk.f32.mxu0 %vm25075_vm1, %v27351_v3 }
0x19e2   :  { %23348 = vmatprep.subr.mxu0 %v27351_v3 }
0x19e8   :  { %23346 = vmatmul.mubr.f32.vlgmr.msra.gmra.mrb[50].mxu0 %v18107_v19 }
0x19e9   :  { %23349 = vmatpush3.xpose.msra.mxu0 %v18119_v50  ;;  %23350 = vmatprep.mubr.msk.f32.mxu0 %vm25075_vm1, %v27351_v3 }
0x19ea   :  { %23353 = vmatprep.subr.mxu0 %v27351_v3 }
0x19f0   :  { %23351 = vmatmul.mubr.f32.vlgmr.msra.gmra.mrb[50].mxu0 %v18108_v43 }
0x19f1   :  { %23354 = vmatpush3.xpose.msra.mxu0 %v18042_v21  ;;  %23355 = vmatprep.mubr.msk.f32.mxu0 %vm25075_vm1, %v27351_v3 }
0x19f2   :  { %23358 = vmatprep.subr.mxu0 %v27351_v3 }
0x19f8   :  { %23356 = vmatmul.mubr.f32.vlgmr.msra.gmra.mrb[50].mxu0 %v18109_v58 }
0x19f9   :  { %23359 = vmatpush3.xpose.msra.mxu0 %v18120_v34  ;;  %23360 = vmatprep.mubr.msk.f32.mxu0 %vm25075_vm1, %v27351_v3 }
0x19fa   :  { %23363 = vmatprep.subr.mxu0 %v27351_v3 }
0x1a00   :  { %23361 = vmatmul.mubr.f32.vlgmr.msra.gmra.mrb[50].mxu0 %v18107_v19 }
0x1a01   :  { %23364 = vmatpush3.xpose.msra.mxu0 %v18042_v21  ;;  %23365 = vmatprep.mubr.msk.f32.mxu0 %vm25075_vm1, %v27351_v3 }
0x1a02   :  { %24088 = vmatprep.subr.bf16.mxu0 %v27352_v27 }
0x1a08   :  { %23366 = vmatmul.mubr.f32.vlgmr.msra.gmra.mrb[50].mxu0 %v18107_v19 }
0x1a09   :  { %24090 = vmatpush3.bf16.msra.mxu0 %v26670_v12  ;;  %23406 = vmatprep.mubr.msk.f32.mxu0 %vm25075_vm1, %v27351_v3 }
0x1a0a   :  { %24091 = vmatprep.subr.bf16.mxu0 %v27352_v27 }
0x1a0d   :  { %24093 = vmatpush3.bf16.msra.mxu0 %v26674_v54 }
0x1a0e   :  { %v14958_v13 = vpop.f32.mrb[48].mxu1  ;;  %24100 = vmatprep.subr.bf16.mxu0 %v27352_v27 }
0x1a0f   :  { %v23113_v39 = vpop.f32.mrb[49].mxu1 }
0x1a16   :  { %v15115_v60 = vpop.f32.mrb[50].mxu1  ;;  %v14867_v47 = vpop.f32.mrb[38].mxu0 }
0x1a17   :  { %v14959_v20 = vadd.f32 %v14958_v13, %v14867_v47  ;;  %v23135_v6 = vpop.f32.mrb[51].mxu1  ;;  %v23102_v31 = vpop.f32.mrb[39].mxu0 }
0x1a1e   :  { %v15038_v38 = vpop.f32.mrb[40].mxu0  ;;  %v15273_v51 = vpop.f32.mrb[52].mxu1 }
0x1a1f   :  { %v15039_v37 = vadd.f32 %v15038_v38, %v14959_v20  ;;  %v23124_v14 = vpop.f32.mrb[41].mxu0  ;;  %v23157_v0 = vpop.f32.mrb[53].mxu1 }
0x1a21   :  { %v15116_v23 = vadd.f32 %v15115_v60, %v15039_v37 }
0x1a26   :  { %v15198_v42 = vpop.f32.mrb[42].mxu0 }
0x1a27   :  { %v15199_v44 = vadd.f32 %v15198_v42, %v15116_v23  ;;  %v23146_v48 = vpop.f32.mrb[43].mxu0 }
0x1a29   :  { %v26812_v35 = vadd.f32 %v15273_v51, %v15199_v44 }
0x1a57   :  { %v15728_v22 = vpop.f32.mrb[44].mxu0 }
0x1a58   :  { %v15732_v26 = vsel %vm25394_vm3, %v15728_v22, -3.4028235e+38  ;;  %v23187_v53 = vpop.f32.mrb[45].mxu0 }
0x1a59   :  { %v15733_v40 = vsel %vm784_vm2, %v15732_v26, -inf }
0x1a5a   :  { %15734 = vmax.xlane.f32.xlu1 %v15733_v40 }
0x1a83   :  { %v16647_v45 = vpop.f32.mrb[46].mxu0 }
0x1a84   :  { %v16651_v56 = vsel %vm25394_vm3, %v16647_v45, -3.4028235e+38  ;;  %v23247_v10 = vpop.f32.mrb[47].mxu0 }
0x1a85   :  { %v16652_v57 = vsel %vm784_vm2, %v16651_v56, -inf }
0x1a86   :  { %16653 = vmax.xlane.f32.xlu0 %v16652_v57 }
0x1aaf   :  { %v17565_v63 = vpop.f32.mrb[48].mxu0 }
0x1ab0   :  { %v17569_v33 = vsel %vm25394_vm3, %v17565_v63, -3.4028235e+38  ;;  %v23307_v8 = vpop.f32.mrb[49].mxu0 }
0x1ab1   :  { %v17570_v2 = vsel %vm784_vm2, %v17569_v33, -inf }
0x1ab2   :  { %17571 = vmax.xlane.f32.xlu1 %v17570_v2 }
0x1adb   :  { %v18483_v59 = vpop.f32.mrb[50].mxu0 }
0x1adc   :  { %v18487_v32 = vsel %vm25394_vm3, %v18483_v59, -3.4028235e+38  ;;  %v23367_v49 = vpop.f32.mrb[51].mxu0 }
0x1add   :  { %v18488_v61 = vsel %vm784_vm2, %v18487_v32, -inf }
0x1ade   :  { %18489 = vmax.xlane.f32.xlu1 %v18488_v61 }
0x1ae7   :  { %v15735_v16 = vpop.xlane.xlu1 %15734 }
0x1ae8   :  { %v15736_v4 = vsub.f32 %v15732_v26, %v15735_v16 }
0x1aea   :  { %v15737_v28 = vmul.f32 1.442695, %v15736_v4 }
0x1aec   :  { %24887 = vpow2.f32 %v15737_v28 }
0x1af6   :  { %v24888_v30 = vpop.eup %24887 }
0x1af7   :  { %v15739_v36 = vsel %vm784_vm2, %v24888_v30, 0.0 }
0x1af8   :  { %15740 = vadd.xlane.f32.xlu0 %v15739_v36 }
0x1b0e   :  { %15745 = vrot.lane.b32.xlu0 %v26428_v15, %s25076_s16 }
0x1b13   :  { %v16654_v19 = vpop.xlane.xlu0 %16653 }
0x1b14   :  { %v16655_v21 = vsub.f32 %v16651_v56, %v16654_v19 }
0x1b16   :  { %v16656_v43 = vmul.f32 1.442695, %v16655_v21 }
0x1b18   :  { %24889 = vpow2.f32 %v16656_v43 }
0x1b22   :  { %v24890_v62 = vpop.eup %24889 }
0x1b23   :  { %v16658_v50 = vsel %vm784_vm2, %v24890_v62, 0.0 }
0x1b24   :  { %16659 = vadd.xlane.f32.xlu1 %v16658_v50 }
0x1b35   :  { %16663 = vrot.lane.b32.xlu1 %v26428_v15, %s25083_s7 }
0x1b39   :  { %17581 = vrot.lane.b32.xlu1 %v26428_v15, %s25084_s30 }
0x1b3f   :  { %v17572_v58 = vpop.xlane.xlu1 %17571 }
0x1b40   :  { %v17573_v34 = vsub.f32 %v17569_v33, %v17572_v58 }
0x1b42   :  { %v17574_v52 = vmul.f32 1.442695, %v17573_v34 }
0x1b44   :  { %24891 = vpow2.f32 %v17574_v52 }
0x1b4e   :  { %v26834_v5 = vpop.eup %24891 }
0x1b4f   :  { %v17576_v41 = vsel %vm784_vm2, %v26834_v5, 0.0 }
0x1b50   :  { %17577 = vadd.xlane.f32.xlu0 %v17576_v41 }
0x1b66   :  { %18499 = vrot.lane.b32.xlu0 %v26428_v15, %s25085_s22 }
0x1b6b   :  { %v18490_v1 = vpop.xlane.xlu1 %18489 }
0x1b6c   :  { %v18491_v13 = vsub.f32 %v18487_v32, %v18490_v1 }
0x1b6e   :  { %v18492_v39 = vmul.f32 1.442695, %v18491_v13 }
0x1b70   :  { %24893 = vpow2.f32 %v18492_v39 }
0x1b7a   :  { %v26840_v60 = vpop.eup %24893 }
0x1b7b   :  { %v18494_v47 = vsel %vm784_vm2, %v26840_v60, 0.0 }
0x1b7c   :  { %18495 = vadd.xlane.f32.xlu1 %v18494_v47 }
0x1b85   :  { %v15741_v20 = vpop.xlane.xlu0 %15740 }
0x1b86   :  { %24895 = vrcp.f32 %v15741_v20 }
0x1b89   :  { %v15746_v6 = vpop.permute.xlu0 %15745 }
0x1b8a   :  { %v15752_v31 = vand.u32 4294901760, %v15746_v6 }
0x1b8c   :  { %23189 = vmatpush3.msra.mxu1 %v15752_v31  ;;  %v15829_v15 = vsub.f32 %v15746_v6, %v15752_v31 }
0x1b8d   :  { %23193 = vmatprep.subr.mxu1 %v27351_v3 }
0x1b8e   :  { %v15830_v0 = vand.u32 4294901760, %v15829_v15 }
0x1b90   :  { %v24896_v38 = vpop.eup %24895  ;;  %v15831_v44 = vsub.f32 %v15829_v15, %v15830_v0 }
0x1b91   :  { %v15743_v51 = vmul.f32 %v24896_v38, %v24888_v30 }
0x1b92   :  { %v15832_v26 = vand.u32 4294901760, %v15831_v44 }
0x1b93   :  { %v15749_v37 = vsel %vm784_vm2, %v15743_v51, 0 }
0x1b94   :  { %v15817_v14 = vand.u32 4294901760, %v15749_v37 }
0x1b96   :  { %v15818_v23 = vsub.f32 %v15749_v37, %v15817_v14 }
0x1b98   :  { %v15819_v42 = vand.u32 4294901760, %v15818_v23 }
0x1b9a   :  { %v15820_v48 = vsub.f32 %v15818_v23, %v15819_v42 }
0x1b9c   :  { %v15821_v22 = vand.u32 4294901760, %v15820_v48 }
0x1b9e   :  { %23191 = vmatmul.mubr.f32.vlgmr.msra.gmra.mrb[54].mxu1 %v15821_v22 }
0x1b9f   :  { %23194 = vmatpush3.msra.mxu1 %v15832_v26  ;;  %23195 = vmatprep.mubr.msk.f32.mxu1 %vm25075_vm1, %v27351_v3 }
0x1ba0   :  { %23198 = vmatprep.subr.mxu1 %v27351_v3 }
0x1ba6   :  { %23196 = vmatmul.mubr.f32.vlgmr.msra.gmra.mrb[54].mxu1 %v15817_v14 }
0x1ba7   :  { %23199 = vmatpush3.msra.mxu1 %v15829_v15  ;;  %23200 = vmatprep.mubr.msk.f32.mxu1 %vm25075_vm1, %v27351_v3 }
0x1ba8   :  { %23203 = vmatprep.subr.mxu1 %v27351_v3 }
0x1bae   :  { %23201 = vmatmul.mubr.f32.vlgmr.msra.gmra.mrb[54].mxu1 %v15818_v23 }
0x1baf   :  { %23204 = vmatpush3.msra.mxu1 %v15752_v31  ;;  %23205 = vmatprep.mubr.msk.f32.mxu1 %vm25075_vm1, %v27351_v3 }
0x1bb0   :  { %23208 = vmatprep.subr.mxu1 %v27351_v3 }
0x1bb1   :  { %v16660_v53 = vpop.xlane.xlu1 %16659 }
0x1bb2   :  { %24897 = vrcp.f32 %v16660_v53 }
0x1bb5   :  { %v16664_v40 = vpop.permute.xlu1 %16663 }
0x1bb6   :  { %23206 = vmatmul.mubr.f32.vlgmr.msra.gmra.mrb[54].mxu1 %v15819_v42  ;;  %v16670_v45 = vand.u32 4294901760, %v16664_v40 }
0x1bb7   :  { %23209 = vmatpush3.msra.mxu1 %v15830_v0  ;;  %23210 = vmatprep.mubr.msk.f32.mxu1 %vm25075_vm1, %v27351_v3 }
0x1bb8   :  { %23213 = vmatprep.subr.mxu1 %v27351_v3  ;;  %v16747_v57 = vsub.f32 %v16664_v40, %v16670_v45 }
0x1bb9   :  { %v17582_v28 = vpop.permute.xlu1 %17581 }
0x1bba   :  { %v16748_v8 = vand.u32 4294901760, %v16747_v57  ;;  %v17588_v30 = vand.u32 4294901760, %v17582_v28 }
0x1bbc   :  { %v24898_v56 = vpop.eup %24897  ;;  %v16749_v32 = vsub.f32 %v16747_v57, %v16748_v8  ;;  %v17665_v19 = vsub.f32 %v17582_v28, %v17588_v30 }
0x1bbd   :  { %v16662_v10 = vmul.f32 %v24898_v56, %v24890_v62  ;;  %v26931_v56 = vadd.f32 %v26812_v35, %v25876_v7 }
0x1bbe   :  { %23211 = vmatmul.mubr.f32.vlgmr.msra.gmra.mrb[54].mxu1 %v15817_v14  ;;  %v16750_v16 = vand.u32 4294901760, %v16749_v32  ;;  %v17666_v50 = vand.u32 4294901760, %v17665_v19  ;;  %v21357_v32 = vld [vmem:[%s27339_s5 + $0x78] sm:$0xff] }
0x1bbf   :  { %23214 = vmatpush3.msra.mxu1 %v15752_v31  ;;  %23215 = vmatprep.mubr.msk.f32.mxu1 %vm25075_vm1, %v27351_v3  ;;  %v16667_v63 = vsel %vm784_vm2, %v16662_v10, 0 }
0x1bc0   :  { %23248 = vmatprep.subr.mxu1 %v27351_v3  ;;  %v16735_v33 = vand.u32 4294901760, %v16667_v63  ;;  %v17667_v52 = vsub.f32 %v17665_v19, %v17666_v50 }
0x1bc2   :  { %v16736_v2 = vsub.f32 %v16667_v63, %v16735_v33  ;;  %v17668_v1 = vand.u32 4294901760, %v17667_v52  ;;  %v21353_v63 = vld [vmem:[%s27339_s5 + $0x58] sm:$0xff] }
0x1bc3   :  { %v19490_v35 = vand.u32 4294901760, %v21353_v63 }
0x1bc4   :  { %v16737_v59 = vand.u32 4294901760, %v16736_v2 }
0x1bc6   :  { %23216 = vmatmul.mubr.f32.vlgmr.msra.gmra.mrb[54].mxu1 %v15817_v14  ;;  %v16738_v49 = vsub.f32 %v16736_v2, %v16737_v59 }
0x1bc7   :  { %23249 = vmatpush3.msra.mxu1 %v16670_v45  ;;  %23250 = vmatprep.mubr.msk.f32.mxu1 %vm25075_vm1, %v27351_v3 }
0x1bc8   :  { %23253 = vmatprep.subr.mxu1 %v27351_v3  ;;  %v16739_v61 = vand.u32 4294901760, %v16738_v49 }
0x1bca   :  { %23251 = vmatmul.mubr.f32.vlgmr.msra.gmra.mrb[56].mxu1 %v16739_v61 }
0x1bcb   :  { %23254 = vmatpush3.msra.mxu1 %v16750_v16  ;;  %23255 = vmatprep.mubr.msk.f32.mxu1 %vm25075_vm1, %v27351_v3  ;;  %v21354_v16 = vld [vmem:[%s27339_s5 + $0x60] sm:$0xff] }
0x1bcc   :  { %23258 = vmatprep.subr.mxu1 %v27351_v3 }
0x1bd2   :  { %23256 = vmatmul.mubr.f32.vlgmr.msra.gmra.mrb[56].mxu1 %v16735_v33 }
0x1bd3   :  { %23259 = vmatpush3.msra.mxu1 %v16747_v57  ;;  %23260 = vmatprep.mubr.msk.f32.mxu1 %vm25075_vm1, %v27351_v3  ;;  %v21351_v57 = vld [vmem:[%s27339_s5 + $0x48] sm:$0xff] }
0x1bd4   :  { %23263 = vmatprep.subr.mxu1 %v27351_v3  ;;  %v19486_v7 = vand.u32 4294901760, %v21351_v57 }
0x1bd6   :  { %v26960_v28 = vsub.f32 %v21351_v57, %v19486_v7 }
0x1bda   :  { %23261 = vmatmul.mubr.f32.vlgmr.msra.gmra.mrb[56].mxu1 %v16736_v2 }
0x1bdb   :  { %23264 = vmatpush3.msra.mxu1 %v16670_v45  ;;  %23265 = vmatprep.mubr.msk.f32.mxu1 %vm25075_vm1, %v27351_v3 }
0x1bdc   :  { %23268 = vmatprep.subr.mxu1 %v27351_v3 }
0x1bdd   :  { %v17578_v4 = vpop.xlane.xlu0 %17577 }
0x1bde   :  { %24899 = vrcp.f32 %v17578_v4  ;;  %v21356_v4 = vld [vmem:[%s27339_s5 + $0x70] sm:$0xff] }
0x1be1   :  { %v18500_v39 = vpop.permute.xlu0 %18499 }
0x1be2   :  { %23266 = vmatmul.mubr.f32.vlgmr.msra.gmra.mrb[56].mxu1 %v16737_v59  ;;  %v18506_v47 = vand.u32 4294901760, %v18500_v39  ;;  %v21355_v59 = vld [vmem:[%s27339_s5 + $0x68] sm:$0xff] }
0x1be3   :  { %23269 = vmatpush3.msra.mxu1 %v16748_v8  ;;  %23270 = vmatprep.mubr.msk.f32.mxu1 %vm25075_vm1, %v27351_v3  ;;  %v21352_v8 = vld [vmem:[%s27339_s5 + $0x50] sm:$0xff]  ;;  %v19494_v61 = vand.u32 4294901760, %v21355_v59 }
0x1be4   :  { %23273 = vmatprep.subr.mxu1 %v27351_v3  ;;  %v18583_v6 = vsub.f32 %v18500_v39, %v18506_v47  ;;  %v19492_v49 = vand.u32 4294901760, %v21352_v8 }
0x1be6   :  { %v18584_v15 = vand.u32 4294901760, %v18583_v6 }
0x1be8   :  { %v24900_v36 = vpop.eup %24899  ;;  %v18585_v0 = vsub.f32 %v18583_v6, %v18584_v15 }
0x1be9   :  { %v17580_v21 = vmul.f32 %v24900_v36, %v26834_v5 }
0x1bea   :  { %23271 = vmatmul.mubr.f32.vlgmr.msra.gmra.mrb[56].mxu1 %v16735_v33  ;;  %v18586_v42 = vand.u32 4294901760, %v18585_v0 }
0x1beb   :  { %23274 = vmatpush3.msra.mxu1 %v16670_v45  ;;  %23275 = vmatprep.mubr.msk.f32.mxu1 %vm25075_vm1, %v27351_v3  ;;  %v17585_v43 = vsel %vm784_vm2, %v17580_v21, 0  ;;  %v26966_v21 = vsub.f32 %v21352_v8, %v19492_v49 }
0x1bec   :  { %23308 = vmatprep.subr.mxu1 %v27351_v3  ;;  %v17653_v62 = vand.u32 4294901760, %v17585_v43 }
0x1bee   :  { %v17654_v58 = vsub.f32 %v17585_v43, %v17653_v62  ;;  %v26968_v43 = vsub.f32 %v21355_v59, %v19494_v61 }
0x1bf0   :  { %v17655_v34 = vand.u32 4294901760, %v17654_v58 }
0x1bf2   :  { %23276 = vmatmul.mubr.f32.vlgmr.msra.gmra.mrb[56].mxu1 %v16735_v33  ;;  %v17656_v41 = vsub.f32 %v17654_v58, %v17655_v34  ;;  %v21350_v33 = vld [vmem:[%s27339_s5 + $0x40] sm:$0xff] }
0x1bf3   :  { %23309 = vmatpush3.msra.mxu1 %v17588_v30  ;;  %23310 = vmatprep.mubr.msk.f32.mxu1 %vm25075_vm1, %v27351_v3  ;;  %v19488_v2 = vand.u32 4294901760, %v21350_v33 }
0x1bf4   :  { %23313 = vmatprep.subr.mxu1 %v27351_v3  ;;  %v17657_v5 = vand.u32 4294901760, %v17656_v41 }
0x1bf5   :  { %v26964_v36 = vsub.f32 %v21350_v33, %v19488_v2 }
0x1bf6   :  { %23311 = vmatmul.mubr.f32.vlgmr.msra.gmra.mrb[58].mxu1 %v17657_v5 }
0x1bf7   :  { %23314 = vmatpush3.msra.mxu1 %v17668_v1  ;;  %23315 = vmatprep.mubr.msk.f32.mxu1 %vm25075_vm1, %v27351_v3 }
0x1bf8   :  { %23318 = vmatprep.subr.mxu1 %v27351_v3 }
0x1bfe   :  { %23316 = vmatmul.mubr.f32.vlgmr.msra.gmra.mrb[58].mxu1 %v17653_v62 }
0x1bff   :  { %23319 = vmatpush3.msra.mxu1 %v17665_v19  ;;  %23320 = vmatprep.mubr.msk.f32.mxu1 %vm25075_vm1, %v27351_v3  ;;  %v19498_v19 = vand.u32 4294901760, %v21357_v32 }
0x1c00   :  { %23323 = vmatprep.subr.mxu1 %v27351_v3 }
0x1c06   :  { %23321 = vmatmul.mubr.f32.vlgmr.msra.gmra.mrb[58].mxu1 %v17654_v58  ;;  %v19500_v58 = vand.u32 4294901760, %v21356_v4 }
0x1c07   :  { %23324 = vmatpush3.msra.mxu1 %v17588_v30  ;;  %23325 = vmatprep.mubr.msk.f32.mxu1 %vm25075_vm1, %v27351_v3 }
0x1c08   :  { %23328 = vmatprep.subr.mxu1 %v27351_v3  ;;  %v26974_v52 = vsub.f32 %v21356_v4, %v19500_v58  ;;  %v19583_v4 = vand.u32 4294901760, %v26960_v28 }
0x1c09   :  { %v18496_v13 = vpop.xlane.xlu1 %18495 }
0x1c0a   :  { %24901 = vrcp.f32 %v18496_v13 }
0x1c0e   :  { %23326 = vmatmul.mubr.f32.vlgmr.msra.gmra.mrb[58].mxu1 %v17655_v34 }
0x1c0f   :  { %23329 = vmatpush3.msra.mxu1 %v17666_v50  ;;  %23330 = vmatprep.mubr.msk.f32.mxu1 %vm25075_vm1, %v27351_v3  ;;  %v19496_v50 = vand.u32 4294901760, %v21354_v16 }
0x1c10   :  { %23333 = vmatprep.subr.mxu1 %v27351_v3 }
0x1c11   :  { %v26972_v34 = vsub.f32 %v21354_v16, %v19496_v50 }
0x1c14   :  { %v24902_v20 = vpop.eup %24901 }
0x1c15   :  { %v18498_v31 = vmul.f32 %v24902_v20, %v26840_v60 }
0x1c16   :  { %23331 = vmatmul.mubr.f32.vlgmr.msra.gmra.mrb[58].mxu1 %v17653_v62 }
0x1c17   :  { %23334 = vmatpush3.msra.mxu1 %v17588_v30  ;;  %23335 = vmatprep.mubr.msk.f32.mxu1 %vm25075_vm1, %v27351_v3  ;;  %v18503_v38 = vsel %vm784_vm2, %v18498_v31, 0  ;;  %v26962_v30 = vsub.f32 %v21353_v63, %v19490_v35 }
0x1c18   :  { %23368 = vmatprep.subr.mxu1 %v27351_v3  ;;  %v18571_v51 = vand.u32 4294901760, %v18503_v38 }
0x1c1a   :  { %v18572_v37 = vsub.f32 %v18503_v38, %v18571_v51 }
0x1c1c   :  { %v18573_v14 = vand.u32 4294901760, %v18572_v37 }
0x1c1e   :  { %23336 = vmatmul.mubr.f32.vlgmr.msra.gmra.mrb[58].mxu1 %v17653_v62  ;;  %v18574_v23 = vsub.f32 %v18572_v37, %v18573_v14  ;;  %v26970_v62 = vsub.f32 %v21357_v32, %v19498_v19 }
0x1c1f   :  { %23369 = vmatpush3.msra.mxu1 %v18506_v47  ;;  %23370 = vmatprep.mubr.msk.f32.mxu1 %vm25075_vm1, %v27351_v3 }
0x1c20   :  { %23373 = vmatprep.subr.mxu1 %v27351_v3  ;;  %v18575_v60 = vand.u32 4294901760, %v18574_v23 }
0x1c22   :  { %23371 = vmatmul.mubr.f32.vlgmr.msra.gmra.mrb[60].mxu1 %v18575_v60 }
0x1c23   :  { %23374 = vmatpush3.msra.mxu1 %v18586_v42  ;;  %23375 = vmatprep.mubr.msk.f32.mxu1 %vm25075_vm1, %v27351_v3 }
0x1c24   :  { %23378 = vmatprep.subr.mxu1 %v27351_v3 }
0x1c2a   :  { %23376 = vmatmul.mubr.f32.vlgmr.msra.gmra.mrb[60].mxu1 %v18571_v51 }
0x1c2b   :  { %23379 = vmatpush3.msra.mxu1 %v18583_v6  ;;  %23380 = vmatprep.mubr.msk.f32.mxu1 %vm25075_vm1, %v27351_v3 }
0x1c2c   :  { %23383 = vmatprep.subr.mxu1 %v27351_v3 }
0x1c32   :  { %23381 = vmatmul.mubr.f32.vlgmr.msra.gmra.mrb[60].mxu1 %v18572_v37 }
0x1c33   :  { %23384 = vmatpush3.msra.mxu1 %v18506_v47  ;;  %23385 = vmatprep.mubr.msk.f32.mxu1 %vm25075_vm1, %v27351_v3 }
0x1c34   :  { %23388 = vmatprep.subr.mxu1 %v27351_v3 }
0x1c3a   :  { %23386 = vmatmul.mubr.f32.vlgmr.msra.gmra.mrb[60].mxu1 %v18573_v14 }
0x1c3b   :  { %23389 = vmatpush3.msra.mxu1 %v18584_v15  ;;  %23390 = vmatprep.mubr.msk.f32.mxu1 %vm25075_vm1, %v27351_v3 }
0x1c3c   :  { %23393 = vmatprep.subr.mxu1 %v27351_v3 }
0x1c42   :  { %23391 = vmatmul.mubr.f32.vlgmr.msra.gmra.mrb[60].mxu1 %v18571_v51 }
0x1c43   :  { %23394 = vmatpush3.msra.mxu1 %v18506_v47  ;;  %23395 = vmatprep.mubr.msk.f32.mxu1 %vm25075_vm1, %v27351_v3 }
0x1c44   :  { %24094 = vmatprep.subr.bf16.mxu1 %v27352_v27 }
0x1c4a   :  { %23396 = vmatmul.mubr.f32.vlgmr.msra.gmra.mrb[60].mxu1 %v18571_v51 }
0x1c4b   :  { %24096 = vmatpush3.bf16.msra.mxu1 %v26661_v25  ;;  %23417 = vmatprep.mubr.msk.f32.mxu1 %vm25075_vm1, %v27351_v3 }
0x1c4c   :  { %24097 = vmatprep.subr.bf16.mxu1 %v27352_v27 }
0x1c4f   :  { %24099 = vmatpush3.bf16.msra.mxu1 %v26666_v18  ;;  %v19455_v18 = vmul.f32 %v26931_v56, %v26931_v56 }
0x1c50   :  { %24106 = vmatprep.subr.bf16.mxu1 %v27352_v27 }
0x1c51   :  { %v19457_v10 = vsel %vm111_vm0, %v19455_v18, 0.0 }
0x1c99   :  { %v16193_v44 = vpop.f32.mrb[54].mxu1 }
0x1c9a   :  { %v23217_v48 = vpop.f32.mrb[55].mxu1 }
0x1cc5   :  { %v17111_v22 = vpop.f32.mrb[56].mxu1 }
0x1cc6   :  { %18952 = vrot.lane.b32.xlu1 %v17111_v22, %s25068_s18  ;;  %v23277_v26 = vpop.f32.mrb[57].mxu1 }
0x1cf1   :  { %v18029_v53 = vpop.f32.mrb[58].mxu1 }
0x1cf2   :  { %18956 = vrot.lane.b32.xlu0 %v18029_v53, %s25087_s23  ;;  %v23337_v40 = vpop.f32.mrb[59].mxu1 }
0x1d1d   :  { %v18947_v25 = vpop.f32.mrb[60].mxu1 }
0x1d1e   :  { %18960 = vrot.lane.b32.xlu0 %v18947_v25, %s25088_s24  ;;  %v23397_v45 = vpop.f32.mrb[61].mxu1 }
0x1d38   :  { %v18953_v41 = vpop.permute.xlu1 %18952 }
0x1d39   :  { %v18963_v1 = vsel %vm784_vm2, %v16193_v44, %v18953_v41  ;;  %v19584_v41 = vsub.f32 %v26960_v28, %v19583_v4 }
0x1d3d   :  { %19458 = vadd.xlane.f32.xlu0 %v19457_v10 }
0x1d64   :  { %v18957_v5 = vpop.permute.xlu0 %18956 }
0x1d65   :  { %v18964_v13 = vsel %vm4468_vm4, %v18963_v1, %v18957_v5 }
0x1d90   :  { %v18961_v39 = vpop.permute.xlu0 %18960 }
0x1d91   :  { %v18965_v47 = vsel %vm4470_vm5, %v18964_v13, %v18961_v39  ;;  %v19585_v13 = vand.u32 4294901760, %v19584_v41  ;;  %v21365_v41 = vld [vmem:[%s27340_s6 + $0x98] sm:$0xff] }
0x1d92   :  { %v18967_v20 = vsel %vm111_vm0, %v18965_v47, 0 }
0x1d93   :  { %v19038_v6 = vand.u32 4294901760, %v18967_v20 }
0x1d95   :  { %v19039_v31 = vsub.f32 %v18967_v20, %v19038_v6  ;;  %23418 = vmatmul.mubr.f32.vlgmr.msra.gmra.mrb[62].mxu1 %v19038_v6 }
0x1d96   :  { %24108 = vmatpush3.bf16.msra.mxu1 %v26670_v12  ;;  %23439 = vmatprep.mubr.msk.f32.mxu1 %vm25075_vm1, %v27351_v3 }
0x1d97   :  { %24109 = vmatprep.subr.bf16.mxu1 %v27352_v27  ;;  %v19040_v38 = vand.u32 4294901760, %v19039_v31 }
0x1d99   :  { %v19041_v51 = vsub.f32 %v19039_v31, %v19040_v38 }
0x1d9a   :  { %24111 = vmatpush3.bf16.msra.mxu1 %v26674_v54 }
0x1d9b   :  { %24118 = vmatprep.subr.bf16.mxu1 %v27352_v27  ;;  %v19042_v15 = vand.u32 4294901760, %v19041_v51  ;;  %v19619_v51 = vand.u32 4294901760, %v26970_v62 }
0x1d9d   :  { %23440 = vmatmul.mubr.f32.vlgmr.msra.gmra.mrb[64].mxu1 %v19040_v38  ;;  %23407 = vmatmul.mubr.f32.vlgmr.msra.gmra.mrb[52].mxu0 %v19042_v15  ;;  %v19607_v38 = vand.u32 4294901760, %v26968_v43  ;;  %v19613_v15 = vand.u32 4294901760, %v26972_v34 }
0x1d9e   :  { %24102 = vmatpush3.bf16.msra.mxu0 %v26678_v9  ;;  %24120 = vmatpush3.bf16.msra.mxu1 %v26670_v12  ;;  %v27001_v12 = vpack.c.bf16 %v19490_v35, %v19486_v7  ;;  %v27004_v9 = vpack.c.bf16 %v19492_v49, %v19488_v2 }
0x1d9f   :  { %24103 = vmatprep.subr.bf16.mxu0 %v27352_v27  ;;  %24121 = vmatprep.subr.bf16.mxu1 %v27352_v27 }
0x1da0   :  { %23428 = vmatprep.mubr.msk.f32.mxu0 %vm25075_vm1, %v27351_v3  ;;  %23461 = vmatprep.mubr.msk.f32.mxu1 %vm25075_vm1, %v27351_v3 }
0x1da2   :  { %24105 = vmatpush3.bf16.msra.mxu0 %v26681_v24  ;;  %24123 = vmatpush3.bf16.msra.mxu1 %v26674_v54  ;;  %v27007_v54 = vpack.c.bf16 %v19498_v19, %v19494_v61  ;;  %v27010_v24 = vpack.c.bf16 %v19500_v58, %v19496_v50  ;;  %v19595_v19 = vand.u32 4294901760, %v26962_v30  ;;  %v19589_v50 = vand.u32 4294901760, %v26964_v36 }
0x1da3   :  { %24112 = vmatprep.subr.bf16.mxu0 %v27352_v27  ;;  %v19601_v58 = vand.u32 4294901760, %v26966_v21 }
0x1da4   :  { %v19596_v5 = vsub.f32 %v26962_v30, %v19595_v19 }
0x1da5   :  { %23429 = vmatmul.mubr.f32.vlgmr.msra.gmra.mrb[54].mxu0 %v19039_v31  ;;  %23462 = vmatmul.mubr.f32.vlgmr.msra.gmra.mrb[66].mxu1 %v19038_v6  ;;  %v19602_v1 = vsub.f32 %v26966_v21, %v19601_v58 }
0x1da6   :  { %24114 = vmatpush3.bf16.msra.mxu0 %v26685_v11  ;;  %23450 = vmatprep.mubr.msk.f32.mxu0 %vm25075_vm1, %v27351_v3  ;;  %v19597_v39 = vand.u32 4294901760, %v19596_v5 }
0x1da7   :  { %24115 = vmatprep.subr.bf16.mxu0 %v27352_v27  ;;  %v19603_v20 = vand.u32 4294901760, %v19602_v1 }
0x1daa   :  { %24117 = vmatpush3.bf16.msra.mxu0 %v26689_v29 }
0x1dab   :  { %24125 = vmatprep.subr.bf16.mxu0 %v27001_v12 }
0x1dad   :  { %23451 = vmatmul.mubr.f32.vlgmr.msra.gmra.mrb[56].mxu0 %v19038_v6  ;;  %v24132_v6 = vpack.c.bf16 %v19597_v39, %v19585_v13 }
0x1dae   :  { %24127 = vmatpush1.bf16.msra.mxu0 %v27004_v9  ;;  %19558 = vmatprep.mubr.f32.mxu0 %v27351_v3 }
0x1daf   :  { %24129 = vmatprep.subr.bf16.mxu0 %v27007_v54 }
0x1db2   :  { %24131 = vmatpush1.bf16.msra.mxu0 %v27010_v24 }
0x1db3   :  { %24133 = vmatprep.subr.bf16.mxu0 %v24132_v6 }
0x1dca   :  { %v19459_v27 = vpop.xlane.xlu0 %19458 }
0x1dcb   :  { %v19463_v11 = vmul.f32 0.03125, %v19459_v27  ;;  %v19625_v27 = vand.u32 4294901760, %v26974_v52 }
0x1dcd   :  { %v19465_v29 = vadd.f32 1e-05, %v19463_v11  ;;  %v19608_v11 = vsub.f32 %v26968_v43, %v19607_v38 }
0x1dcf   :  { %24903 = vrsqrt.f32 %v19465_v29  ;;  %v19620_v29 = vsub.f32 %v26970_v62, %v19619_v51 }
0x1dd9   :  { %v24904_v37 = vpop.eup %24903 }
0x1dda   :  { %v19469_v14 = vmul.f32 %v24904_v37, %v26931_v56  ;;  %v19614_v37 = vsub.f32 %v26972_v34, %v19613_v15 }
0x1ddc   :  { %v19481_v0 = vsel %vm111_vm0, %v19469_v14, 0  ;;  %v19626_v14 = vsub.f32 %v26974_v52, %v19625_v27 }
0x1ddd   :  { %v27017_v23 = vand.u32 4294901760, %v19481_v0 }
0x1ddf   :  { %v27020_v60 = vsub.f32 %v19481_v0, %v27017_v23  ;;  %v19609_v0 = vand.u32 4294901760, %v19608_v11 }
0x1de1   :  { %v19561_v42 = vand.u32 4294901760, %v27020_v60 }
0x1de3   :  { %v19562_v44 = vsub.f32 %v27020_v60, %v19561_v42 }
0x1de5   :  { %v19563_v48 = vand.u32 4294901760, %v19562_v44  ;;  %v19621_v44 = vand.u32 4294901760, %v19620_v29 }
0x1de7   :  { %19564 = vmatmul.mubr.f32.vlgmr.msra.gmra.mrb[58].mxu0 %v19563_v48  ;;  %v19615_v48 = vand.u32 4294901760, %v19614_v37 }
0x1de8   :  { %19569 = vmatprep.mubr.f32.mxu0 %v27351_v3 }
0x1e68   :  { %v19135_v22 = vpop.f32.mrb[62].mxu1 }
0x1e69   :  { %v23419_v26 = vpop.f32.mrb[63].mxu1 }
0x1e6a   :  { %v24136_v26 = vpack.c.bf16 %v19621_v44, %v19609_v0 }
0x1e70   :  { %v19292_v53 = vpop.f32.mrb[64].mxu1  ;;  %v19044_v40 = vpop.f32.mrb[52].mxu0 }
0x1e71   :  { %v19136_v25 = vadd.f32 %v19135_v22, %v19044_v40  ;;  %v23441_v45 = vpop.f32.mrb[65].mxu1  ;;  %v23408_v18 = vpop.f32.mrb[53].mxu0  ;;  %v19627_v22 = vand.u32 4294901760, %v19626_v14  ;;  %v24140_v40 = vpack.c.bf16 %v26962_v30, %v26960_v28 }
0x1e72   :  { %v24144_v45 = vpack.c.bf16 %v26970_v62, %v26968_v43  ;;  %v24146_v18 = vpack.c.bf16 %v26974_v52, %v26972_v34  ;;  %v21358_v34 = vld [vmem:[%s27340_s6 + $0x60] sm:$0xff]  ;;  %v21359_v52 = vld [vmem:[%s27340_s6 + $0x68] sm:$0xff] }
0x1e78   :  { %v19215_v10 = vpop.f32.mrb[54].mxu0  ;;  %v19450_v57 = vpop.f32.mrb[66].mxu1 }
0x1e79   :  { %v19216_v63 = vadd.f32 %v19215_v10, %v19136_v25  ;;  %v23430_v33 = vpop.f32.mrb[55].mxu0  ;;  %v23463_v7 = vpop.f32.mrb[67].mxu1  ;;  %v24142_v25 = vpack.c.bf16 %v26966_v21, %v26964_v36  ;;  %v24156_v10 = vpack.c.bf16 %v19595_v19, %v19583_v4 }
0x1e7a   :  { %v24162_v33 = vpack.c.bf16 %v19625_v27, %v19613_v15  ;;  %v20151_v15 = vand.u32 4294901760, %v21365_v41 }
0x1e7b   :  { %v19293_v35 = vadd.f32 %v19292_v53, %v19216_v63  ;;  %v24138_v53 = vpack.c.bf16 %v19627_v22, %v19615_v48  ;;  %v24160_v63 = vpack.c.bf16 %v19619_v51, %v19607_v38 }
0x1e80   :  { %v19375_v8 = vpop.f32.mrb[56].mxu0 }
0x1e81   :  { %v19376_v2 = vadd.f32 %v19375_v8, %v19293_v35  ;;  %v23452_v59 = vpop.f32.mrb[57].mxu0 }
0x1e83   :  { %v19451_v32 = vadd.f32 %v19450_v57, %v19376_v2  ;;  %v24158_v57 = vpack.c.bf16 %v19601_v58, %v19589_v50  ;;  %v21364_v58 = vld [vmem:[%s27340_s6 + $0x90] sm:$0xff] }
0x1e84   :  { %v20148_v51 = vand.u32 4294901760, %v21364_v58 }
0x1e85   :  { %v27028_v49 = vadd.f32 %v19451_v32, %v25975_v17  ;;  %v19590_v17 = vsub.f32 %v26964_v36, %v19589_v50 }
0x1e86   :  { %v27149_v44 = vsub.f32 %v21364_v58, %v20148_v51 }
0x1e87   :  { %v19456_v61 = vmul.f32 %v27028_v49, %v27028_v49  ;;  %v19591_v47 = vand.u32 4294901760, %v19590_v17 }
0x1e89   :  { %v19460_v16 = vsel %vm111_vm0, %v19456_v61, 0.0  ;;  %v24134_v31 = vpack.c.bf16 %v19603_v20, %v19591_v47 }
0x1e8a   :  { %19461 = vadd.xlane.f32.xlu1 %v19460_v16 }
0x1e8b   :  { %24135 = vmatpush1.bf16.msra.mxu0 %v24134_v31 }
0x1e8c   :  { %24137 = vmatprep.subr.bf16.mxu0 %v24136_v26 }
0x1e8f   :  { %24139 = vmatpush1.bf16.msra.mxu0 %v24138_v53 }
0x1e90   :  { %24141 = vmatprep.subr.bf16.mxu0 %v24140_v40 }
0x1f17   :  { %v19462_v7 = vpop.xlane.xlu1 %19461 }
0x1f18   :  { %v19464_v35 = vmul.f32 0.03125, %v19462_v7 }
0x1f1a   :  { %v19466_v8 = vadd.f32 1e-05, %v19464_v35 }
0x1f1c   :  { %24905 = vrsqrt.f32 %v19466_v8 }
0x1f26   :  { %v24906_v2 = vpop.eup %24905 }
0x1f27   :  { %v19470_v28 = vmul.f32 %v24906_v2, %v27028_v49 }
0x1f29   :  { %v19484_v30 = vsel %vm111_vm0, %v19470_v28, 0 }
0x1f2a   :  { %v19570_v36 = vand.u32 4294901760, %v19484_v30 }
0x1f2c   :  { %v19571_v21 = vsub.f32 %v19484_v30, %v19570_v36 }
0x1f2e   :  { %v19572_v59 = vand.u32 4294901760, %v19571_v21 }
0x1f30   :  { %v19573_v43 = vsub.f32 %v19571_v21, %v19572_v59 }
0x1f32   :  { %v19574_v62 = vand.u32 4294901760, %v19573_v43 }
0x1f34   :  { %19575 = vmatmul.mubr.f32.gmra.mrb[60].mxu0 %v19574_v62 }
0x1f35   :  { %19685 = vmatprep.mubr.f32.mxu0 %v27351_v3 }
0x1f38   :  { %19687 = vmatmul.mubr.f32.vlgmr.msra.gmra.mrb[58].mxu0 %v27017_v23 }
0x1f39   :  { %24143 = vmatpush1.bf16.msra.mxu0 %v24142_v25  ;;  %19692 = vmatprep.mubr.f32.mxu0 %v27351_v3  ;;  %v20271_v25 = vand.u32 4294901760, %v27149_v44 }
0x1f3a   :  { %24145 = vmatprep.subr.bf16.mxu0 %v24144_v45  ;;  %v27155_v45 = vsub.f32 %v21365_v41, %v20151_v15 }
0x1f3b   :  { %v20272_v7 = vsub.f32 %v27149_v44, %v20271_v25 }
0x1f3c   :  { %19694 = vmatmul.mubr.f32.gmra.mrb[60].mxu0 %v19570_v36  ;;  %v20278_v35 = vand.u32 4294901760, %v27155_v45 }
0x1f3d   :  { %24147 = vmatpush1.bf16.msra.mxu0 %v24146_v18  ;;  %19780 = vmatprep.mubr.f32.mxu0 %v27351_v3  ;;  %v20273_v28 = vand.u32 4294901760, %v20272_v7 }
0x1f3e   :  { %24149 = vmatprep.subr.bf16.mxu0 %v27001_v12  ;;  %v20279_v8 = vsub.f32 %v27155_v45, %v20278_v35 }
0x1f40   :  { %19783 = vmatmul.mubr.f32.vlgmr.msra.gmra.mrb[58].mxu0 %v27020_v60  ;;  %v21363_v60 = vld [vmem:[%s27340_s6 + $0x88] sm:$0xff]  ;;  %v20280_v30 = vand.u32 4294901760, %v20279_v8 }
0x1f41   :  { %24151 = vmatpush1.bf16.msra.mxu0 %v27004_v9  ;;  %19788 = vmatprep.mubr.f32.mxu0 %v27351_v3  ;;  %v20145_v61 = vand.u32 4294901760, %v21363_v60 }
0x1f42   :  { %24153 = vmatprep.subr.bf16.mxu0 %v27007_v54 }
0x1f43   :  { %v27126_v6 = vsub.f32 %v21363_v60, %v20145_v61 }
0x1f44   :  { %19791 = vmatmul.mubr.f32.gmra.mrb[60].mxu0 %v19571_v21  ;;  %v21366_v21 = vld [vmem:[%s27340_s6 + $0xa0] sm:$0xff] }
0x1f45   :  { %24155 = vmatpush1.bf16.msra.mxu0 %v27010_v24  ;;  %19869 = vmatprep.mubr.f32.mxu0 %v27351_v3  ;;  %v20264_v37 = vand.u32 4294901760, %v27126_v6  ;;  %v20154_v43 = vand.u32 4294901760, %v21366_v21 }
0x1f46   :  { %24157 = vmatprep.subr.bf16.mxu0 %v24156_v10 }
0x1f47   :  { %v20265_v53 = vsub.f32 %v27126_v6, %v20264_v37 }
0x1f48   :  { %19873 = vmatmul.mubr.f32.vlgmr.msra.gmra.mrb[58].mxu0 %v19561_v42 }
0x1f49   :  { %24159 = vmatpush1.bf16.msra.mxu0 %v24158_v57  ;;  %19878 = vmatprep.mubr.f32.mxu0 %v27351_v3  ;;  %v20266_v57 = vand.u32 4294901760, %v20265_v53 }
0x1f4a   :  { %24161 = vmatprep.subr.bf16.mxu0 %v24160_v63  ;;  %v27158_v63 = vpack.c.bf16 %v20151_v15, %v20148_v51 }
0x1f4c   :  { %19882 = vmatmul.mubr.f32.gmra.mrb[60].mxu0 %v19572_v59  ;;  %v21367_v59 = vld [vmem:[%s27340_s6 + $0xa8] sm:$0xff] }
0x1f4d   :  { %24163 = vmatpush1.bf16.msra.mxu0 %v24162_v33  ;;  %19976 = vmatprep.mubr.f32.mxu0 %v27351_v3  ;;  %v20157_v62 = vand.u32 4294901760, %v21367_v59 }
0x1f4e   :  { %24165 = vmatprep.subr.bf16.mxu0 %v27001_v12  ;;  %v21360_v12 = vld [vmem:[%s27340_s6 + $0x70] sm:$0xff] }
0x1f50   :  { %19978 = vmatmul.mubr.f32.vlgmr.msra.gmra.mrb[58].mxu0 %v27017_v23 }
0x1f51   :  { %24167 = vmatpush1.bf16.msra.mxu0 %v27004_v9  ;;  %19983 = vmatprep.mubr.f32.mxu0 %v27351_v3  ;;  %v20130_v9 = vand.u32 4294901760, %v21358_v34 }
0x1f52   :  { %24169 = vmatprep.subr.bf16.mxu0 %v27007_v54  ;;  %v20133_v54 = vand.u32 4294901760, %v21359_v52 }
0x1f53   :  { %v27103_v4 = vsub.f32 %v21358_v34, %v20130_v9  ;;  %v27177_v34 = vsub.f32 %v21366_v21, %v20154_v43 }
0x1f54   :  { %19985 = vmatmul.mubr.f32.gmra.mrb[60].mxu0 %v19570_v36  ;;  %v27101_v16 = vpack.c.bf16 %v20133_v54, %v20130_v9  ;;  %v27105_v19 = vsub.f32 %v21359_v52, %v20133_v54  ;;  %v27179_v52 = vsub.f32 %v21367_v59, %v20157_v62  ;;  %v21369_v9 = vld [vmem:[%s27340_s6 + $0xb8] sm:$0xff] }
0x1f55   :  { %24171 = vmatpush1.bf16.msra.mxu0 %v27010_v24  ;;  %20063 = vmatprep.mubr.f32.mxu0 %v27351_v3  ;;  %v21361_v24 = vld [vmem:[%s27340_s6 + $0x78] sm:$0xff]  ;;  %v20229_v39 = vand.u32 4294901760, %v27103_v4  ;;  %v20285_v54 = vand.u32 4294901760, %v27177_v34 }
0x1f56   :  { %v20139_v42 = vand.u32 4294901760, %v21361_v24  ;;  %v20236_v47 = vand.u32 4294901760, %v27105_v19  ;;  %24173 = vmatprep.subr.bf16.mxu0 %v27101_v16 }
0x1f57   :  { %v20230_v27 = vsub.f32 %v27103_v4, %v20229_v39  ;;  %v20286_v60 = vsub.f32 %v27177_v34, %v20285_v54 }
0x1f58   :  { %20065 = vmatmul.mubr.f32.vlgmr.msra.gmra.mrb[58].mxu0 %v27017_v23  ;;  %v21362_v23 = vld [vmem:[%s27340_s6 + $0x80] sm:$0xff]  ;;  %v27117_v17 = vsub.f32 %v21361_v24, %v20139_v42  ;;  %v20237_v11 = vsub.f32 %v27105_v19, %v20236_v47  ;;  %v20292_v24 = vand.u32 4294901760, %v27179_v52 }
0x1f59   :  { %20070 = vmatprep.mubr.f32.mxu0 %v27351_v3  ;;  %v20136_v3 = vand.u32 4294901760, %v21360_v12  ;;  %v20142_v32 = vand.u32 4294901760, %v21362_v23  ;;  %24175 = vmatpush3.bf16.msra.mxu0 %v27101_v16  ;;  %v20231_v48 = vand.u32 4294901760, %v20230_v27  ;;  %v20287_v58 = vand.u32 4294901760, %v20286_v60 }
0x1f5a   :  { %v20250_v31 = vand.u32 4294901760, %v27117_v17  ;;  %v20238_v22 = vand.u32 4294901760, %v20237_v11 }
0x1f5b   :  { %v27107_v50 = vsub.f32 %v21360_v12, %v20136_v3  ;;  %v27115_v5 = vpack.c.bf16 %v20139_v42, %v20136_v3  ;;  %v27119_v1 = vpack.c.bf16 %v20145_v61, %v20142_v32  ;;  %v27121_v13 = vsub.f32 %v21362_v23, %v20142_v32  ;;  %v21368_v12 = vld [vmem:[%s27340_s6 + $0xb0] sm:$0xff]  ;;  %s25089_s6 = smov [#allocation11]  }
0x1f5c   :  { %20072 = vmatmul.mubr.f32.gmra.mrb[60].mxu0 %v19570_v36  ;;  %v20251_v14 = vsub.f32 %v27117_v17, %v20250_v31  ;;  %v24196_v18 = vpack.c.bf16 %v20238_v22, %v20231_v48  ;;  %v24208_v36 = vpack.c.bf16 %v20280_v30, %v20273_v28  ;;  %v20160_v3 = vand.u32 4294901760, %v21368_v12 }
0x1f5d   :  { %v20243_v20 = vand.u32 4294901760, %v27107_v50  ;;  %v20257_v38 = vand.u32 4294901760, %v27121_v13  ;;  %24177 = vmatprep.subr.bf16.mxu0 %v27115_v5  ;;  %v20163_v23 = vand.u32 4294901760, %v21369_v9  ;;  %v20293_v42 = vsub.f32 %v27179_v52, %v20292_v24 }
0x1f5e   :  { %v20252_v40 = vand.u32 4294901760, %v20251_v14  ;;  %24179 = vmatpush3.bf16.msra.mxu0 %v27115_v5  ;;  %24197 = vmatprep.subr.bf16.mxu1 %v24196_v18  ;;  %v27195_v32 = vsub.f32 %v21368_v12, %v20160_v3  ;;  %v27207_v22 = vpack.c.bf16 %v20157_v62, %v20154_v43 }
0x1f5f   :  { %v20244_v29 = vsub.f32 %v27107_v50, %v20243_v20  ;;  %v20258_v0 = vsub.f32 %v27121_v13, %v20257_v38  ;;  %24181 = vmatprep.subr.bf16.mxu0 %v27119_v1  ;;  %24199 = vmatpush3.bf16.msra.mxu1 %v24196_v18  ;;  %v27197_v61 = vsub.f32 %v21369_v9, %v20163_v23  ;;  %v20294_v41 = vand.u32 4294901760, %v20293_v42 }
0x1f60   :  { %v20299_v51 = vand.u32 4294901760, %v27195_v32  ;;  %v27214_v18 = vpack.c.bf16 %v20163_v23, %v20160_v3 }
0x1f61   :  { %v20245_v26 = vand.u32 4294901760, %v20244_v29  ;;  %v20259_v10 = vand.u32 4294901760, %v20258_v0  ;;  %v20306_v15 = vand.u32 4294901760, %v27197_v61  ;;  %v24212_v27 = vpack.c.bf16 %v20294_v41, %v20287_v58 }
0x1f62   :  { %24183 = vmatpush3.bf16.msra.mxu0 %v27119_v1  ;;  %v20300_v11 = vsub.f32 %v27195_v32, %v20299_v51  ;;  %v24240_v7 = vpack.c.bf16 %v27197_v61, %v27195_v32 }
0x1f63   :  { %v24200_v33 = vpack.c.bf16 %v20252_v40, %v20245_v26  ;;  %v24204_v2 = vpack.c.bf16 %v20266_v57, %v20259_v10  ;;  %24185 = vmatprep.subr.bf16.mxu0 %v27158_v63  ;;  %v20307_v29 = vsub.f32 %v27197_v61, %v20306_v15  ;;  %v24220_v26 = vpack.c.bf16 %v27105_v19, %v27103_v4 }
0x1f64   :  { %v20301_v14 = vand.u32 4294901760, %v20300_v11  ;;  %v24276_v4 = vpack.c.bf16 %v20264_v37, %v20257_v38  ;;  %v24280_v19 = vpack.c.bf16 %v20278_v35, %v20271_v25 }
0x1f65   :  { %24201 = vmatprep.subr.bf16.mxu1 %v24200_v33  ;;  %v20308_v0 = vand.u32 4294901760, %v20307_v29 }
0x1f66   :  { %24203 = vmatpush3.bf16.msra.mxu1 %v24200_v33  ;;  %24187 = vmatpush3.bf16.msra.mxu0 %v27158_v63  ;;  %v24236_v33 = vpack.c.bf16 %v27179_v52, %v27177_v34  ;;  %v20783_v34 = vld [vmem:[#allocation10] sm:$0xff]  ;;  %v20784_v52 = vld [vmem:[#allocation10 + $0x8] sm:$0xff] }
0x1f67   :  { %24205 = vmatprep.subr.bf16.mxu1 %v24204_v2  ;;  %v24216_v48 = vpack.c.bf16 %v20308_v0, %v20301_v14  ;;  %24189 = vmatprep.subr.bf16.mxu0 %v27207_v22 }
0x1f6a   :  { %24207 = vmatpush3.bf16.msra.mxu1 %v24204_v2  ;;  %24191 = vmatpush3.bf16.msra.mxu0 %v27207_v22 }
0x1f6b   :  { %24209 = vmatprep.subr.bf16.mxu1 %v24208_v36  ;;  %24193 = vmatprep.subr.bf16.mxu0 %v27214_v18 }
0x1f6e   :  { %24211 = vmatpush3.bf16.msra.mxu1 %v24208_v36  ;;  %24195 = vmatpush3.bf16.msra.mxu0 %v27214_v18 }
0x1f6f   :  { %24213 = vmatprep.subr.bf16.mxu1 %v24212_v27 }
0x1f72   :  { %24215 = vmatpush3.bf16.msra.mxu1 %v24212_v27 }
0x1f73   :  { %24217 = vmatprep.subr.bf16.mxu1 %v24216_v48 }
0x1f76   :  { %24219 = vmatpush3.bf16.msra.mxu1 %v24216_v48 }
0x1f77   :  { %24221 = vmatprep.subr.bf16.mxu1 %v24220_v26 }
0x202b   :  { %v20066_v53 = vpop.f32.mrb[58].mxu0 }
0x202c   :  { %20096 = vrot.lane.b32.xlu0 %v20066_v53, %s25074_s15  ;;  %v20068_v40 = vpop.f32.mrb[59].mxu0  ;;  %v20078_v8 = vsub.f32 0.0, %v20066_v53 }
0x202d   :  { %20098 = vrot.lane.b32.xlu1 %v20068_v40, %s25074_s15 }
0x202e   :  { %v20080_v2 = vmul.f32 1.442695, %v20078_v8 }
0x202f   :  { %v20073_v10 = vpop.f32.mrb[60].mxu0 }
0x2030   :  { %20100 = vrot.lane.b32.xlu0 %v20073_v10, %s25074_s15  ;;  %v20075_v57 = vpop.f32.mrb[61].mxu0  ;;  %v20079_v28 = vsub.f32 0.0, %v20073_v10  ;;  %24907 = vpow2.f32 %v20080_v2 }
0x2031   :  { %20102 = vrot.lane.b32.xlu1 %v20075_v57, %s25074_s15  ;;  %v24224_v57 = vpack.c.bf16 %v27117_v17, %v27107_v50  ;;  %v24284_v50 = vpack.c.bf16 %v20292_v24, %v20285_v54  ;;  %v24288_v17 = vpack.c.bf16 %v20306_v15, %v20299_v51  ;;  %v20785_v54 = vld [vmem:[#allocation10 + $0x10] sm:$0xff]  ;;  %v20797_v24 = vand.u32 4294901760, %v20784_v52  ;;  %s21328_s15 = sshll.u32 %s25089_s6, 4  ;;  %s21329_s15 = int_to_ptr.vmem [resolvable:$true] %s21328_s15 }
0x2032   :  { %v20082_v30 = vmul.f32 1.442695, %v20079_v28  ;;  %v20800_v32 = vand.u32 4294901760, %v20785_v54  ;;  %s25035_s26 = scalar_lea.vmem %s21329_s15, 256  ;;  %p25040_p13 = scmp.lt.s32.totalorder %s21329_s15, %s21329_s15 }
0x2033   :  { %v20891_v15 = vsub.f32 %v20784_v52, %v20797_v24  ;;  %p25036_p12 = scmp.ne.s32.totalorder %s21329_s15, %s25035_s26  ;;  %p25041_p0 = scmp.lt.s32.totalorder %s25035_s26, %s25035_s26 }
0x2034   :  { %24909 = vpow2.f32 %v20082_v30 }
0x2035   :  { %p25042_p1 = por %p25041_p0, %p25040_p13 }
0x2037   :  { %p25043_p2 = pnand %p25042_p1, %p25036_p12 }
0x203a   :  { %v24908_v36 = vpop.eup %24907 }
0x203b   :  { %v20084_v21 = vadd.f32 1.0, %v24908_v36  ;;  %v24228_v36 = vpack.c.bf16 %v27126_v6, %v27121_v13 }
0x203d   :  { %24911 = vrcp.f32 %v20084_v21 }
0x203e   :  { %v24910_v59 = vpop.eup %24909 }
0x203f   :  { %v20085_v43 = vadd.f32 1.0, %v24910_v59 }
0x2041   :  { %24913 = vrcp.f32 %v20085_v43  ;;  %v24232_v43 = vpack.c.bf16 %v27155_v45, %v27149_v44 }
0x2047   :  { %v24912_v62 = vpop.eup %24911 }
0x2048   :  { %v20090_v9 = vmul.f32 %v24912_v62, %v20066_v53 }
0x204b   :  { %v24914_v23 = vpop.eup %24913 }
0x204c   :  { %v20091_v41 = vmul.f32 %v24914_v23, %v20073_v10 }
0x209e   :  { %v20097_v12 = vpop.permute.xlu0 %20096 }
0x209f   :  { %v20099_v3 = vpop.permute.xlu1 %20098 }
0x20a0   :  { %v20104_v60 = vsel %vm111_vm0, %v20097_v12, %v20099_v3  ;;  %v20898_v12 = vsub.f32 %v20785_v54, %v20800_v32 }
0x20a1   :  { %v20108_v42 = vmul.f32 %v20104_v60, %v20090_v9 }
0x20a2   :  { %v20101_v58 = vpop.permute.xlu0 %20100  ;;  %v20899_v60 = vand.u32 4294901760, %v20898_v12 }
0x20a3   :  { %v20124_v27 = vsel %vm9804_vm6, %v20108_v42, 0  ;;  %v20103_v11 = vpop.permute.xlu1 %20102 }
0x20a4   :  { %v27227_v29 = vand.u32 4294901760, %v20124_v27  ;;  %v20105_v14 = vsel %vm111_vm0, %v20101_v58, %v20103_v11 }
0x20a5   :  { %v20109_v0 = vmul.f32 %v20105_v14, %v20091_v41  ;;  %v20900_v41 = vsub.f32 %v20898_v12, %v20899_v60 }
0x20a6   :  { %23515 = vmatprep.mubr.f32.mxu1 %v27227_v29  ;;  %v20207_v48 = vsub.f32 %v20124_v27, %v27227_v29 }
0x20a7   :  { %v20127_v53 = vsel %vm9804_vm6, %v20109_v0, 0  ;;  %v20901_v11 = vand.u32 4294901760, %v20900_v41 }
0x20a8   :  { %v27233_v40 = vand.u32 4294901760, %v20127_v53  ;;  %v20208_v10 = vand.u32 4294901760, %v20207_v48 }
0x20aa   :  { %v20217_v8 = vsub.f32 %v20127_v53, %v27233_v40  ;;  %23516 = vmatmul.mubr.f32.vlgmr.msra.gmra.mrb[68].mxu1 %v27233_v40  ;;  %v20209_v2 = vsub.f32 %v20207_v48, %v20208_v10 }
0x20ab   :  { %24223 = vmatpush3.bf16.msra.mxu1 %v24220_v26  ;;  %23542 = vmatprep.mubr.f32.mxu1 %v20207_v48  ;;  %v24268_v26 = vpack.c.bf16 %v20236_v47, %v20229_v39 }
0x20ac   :  { %v20218_v28 = vand.u32 4294901760, %v20217_v8  ;;  %24225 = vmatprep.subr.bf16.mxu1 %v24224_v57  ;;  %v20210_v30 = vand.u32 4294901760, %v20209_v2 }
0x20ae   :  { %v20219_v21 = vsub.f32 %v20217_v8, %v20218_v28  ;;  %23488 = vmatprep.mubr.f32.mxu0 %v20210_v30 }
0x20af   :  { %24227 = vmatpush3.bf16.msra.mxu1 %v24224_v57 }
0x20b0   :  { %v20220_v59 = vand.u32 4294901760, %v20219_v21  ;;  %24229 = vmatprep.subr.bf16.mxu1 %v24228_v36 }
0x20b2   :  { %23489 = vmatmul.mubr.f32.vlgmr.msra.gmra.mrb[62].mxu0 %v20220_v59 }
0x20b3   :  { %24231 = vmatpush3.bf16.msra.mxu1 %v24228_v36 }
0x20b4   :  { %24233 = vmatprep.subr.bf16.mxu1 %v24232_v43 }
0x20b7   :  { %24235 = vmatpush3.bf16.msra.mxu1 %v24232_v43 }
0x20b8   :  { %24237 = vmatprep.subr.bf16.mxu1 %v24236_v33 }
0x20bb   :  { %24239 = vmatpush3.bf16.msra.mxu1 %v24236_v33  ;;  %v24272_v33 = vpack.c.bf16 %v20250_v31, %v20243_v20 }
0x20bc   :  { %24241 = vmatprep.subr.bf16.mxu1 %v24240_v7 }
0x20bf   :  { %24243 = vmatpush3.bf16.msra.mxu1 %v24240_v7 }
0x20c0   :  { %24245 = vmatprep.subr.bf16.mxu1 %v27101_v16 }
0x20c2   :  { %23543 = vmatmul.mubr.f32.vlgmr.msra.gmra.mrb[68].mxu1 %v20217_v8 }
0x20c3   :  { %24247 = vmatpush3.bf16.msra.mxu1 %v27101_v16  ;;  %23569 = vmatprep.mubr.f32.mxu1 %v20208_v10 }
0x20c4   :  { %24249 = vmatprep.subr.bf16.mxu1 %v27115_v5 }
0x20c7   :  { %24251 = vmatpush3.bf16.msra.mxu1 %v27115_v5 }
0x20c8   :  { %24253 = vmatprep.subr.bf16.mxu1 %v27119_v1 }
0x20cb   :  { %24255 = vmatpush3.bf16.msra.mxu1 %v27119_v1 }
0x20cc   :  { %24257 = vmatprep.subr.bf16.mxu1 %v27158_v63 }
0x20cf   :  { %24259 = vmatpush3.bf16.msra.mxu1 %v27158_v63 }
0x20d0   :  { %24261 = vmatprep.subr.bf16.mxu1 %v27207_v22 }
0x20d3   :  { %24263 = vmatpush3.bf16.msra.mxu1 %v27207_v22 }
0x20d4   :  { %24265 = vmatprep.subr.bf16.mxu1 %v27214_v18 }
0x20d7   :  { %24267 = vmatpush3.bf16.msra.mxu1 %v27214_v18 }
0x20d8   :  { %24269 = vmatprep.subr.bf16.mxu1 %v24268_v26 }
0x20da   :  { %23570 = vmatmul.mubr.f32.vlgmr.msra.gmra.mrb[68].mxu1 %v20218_v28 }
0x20db   :  { %24271 = vmatpush3.bf16.msra.mxu1 %v24268_v26  ;;  %23596 = vmatprep.mubr.f32.mxu1 %v27227_v29 }
0x20dc   :  { %24273 = vmatprep.subr.bf16.mxu1 %v24272_v33 }
0x20df   :  { %24275 = vmatpush3.bf16.msra.mxu1 %v24272_v33 }
0x20e0   :  { %24277 = vmatprep.subr.bf16.mxu1 %v24276_v4 }
0x20e3   :  { %24279 = vmatpush3.bf16.msra.mxu1 %v24276_v4 }
0x20e4   :  { %24281 = vmatprep.subr.bf16.mxu1 %v24280_v19 }
0x20e7   :  { %24283 = vmatpush3.bf16.msra.mxu1 %v24280_v19 }
0x20e8   :  { %24285 = vmatprep.subr.bf16.mxu1 %v24284_v50 }
0x20eb   :  { %24287 = vmatpush3.bf16.msra.mxu1 %v24284_v50 }
0x20ec   :  { %24289 = vmatprep.subr.bf16.mxu1 %v24288_v17 }
0x20ef   :  { %24291 = vmatpush3.bf16.msra.mxu1 %v24288_v17 }
0x20f0   :  { %24293 = vmatprep.subr.bf16.mxu1 %v27101_v16 }
0x20f2   :  { %23597 = vmatmul.mubr.f32.vlgmr.msra.gmra.mrb[68].mxu1 %v27233_v40 }
0x20f3   :  { %24295 = vmatpush3.bf16.msra.mxu1 %v27101_v16  ;;  %23623 = vmatprep.mubr.f32.mxu1 %v27227_v29 }
0x20f4   :  { %24297 = vmatprep.subr.bf16.mxu1 %v27115_v5 }
0x20f7   :  { %24299 = vmatpush3.bf16.msra.mxu1 %v27115_v5 }
0x20f8   :  { %24301 = vmatprep.subr.bf16.mxu1 %v27119_v1 }
0x20fb   :  { %24303 = vmatpush3.bf16.msra.mxu1 %v27119_v1 }
0x20fc   :  { %24305 = vmatprep.subr.bf16.mxu1 %v27158_v63 }
0x20ff   :  { %24307 = vmatpush3.bf16.msra.mxu1 %v27158_v63 }
0x2100   :  { %24309 = vmatprep.subr.bf16.mxu1 %v27207_v22 }
0x2103   :  { %24311 = vmatpush3.bf16.msra.mxu1 %v27207_v22 }
0x2104   :  { %24313 = vmatprep.subr.bf16.mxu1 %v27214_v18 }
0x2107   :  { %24315 = vmatpush3.bf16.msra.mxu1 %v27214_v18  ;;  %v20892_v18 = vand.u32 4294901760, %v20891_v15 }
0x2109   :  { %v20893_v62 = vsub.f32 %v20891_v15, %v20892_v18 }
0x210a   :  { %23624 = vmatmul.mubr.f32.vlgmr.msra.gmra.mrb[68].mxu1 %v27233_v40 }
0x210b   :  { %v20894_v23 = vand.u32 4294901760, %v20893_v62 }
0x2185   :  { %v23490_v16 = vpop.f32.mrb[62].mxu0 }
0x2186   :  { %v20212_v5 = vpop.f32.mrb[63].mxu0 }
0x21dd   :  { %v23625_v13 = vpop.f32.mrb[68].mxu1 }
0x21de   :  { %v24364_v39 = vadd.f32 %v23625_v13, %v23490_v16  ;;  %v20751_v47 = vpop.f32.mrb[69].mxu1 }
0x21df   :  { %v24365_v1 = vadd.f32 %v20751_v47, %v20212_v5 }
0x21e0   :  { %v20762_v20 = vadd.f32 %v24364_v39, %v26309_v55  ;;  %v20794_v55 = vand.u32 4294901760, %v20783_v34 }
0x21e1   :  { %v20761_v6 = vadd.f32 %v24365_v1, %v26312_v46  ;;  %v20786_v46 = vld [vmem:[#allocation10 + $0x18] sm:$0xff] }
0x21e2   :  { %v20764_v31 = vadd.f32 %v20762_v20, %v27028_v49  ;;  %v20803_v49 = vand.u32 4294901760, %v20786_v46  ;;  %v27301_v61 = vpack.c.bf16 %v20797_v24, %v20794_v55  ;;  %v20884_v51 = vsub.f32 %v20783_v34, %v20794_v55 }
0x21e3   :  { %v20763_v38 = vadd.f32 %v20761_v6, %v26931_v56 }
0x21e4   :  { %v20766_v37 = vmul.f32 0.5, %v20764_v31  ;;  %v27303_v56 = vpack.c.bf16 %v20803_v49, %v20800_v32  ;;  %24317 = vmatprep.subr.bf16.mxu0 %v27301_v61  ;;  %v20885_v22 = vand.u32 4294901760, %v20884_v51  ;;  %v20905_v9 = vsub.f32 %v20786_v46, %v20803_v49 }
0x21e5   :  { %v20765_v44 = vmul.f32 0.5, %v20763_v38  ;;  %24319 = vmatpush3.bf16.msra.mxu0 %v27301_v61  ;;  %v24332_v0 = vpack.c.bf16 %v20891_v15, %v20884_v51 }
0x21e6   :  { %v20768_v25 = vmul.f32 %v20766_v37, %v20766_v37  ;;  %24321 = vmatprep.subr.bf16.mxu0 %v27303_v56  ;;  %v20886_v7 = vsub.f32 %v20884_v51, %v20885_v22  ;;  %v20906_v42 = vand.u32 4294901760, %v20905_v9  ;;  %v24336_v48 = vpack.c.bf16 %v20905_v9, %v20898_v12 }
0x21e7   :  { %v20767_v45 = vmul.f32 %v20765_v44, %v20765_v44  ;;  %v24348_v53 = vpack.c.bf16 %v20892_v18, %v20885_v22 }
0x21e8   :  { %v20772_v63 = vsel %vm111_vm0, %v20768_v25, 0.0  ;;  %v20887_v3 = vand.u32 4294901760, %v20886_v7  ;;  %v20907_v27 = vsub.f32 %v20905_v9, %v20906_v42  ;;  %v24352_v40 = vpack.c.bf16 %v20906_v42, %v20899_v60 }
0x21e9   :  { %20773 = vadd.xlane.f32.xlu1 %v20772_v63  ;;  %v20769_v35 = vsel %vm111_vm0, %v20767_v45, 0.0  ;;  %24323 = vmatpush3.bf16.msra.mxu0 %v27303_v56 }
0x21ea   :  { %20770 = vadd.xlane.f32.xlu0 %v20769_v35  ;;  %v24324_v58 = vpack.c.bf16 %v20894_v23, %v20887_v3  ;;  %v20908_v29 = vand.u32 4294901760, %v20907_v27 }
0x21ec   :  { %24325 = vmatprep.subr.bf16.mxu0 %v24324_v58  ;;  %v24328_v14 = vpack.c.bf16 %v20908_v29, %v20901_v11 }
0x2276   :  { %v20774_v57 = vpop.xlane.xlu1 %20773 }
0x2277   :  { %v20776_v10 = vmul.f32 0.03125, %v20774_v57  ;;  %v20771_v8 = vpop.xlane.xlu0 %20770 }
0x2278   :  { %v20775_v2 = vmul.f32 0.03125, %v20771_v8 }
0x2279   :  { %v20778_v28 = vadd.f32 1e-05, %v20776_v10 }
0x227a   :  { %v20777_v30 = vadd.f32 1e-05, %v20775_v2 }
0x227b   :  { %24915 = vrsqrt.f32 %v20778_v28 }
0x227c   :  { %24917 = vrsqrt.f32 %v20777_v30 }
0x2285   :  { %v24916_v36 = vpop.eup %24915 }
0x2286   :  { %v24918_v21 = vpop.eup %24917  ;;  %v20782_v59 = vmul.f32 %v24916_v36, %v20766_v37 }
0x2287   :  { %v20781_v43 = vmul.f32 %v24918_v21, %v20765_v44 }
0x2288   :  { %v20791_v26 = vsel %vm111_vm0, %v20782_v59, 0 }
0x2289   :  { %v20788_v33 = vsel %vm111_vm0, %v20781_v43, 0  ;;  %v20872_v4 = vand.u32 4294901760, %v20791_v26 }
0x228a   :  { %v20862_v19 = vand.u32 4294901760, %v20788_v33 }
0x228b   :  { %v20873_v50 = vsub.f32 %v20791_v26, %v20872_v4 }
0x228c   :  { %v20863_v17 = vsub.f32 %v20788_v33, %v20862_v19 }
0x228d   :  { %v20874_v16 = vand.u32 4294901760, %v20873_v50 }
0x228e   :  { %v20864_v5 = vand.u32 4294901760, %v20863_v17 }
0x228f   :  { %v20875_v13 = vsub.f32 %v20873_v50, %v20874_v16 }
0x2290   :  { %v20865_v39 = vsub.f32 %v20863_v17, %v20864_v5 }
0x2291   :  { %v20876_v1 = vand.u32 4294901760, %v20875_v13 }
0x2292   :  { %v20866_v47 = vand.u32 4294901760, %v20865_v39 }
0x2294   :  { %23634 = vmatprep.mubr.f32.mxu0 %v20866_v47 }
0x2295   :  { %23635 = vmatmul.mubr.f32.vlgmr.msra.gmra.mrb[64].mxu0 %v20876_v1 }
0x2296   :  { %24327 = vmatpush3.bf16.msra.mxu0 %v24324_v58  ;;  %23645 = vmatprep.mubr.f32.mxu0 %v20862_v19 }
0x2297   :  { %24329 = vmatprep.subr.bf16.mxu0 %v24328_v14 }
0x229a   :  { %24331 = vmatpush3.bf16.msra.mxu0 %v24328_v14 }
0x229b   :  { %24333 = vmatprep.subr.bf16.mxu0 %v24332_v0 }
0x229d   :  { %23646 = vmatmul.mubr.f32.vlgmr.msra.gmra.mrb[64].mxu0 %v20872_v4 }
0x229e   :  { %24335 = vmatpush3.bf16.msra.mxu0 %v24332_v0  ;;  %23656 = vmatprep.mubr.f32.mxu0 %v20863_v17 }
0x229f   :  { %24337 = vmatprep.subr.bf16.mxu0 %v24336_v48 }
0x22a2   :  { %24339 = vmatpush3.bf16.msra.mxu0 %v24336_v48 }
0x22a3   :  { %24341 = vmatprep.subr.bf16.mxu0 %v27301_v61 }
0x22a5   :  { %23657 = vmatmul.mubr.f32.vlgmr.msra.gmra.mrb[64].mxu0 %v20873_v50 }
0x22a6   :  { %24343 = vmatpush3.bf16.msra.mxu0 %v27301_v61  ;;  %23667 = vmatprep.mubr.f32.mxu0 %v20864_v5 }
0x22a7   :  { %24345 = vmatprep.subr.bf16.mxu0 %v27303_v56 }
0x22aa   :  { %24347 = vmatpush3.bf16.msra.mxu0 %v27303_v56 }
0x22ab   :  { %24349 = vmatprep.subr.bf16.mxu0 %v24348_v53 }
0x22ad   :  { %23668 = vmatmul.mubr.f32.vlgmr.msra.gmra.mrb[64].mxu0 %v20874_v16 }
0x22ae   :  { %24351 = vmatpush3.bf16.msra.mxu0 %v24348_v53  ;;  %23678 = vmatprep.mubr.f32.mxu0 %v20862_v19 }
0x22af   :  { %24353 = vmatprep.subr.bf16.mxu0 %v24352_v40 }
0x22b2   :  { %24355 = vmatpush3.bf16.msra.mxu0 %v24352_v40 }
0x22b3   :  { %24357 = vmatprep.subr.bf16.mxu0 %v27301_v61 }
0x22b5   :  { %23679 = vmatmul.mubr.f32.vlgmr.msra.gmra.mrb[64].mxu0 %v20872_v4 }
0x22b6   :  { %24359 = vmatpush3.bf16.msra.mxu0 %v27301_v61  ;;  %23689 = vmatprep.mubr.f32.mxu0 %v20862_v19 }
0x22b7   :  { %24361 = vmatprep.subr.bf16.mxu0 %v27303_v56 }
0x22ba   :  { %24363 = vmatpush3.bf16.msra.mxu0 %v27303_v56 }
0x22bd   :  { %23690 = vmatmul.mubr.f32.vlgmr.msra.gmra.mrb[64].mxu0 %v20872_v4 }
0x2390   :  { %v23691_v20 = vpop.f32.mrb[64].mxu0 }
0x2391   :  { %21322 = vst [vmem:[#allocation11 + $0x8] sm:$0xff] %v23691_v20  ;;  %v21311_v6 = vpop.f32.mrb[65].mxu0 }
0x2392   :  { %21321 = vst [vmem:[#allocation11] sm:$0xff] %v21311_v6 }
0x2393   :  { %25046 = shalt.err (!%p25043_p2)
}
0x2394   :  { %s25047_s29 = scalar_lea.hbm %s27342_s8, 256 }
0x2395   :  { %p25048_p3 = scmp.ne.s32.totalorder %s27342_s8, %s25047_s29  ;;  %p25051_p4 = scmp.lt.u32.totalorder %s25047_s29, %s27342_s8 }
0x2397   :  { %p25053_p5 = pnand %p25051_p4, %p25048_p3 }
0x2399   :  { %25056 = shalt.err (!%p25053_p5)
}
0x239a   :  { %21334 = dma.vmem_to_hbm [thread:$0]  %s21329_s15, 256, %s27342_s8, [#allocation4], %s25067_s17, %s25067_s17, %s25068_s18  }
0x239b   :  { %25063 = dma.done.wait [#allocation4], 256  }
0x239c   :  { %25064 = vsyncadd [#allocation4], 4294967040 }
0x239d   :  { %21338 = vsyncpa [#allocation3], 1 }
0x239e   :  { %21339 = vsyncpa [#allocation6], 1 }
0x239f   :  { %21340 = vsyncpa [#allocation9], 1 }
0x23a0   :  { %21341 = vsyncpa [#allocation4], 1 }

</bundles_post_ra>
